<compile_context>
chip_gen: v7x
topology: tpu7x:2x2x1
jax: 0.10.0
libtpu: 0.0.40
codegen_flags: <defaults>
</compile_context>

<pallas_src>
import jax
import jax.numpy as jnp
from jax.experimental import pallas as pl
from jax.experimental.pallas import tpu as pltpu

INPUT_DIM = 784
HIDDEN_DIM = 32
OUTPUT_DIM = 10
OUT_PAD = 128  # lane-dense output width


def mlp_kernel(x_ref, w1_ref, b1_ref, w2_ref, b2_ref, o_ref):
    # hidden = ReLU(X @ W1 + b1): bf16 x bf16 -> f32 accumulate on the MXU.
    h = jnp.dot(x_ref[...], w1_ref[...], preferred_element_type=jnp.float32)
    h = jnp.maximum(h + b1_ref[...], 0.0)               # (bm, H) + (1, H)
    # out = sigmoid(hidden @ W2 + b2): tiny f32 matmul, padded to 128 lanes.
    y = jnp.dot(h, w2_ref[...], preferred_element_type=jnp.float32)
    o_ref[...] = jax.nn.sigmoid(y + b2_ref[...])         # (bm, 128) lane-dense store


def classifier_forward(x, w1, b1, w2, b2, *, block_b=1024):
    """x: (B, 784) f32; w1: (784, H); b1: (H,); w2: (H, O); b2: (O,)."""
    B, D = x.shape
    H = w1.shape[1]
    O = w2.shape[1]

    # block_b must be a multiple of 16 (bf16 sublane pack) and of 8.
    assert block_b % 16 == 0

    # Pad batch to a multiple of block_b (padded rows sliced off afterwards).
    n_blocks = pl.cdiv(B, block_b)
    B_pad = n_blocks * block_b
    if B_pad != B:
        x = jnp.pad(x, ((0, B_pad - B), (0, 0)))

    # bf16 inputs to the first (HBM-bound) matmul; f32 everywhere else.
    x_bf16 = x.astype(jnp.bfloat16)
    w1_bf16 = w1.astype(jnp.bfloat16)

    b1_2d = b1.reshape(1, H).astype(jnp.float32)

    # Pad the output projection to 128 lanes with zero columns (zero bias).
    w2_pad = jnp.zeros((H, OUT_PAD), jnp.float32).at[:, :O].set(w2.astype(jnp.float32))
    b2_pad = jnp.zeros((1, OUT_PAD), jnp.float32).at[:, :O].set(b2.astype(jnp.float32))

    out_pad = pl.pallas_call(
        mlp_kernel,
        out_shape=jax.ShapeDtypeStruct((B_pad, OUT_PAD), jnp.float32),
        grid_spec=pltpu.PrefetchScalarGridSpec(
            num_scalar_prefetch=0,
            grid=(n_blocks,),
            in_specs=[
                pl.BlockSpec((block_b, D), lambda i: (i, 0)),    # X tile over batch
                pl.BlockSpec((D, H), lambda i: (0, 0)),          # W1 (resident, bf16)
                pl.BlockSpec((1, H), lambda i: (0, 0)),          # b1
                pl.BlockSpec((H, OUT_PAD), lambda i: (0, 0)),    # W2 (padded, resident)
                pl.BlockSpec((1, OUT_PAD), lambda i: (0, 0)),    # b2 (padded)
            ],
            out_specs=pl.BlockSpec((block_b, OUT_PAD), lambda i: (i, 0)),
        ),
        compiler_params=pltpu.CompilerParams(
            dimension_semantics=("parallel",),
        ),
    )(x_bf16, w1_bf16, b1_2d, w2_pad, b2_pad)

    # Strip batch padding and lane padding.
    return out_pad[:B, :O]


def init_params(key):
    """Deterministic init mimicking PyTorch Linear default (U[-1/sqrt(fan_in), +])."""
    k1, k2, k3, k4 = jax.random.split(key, 4)
    bound1 = 1.0 / (INPUT_DIM ** 0.5)
    bound2 = 1.0 / (HIDDEN_DIM ** 0.5)
    # Stored already transposed: (in, out)
    w1 = jax.random.uniform(k1, (INPUT_DIM, HIDDEN_DIM), jnp.float32, -bound1, bound1)
    b1 = jax.random.uniform(k2, (HIDDEN_DIM,), jnp.float32, -bound1, bound1)
    w2 = jax.random.uniform(k3, (HIDDEN_DIM, OUTPUT_DIM), jnp.float32, -bound2, bound2)
    b2 = jax.random.uniform(k4, (OUTPUT_DIM,), jnp.float32, -bound2, bound2)
    return w1, b1, w2, b2


if __name__ == "__main__":
    key = jax.random.PRNGKey(0)
    kx, kp = jax.random.split(key)

    # Small, non-multiple-of-block_b batch to exercise the cdiv + padding path.
    B = 200
    x = jax.random.uniform(kx, (B, INPUT_DIM), jnp.float32, 0.0, 1.0)
    w1, b1, w2, b2 = init_params(kp)

    out = classifier_forward(x, w1, b1, w2, b2, block_b=1024)
    out = jax.block_until_ready(out)

    # Pure-JAX f32 reference; tolerance loosened for the bf16 first matmul.
    h_ref = jnp.maximum(x @ w1 + b1, 0.0)
    y_ref = jax.nn.sigmoid(h_ref @ w2 + b2)
    assert out.shape == (B, OUTPUT_DIM)
    assert jnp.allclose(out, y_ref, atol=3e-2, rtol=3e-2), float(jnp.max(jnp.abs(out - y_ref)))

    print("KERNEL_OK")
</pallas_src>

<mosaic_0001>
module attributes {stable_mosaic.version = 11 : i64} {
  func.func @mlp_kernel(%arg0: i32, %arg1: memref<1024x784xbf16, #tpu.memory_space<vmem>>, %arg2: memref<784x32xbf16, #tpu.memory_space<vmem>>, %arg3: memref<1x32xf32, #tpu.memory_space<vmem>>, %arg4: memref<32x128xf32, #tpu.memory_space<vmem>>, %arg5: memref<1x128xf32, #tpu.memory_space<vmem>>, %arg6: memref<1024x128xf32, #tpu.memory_space<vmem>>) attributes {dimension_semantics = [#tpu.dimension_semantics<parallel>], iteration_bounds = array<i64: 1>, scalar_prefetch = 0 : i64, scratch_operands = 0 : i64, tpu.core_type = #tpu.core_type<tc>, window_params = [{transform_indices = @transform_0, window_bounds = array<i64: 1024, 784>}, {pipeline_mode = #tpu.pipeline_mode<synchronous>, transform_indices = @transform_1, window_bounds = array<i64: 784, 32>}, {pipeline_mode = #tpu.pipeline_mode<synchronous>, transform_indices = @transform_2, window_bounds = array<i64: 1, 32>}, {pipeline_mode = #tpu.pipeline_mode<synchronous>, transform_indices = @transform_3, window_bounds = array<i64: 32, 128>}, {pipeline_mode = #tpu.pipeline_mode<synchronous>, transform_indices = @transform_4, window_bounds = array<i64: 1, 128>}, {transform_indices = @transform_5, window_bounds = array<i64: 1024, 128>}]} {
    %c0 = arith.constant 0 : index
    %c0_0 = arith.constant 0 : index
    %0 = vector.load %arg1[%c0, %c0_0] : memref<1024x784xbf16, #tpu.memory_space<vmem>>, vector<1024x784xbf16>
    %c0_1 = arith.constant 0 : index
    %c0_2 = arith.constant 0 : index
    %1 = vector.load %arg2[%c0_1, %c0_2] : memref<784x32xbf16, #tpu.memory_space<vmem>>, vector<784x32xbf16>
    %cst = arith.constant dense<0.000000e+00> : vector<1024x32xf32>
    %2 = tpu.matmul %0, %1, %cst {dimension_numbers = #tpu.dot_dimension_numbers<[1], [0], [0], [1], [0, 0, 1, 1], [], []>} : vector<1024x784xbf16>, vector<784x32xbf16>, vector<1024x32xf32> -> vector<1024x32xf32>
    %c0_3 = arith.constant 0 : index
    %c0_4 = arith.constant 0 : index
    %3 = vector.load %arg3[%c0_3, %c0_4] : memref<1x32xf32, #tpu.memory_space<vmem>>, vector<1x32xf32>
    %4 = vector.broadcast %3 : vector<1x32xf32> to vector<1024x32xf32>
    %5 = arith.addf %2, %4 : vector<1024x32xf32>
    %cst_5 = arith.constant 0.000000e+00 : f32
    %6 = vector.broadcast %cst_5 : f32 to vector<1024x32xf32>
    %7 = arith.maximumf %5, %6 : vector<1024x32xf32>
    %c0_6 = arith.constant 0 : index
    %c0_7 = arith.constant 0 : index
    %8 = vector.load %arg4[%c0_6, %c0_7] : memref<32x128xf32, #tpu.memory_space<vmem>>, vector<32x128xf32>
    %cst_8 = arith.constant dense<0.000000e+00> : vector<1024x128xf32>
    %9 = tpu.matmul %7, %8, %cst_8 {dimension_numbers = #tpu.dot_dimension_numbers<[1], [0], [0], [1], [0, 0, 1, 1], [], []>} : vector<1024x32xf32>, vector<32x128xf32>, vector<1024x128xf32> -> vector<1024x128xf32>
    %c0_9 = arith.constant 0 : index
    %c0_10 = arith.constant 0 : index
    %10 = vector.load %arg5[%c0_9, %c0_10] : memref<1x128xf32, #tpu.memory_space<vmem>>, vector<1x128xf32>
    %11 = vector.broadcast %10 : vector<1x128xf32> to vector<1024x128xf32>
    %12 = arith.addf %9, %11 : vector<1024x128xf32>
    %13 = arith.negf %12 : vector<1024x128xf32>
    %14 = math.exp %13 : vector<1024x128xf32>
    %cst_11 = arith.constant 1.000000e+00 : f32
    %15 = vector.broadcast %cst_11 : f32 to vector<1024x128xf32>
    %16 = arith.addf %15, %14 : vector<1024x128xf32>
    %17 = arith.divf %15, %16 : vector<1024x128xf32>
    %c0_12 = arith.constant 0 : index
    %c0_13 = arith.constant 0 : index
    %18 = vector.load %arg6[%c0_12, %c0_13] : memref<1024x128xf32, #tpu.memory_space<vmem>>, vector<1024x128xf32>
    tpu.vector_store %arg6[%c0_12, %c0_13], %17 {strides = array<i32>} : memref<1024x128xf32, #tpu.memory_space<vmem>>, vector<1024x128xf32>,
    return
  }
  func.func @transform_0(%arg0: i32) -> (i32, i32) {
    %c0_i32 = arith.constant 0 : i32
    %c0_i32_0 = arith.constant 0 : i32
    return %arg0, %c0_i32 : i32, i32
  }
  func.func @transform_1(%arg0: i32) -> (i32, i32) {
    %c0_i32 = arith.constant 0 : i32
    %c0_i32_0 = arith.constant 0 : i32
    %c0_i32_1 = arith.constant 0 : i32
    return %c0_i32, %c0_i32_0 : i32, i32
  }
  func.func @transform_2(%arg0: i32) -> (i32, i32) {
    %c0_i32 = arith.constant 0 : i32
    %c0_i32_0 = arith.constant 0 : i32
    %c0_i32_1 = arith.constant 0 : i32
    return %c0_i32, %c0_i32_0 : i32, i32
  }
  func.func @transform_3(%arg0: i32) -> (i32, i32) {
    %c0_i32 = arith.constant 0 : i32
    %c0_i32_0 = arith.constant 0 : i32
    %c0_i32_1 = arith.constant 0 : i32
    return %c0_i32, %c0_i32_0 : i32, i32
  }
  func.func @transform_4(%arg0: i32) -> (i32, i32) {
    %c0_i32 = arith.constant 0 : i32
    %c0_i32_0 = arith.constant 0 : i32
    %c0_i32_1 = arith.constant 0 : i32
    return %c0_i32, %c0_i32_0 : i32, i32
  }
  func.func @transform_5(%arg0: i32) -> (i32, i32) {
    %c0_i32 = arith.constant 0 : i32
    %c0_i32_0 = arith.constant 0 : i32
    return %arg0, %c0_i32 : i32, i32
  }
}

</mosaic_0001>

<bundles_post_ra>
// kernel: tpu_custom_call.1
= control target key start
LH: loop header
LB: loop body
LE: loop exit
PB: predicated region body
PF: predicated region fallthrough
CT: control target
= control target key end

     0   :  { %v10788_v1 = vmov 0   ;;  %s13633_s0 = inlined_call_operand.vmem [shape: bf16[1024,784], index: 0, kind: input, shape index: {}]   ;;  %s13634_s1 = inlined_call_operand.vmem [shape: bf16[784,32], index: 1, kind: input, shape index: {}]   ;;  %s13635_s2 = inlined_call_operand.vmem [shape: f32[1,32], index: 2, kind: input, shape index: {}]   ;;  %s13636_s3 = inlined_call_operand.vmem [shape: f32[32,128], index: 3, kind: input, shape index: {}]   ;;  %s13637_s4 = inlined_call_operand.vmem [shape: f32[1,128], index: 4, kind: input, shape index: {}]   ;;  %s13638_s5 = inlined_call_operand.hbm [shape: f32[1024,128], index: 5, kind: output, shape index: {}]  }
   0x1   :  { %v9557_v0 = vld [vmem:[%s13634_s1] sm:$0xff]   ;;  %3366 = vmatprep.subr.bf16.mxu1 %v10788_v1  ;;  %3911 = vmatprep.subr.bf16.mxu0 %v10788_v1  ;;  %v9559_v3 = vld [vmem:[%s13634_s1 + $0x8] sm:$0xff]   ;;  %v9561_v5 = vld [vmem:[%s13634_s1 + $0x10] sm:$0xff]  }
   0x2   :  { %v9558_v2 = vld [vmem:[%s13634_s1 + $0x80] sm:$0xff]   ;;  %3367 = vmatpush1.bf16.msra.mxu1 %v9557_v0  ;;  %v9560_v4 = vld [vmem:[%s13634_s1 + $0x88] sm:$0xff]   ;;  %v9562_v6 = vld [vmem:[%s13634_s1 + $0x90] sm:$0xff]  }
   0x3   :  { %3912 = vmatpush1.bf16.msra.mxu0 %v9558_v2  ;;  %3368 = vmatprep.subr.bf16.mxu1 %v10788_v1  ;;  %v9563_v7 = vld [vmem:[%s13634_s1 + $0x18] sm:$0xff]   ;;  %v9565_v9 = vld [vmem:[%s13634_s1 + $0x20] sm:$0xff]   ;;  %v9567_v11 = vld [vmem:[%s13634_s1 + $0x28] sm:$0xff]  }
   0x4   :  { %3913 = vmatprep.subr.bf16.mxu0 %v10788_v1  ;;  %v9564_v8 = vld [vmem:[%s13634_s1 + $0x98] sm:$0xff]   ;;  %v9566_v10 = vld [vmem:[%s13634_s1 + $0xa0] sm:$0xff]   ;;  %v9568_v12 = vld [vmem:[%s13634_s1 + $0xa8] sm:$0xff]  }
   0x5   :  { %v9569_v13 = vld [vmem:[%s13634_s1 + $0x30] sm:$0xff]   ;;  %v9571_v15 = vld [vmem:[%s13634_s1 + $0x38] sm:$0xff]   ;;  %v9573_v17 = vld [vmem:[%s13634_s1 + $0x40] sm:$0xff]  }
   0x6   :  { %3369 = vmatpush1.bf16.msra.mxu1 %v9559_v3  ;;  %v9570_v14 = vld [vmem:[%s13634_s1 + $0xb0] sm:$0xff]   ;;  %v9572_v16 = vld [vmem:[%s13634_s1 + $0xb8] sm:$0xff]   ;;  %v9574_v18 = vld [vmem:[%s13634_s1 + $0xc0] sm:$0xff]  }
   0x7   :  { %3914 = vmatpush1.bf16.msra.mxu0 %v9560_v4  ;;  %3370 = vmatprep.subr.bf16.mxu1 %v10788_v1  ;;  %v9591_v19 = vld [vmem:[%s13633_s0 + $0x4] ss:$28 sps:$4 sm:$0xff]   ;;  %v9575_v20 = vld [vmem:[%s13634_s1 + $0x48] sm:$0xff]   ;;  %v9577_v23 = vld [vmem:[%s13634_s1 + $0x50] sm:$0xff]  }
   0x8   :  { %3915 = vmatprep.subr.bf16.mxu0 %v10788_v1  ;;  %v9594_v21 = vld [vmem:[%s13633_s0 + $0xc] ss:$28 sps:$4 sm:$0xff]   ;;  %3398 = vmatprep.mubr.bf16.mxu1 %v9591_v19  ;;  %v9578_v24 = vld [vmem:[%s13634_s1 + $0xd0] sm:$0xff]   ;;  %v9579_v25 = vld [vmem:[%s13634_s1 + $0x58] sm:$0xff]  }
   0x9   :  { %v9576_v22 = vld [vmem:[%s13634_s1 + $0xc8] sm:$0xff]   ;;  %3943 = vmatprep.mubr.bf16.mxu0 %v9594_v21  ;;  %v9580_v26 = vld [vmem:[%s13634_s1 + $0xd8] sm:$0xff]   ;;  %v9581_v27 = vld [vmem:[%s13634_s1 + $0x60] sm:$0xff]  }
   0xa   :  { %3371 = vmatpush1.bf16.msra.mxu1 %v9561_v5  ;;  %v9582_v28 = vld [vmem:[%s13634_s1 + $0xe0] sm:$0xff]   ;;  %v9583_v29 = vld [vmem:[%s13634_s1 + $0x68] sm:$0xff]   ;;  %v9585_v31 = vld [vmem:[%s13634_s1 + $0x70] sm:$0xff]  }
   0xb   :  { %3916 = vmatpush1.bf16.msra.mxu0 %v9562_v6  ;;  %3372 = vmatprep.subr.bf16.mxu1 %v10788_v1  ;;  %v9584_v30 = vld [vmem:[%s13634_s1 + $0xe8] sm:$0xff]   ;;  %v9586_v32 = vld [vmem:[%s13634_s1 + $0xf0] sm:$0xff]   ;;  %v9587_v33 = vld [vmem:[%s13634_s1 + $0x78] sm:$0xff]  }
   0xc   :  { %3917 = vmatprep.subr.bf16.mxu0 %v10788_v1  ;;  %v9588_v34 = vld [vmem:[%s13634_s1 + $0xf8] sm:$0xff]   ;;  %v9592_v36 = vld [vmem:[%s13633_s0 + $0x8] ss:$28 sps:$4 sm:$0xff]   ;;  %v9602_v43 = vld [vmem:[%s13633_s0 + $0x74] ss:$28 sps:$4 sm:$0xff]  }
   0xd   :  { %v9589_v35 = vld [vmem:[%s13633_s0] ss:$28 sps:$4 sm:$0xff]   ;;  %v9620_v40 = vld [vmem:[%s13634_s1 + $0x108] sm:$0xff]   ;;  %v9600_v41 = vld [vmem:[%s13633_s0 + $0x38] ss:$28 sps:$4 sm:$0xff]  }
   0xe   :  { %3373 = vmatpush1.bf16.msra.mxu1 %v9563_v7  ;;  %v9596_v37 = vld [vmem:[%s13633_s0 + $0x3c] ss:$28 sps:$4 sm:$0xff]   ;;  %v9595_v38 = vld [vmem:[%s13634_s1 + $0x100] sm:$0xff]   ;;  %v9645_v45 = vld [vmem:[%s13634_s1 + $0x110] sm:$0xff]  }
   0xf   :  { %3918 = vmatpush1.bf16.msra.mxu0 %v9564_v8  ;;  %3374 = vmatprep.subr.bf16.mxu1 %v10788_v1  ;;  %v9598_v39 = vld [vmem:[%s13633_s0 + $0x44] ss:$28 sps:$4 sm:$0xff]   ;;  %v9604_v44 = vld [vmem:[%s13633_s0 + $0x7c] ss:$28 sps:$4 sm:$0xff]   ;;  %v9606_v47 = vld [vmem:[%s13633_s0 + $0x70] ss:$28 sps:$4 sm:$0xff]  }
  0x10   :  { %3919 = vmatprep.subr.bf16.mxu0 %v10788_v1  ;;  %v9601_v42 = vld [vmem:[%s13633_s0 + $0x40] ss:$28 sps:$4 sm:$0xff]   ;;  %v9607_v48 = vld [vmem:[%s13633_s0 + $0x78] ss:$28 sps:$4 sm:$0xff]   ;;  %v9608_v49 = vld [vmem:[%s13633_s0 + $0xac] ss:$28 sps:$4 sm:$0xff]  }
  0x11   :  { %v9670_v46 = vld [vmem:[%s13634_s1 + $0x118] sm:$0xff]   ;;  %v9610_v50 = vld [vmem:[%s13633_s0 + $0xb4] ss:$28 sps:$4 sm:$0xff]   ;;  %v9695_v51 = vld [vmem:[%s13634_s1 + $0x120] sm:$0xff]  }
  0x12   :  { %3375 = vmatpush1.bf16.msra.mxu1 %v9565_v9  ;;  %v9612_v52 = vld [vmem:[%s13633_s0 + $0xa8] ss:$28 sps:$4 sm:$0xff]   ;;  %v9613_v53 = vld [vmem:[%s13633_s0 + $0xb0] ss:$28 sps:$4 sm:$0xff]   ;;  %v9618_v56 = vld [vmem:[%s13633_s0 + $0xe0] ss:$28 sps:$4 sm:$0xff]  }
  0x13   :  { %3920 = vmatpush1.bf16.msra.mxu0 %v9566_v10  ;;  %3376 = vmatprep.subr.bf16.mxu1 %v10788_v1  ;;  %v9614_v54 = vld [vmem:[%s13633_s0 + $0xe4] ss:$28 sps:$4 sm:$0xff]   ;;  %v9616_v55 = vld [vmem:[%s13633_s0 + $0xec] ss:$28 sps:$4 sm:$0xff]   ;;  %v9621_v58 = vld [vmem:[%s13633_s0 + $0x11c] ss:$28 sps:$4 sm:$0xff]  }
  0x14   :  { %3921 = vmatprep.subr.bf16.mxu0 %v10788_v1  ;;  %v9619_v57 = vld [vmem:[%s13633_s0 + $0xe8] ss:$28 sps:$4 sm:$0xff]   ;;  %v9625_v61 = vld [vmem:[%s13633_s0 + $0x118] ss:$28 sps:$4 sm:$0xff]   ;;  %v9626_v62 = vld [vmem:[%s13633_s0 + $0x120] ss:$28 sps:$4 sm:$0xff]  }
  0x15   :  { %v9623_v59 = vld [vmem:[%s13633_s0 + $0x124] ss:$28 sps:$4 sm:$0xff]   ;;  %v9720_v60 = vld [vmem:[%s13634_s1 + $0x128] sm:$0xff]   ;;  %v9627_v63 = vld [vmem:[%s13633_s0 + $0x154] ss:$28 sps:$4 sm:$0xff]  }
  0x16   :  { %3377 = vmatpush1.bf16.msra.mxu1 %v9567_v11  ;;  %v9629_v0 = vld [vmem:[%s13633_s0 + $0x15c] ss:$28 sps:$4 sm:$0xff]   ;;  %v9631_v2 = vld [vmem:[%s13633_s0 + $0x150] ss:$28 sps:$4 sm:$0xff]   ;;  %v9637_v6 = vld [vmem:[%s13633_s0 + $0x188] ss:$28 sps:$4 sm:$0xff]  }
  0x17   :  { %3922 = vmatpush1.bf16.msra.mxu0 %v9568_v12  ;;  %3378 = vmatprep.subr.bf16.mxu1 %v10788_v1  ;;  %v9632_v3 = vld [vmem:[%s13633_s0 + $0x158] ss:$28 sps:$4 sm:$0xff]   ;;  %v9633_v4 = vld [vmem:[%s13633_s0 + $0x18c] ss:$28 sps:$4 sm:$0xff]   ;;  %v9639_v8 = vld [vmem:[%s13633_s0 + $0x1c4] ss:$28 sps:$4 sm:$0xff]  }
  0x18   :  { %3923 = vmatprep.subr.bf16.mxu0 %v10788_v1  ;;  %v9635_v5 = vld [vmem:[%s13633_s0 + $0x194] ss:$28 sps:$4 sm:$0xff]   ;;  %v9641_v9 = vld [vmem:[%s13633_s0 + $0x1cc] ss:$28 sps:$4 sm:$0xff]   ;;  %v9643_v10 = vld [vmem:[%s13633_s0 + $0x1c0] ss:$28 sps:$4 sm:$0xff]  }
  0x19   :  { %v9638_v7 = vld [vmem:[%s13633_s0 + $0x190] ss:$28 sps:$4 sm:$0xff]   ;;  %v9644_v11 = vld [vmem:[%s13633_s0 + $0x1c8] ss:$28 sps:$4 sm:$0xff]   ;;  %v9646_v12 = vld [vmem:[%s13633_s0 + $0x1fc] ss:$28 sps:$4 sm:$0xff]  }
  0x1a   :  { %3379 = vmatpush1.bf16.msra.mxu1 %v9569_v13  ;;  %v9648_v13 = vld [vmem:[%s13633_s0 + $0x204] ss:$28 sps:$4 sm:$0xff]   ;;  %v9656_v19 = vld [vmem:[%s13633_s0 + $0x230] ss:$28 sps:$4 sm:$0xff]  }
  0x1b   :  { %3924 = vmatpush1.bf16.msra.mxu0 %v9570_v14  ;;  %3380 = vmatprep.subr.bf16.mxu1 %v10788_v1  ;;  %v9745_v14 = vld [vmem:[%s13634_s1 + $0x130] sm:$0xff]   ;;  %v9658_v21 = vld [vmem:[%s13633_s0 + $0x26c] ss:$28 sps:$4 sm:$0xff]  }
  0x1c   :  { %3925 = vmatprep.subr.bf16.mxu0 %v10788_v1 }
  0x1e   :  { %3381 = vmatpush1.bf16.msra.mxu1 %v9571_v15  ;;  %v9650_v15 = vld [vmem:[%s13633_s0 + $0x1f8] ss:$28 sps:$4 sm:$0xff]  }
  0x1f   :  { %3926 = vmatpush1.bf16.msra.mxu0 %v9572_v16  ;;  %3382 = vmatprep.subr.bf16.mxu1 %v10788_v1  ;;  %v9651_v16 = vld [vmem:[%s13633_s0 + $0x200] ss:$28 sps:$4 sm:$0xff]  }
  0x20   :  { %3927 = vmatprep.subr.bf16.mxu0 %v10788_v1 }
  0x22   :  { %3383 = vmatpush1.bf16.msra.mxu1 %v9573_v17  ;;  %v9652_v17 = vld [vmem:[%s13633_s0 + $0x234] ss:$28 sps:$4 sm:$0xff]  }
  0x23   :  { %3928 = vmatpush1.bf16.msra.mxu0 %v9574_v18  ;;  %3384 = vmatprep.subr.bf16.mxu1 %v10788_v1  ;;  %v9654_v18 = vld [vmem:[%s13633_s0 + $0x23c] ss:$28 sps:$4 sm:$0xff]  }
  0x24   :  { %3929 = vmatprep.subr.bf16.mxu0 %v10788_v1 }
  0x26   :  { %3385 = vmatpush1.bf16.msra.mxu1 %v9575_v20  ;;  %v9657_v20 = vld [vmem:[%s13633_s0 + $0x238] ss:$28 sps:$4 sm:$0xff]  }
  0x27   :  { %3930 = vmatpush1.bf16.msra.mxu0 %v9576_v22  ;;  %3386 = vmatprep.subr.bf16.mxu1 %v10788_v1  ;;  %v9660_v22 = vld [vmem:[%s13633_s0 + $0x274] ss:$28 sps:$4 sm:$0xff]  }
  0x28   :  { %3931 = vmatprep.subr.bf16.mxu0 %v10788_v1 }
  0x2a   :  { %3387 = vmatpush1.bf16.msra.mxu1 %v9577_v23  ;;  %v9662_v23 = vld [vmem:[%s13633_s0 + $0x268] ss:$28 sps:$4 sm:$0xff]  }
  0x2b   :  { %3932 = vmatpush1.bf16.msra.mxu0 %v9578_v24  ;;  %3388 = vmatprep.subr.bf16.mxu1 %v10788_v1  ;;  %v9663_v24 = vld [vmem:[%s13633_s0 + $0x270] ss:$28 sps:$4 sm:$0xff]  }
  0x2c   :  { %3933 = vmatprep.subr.bf16.mxu0 %v10788_v1 }
  0x2e   :  { %3389 = vmatpush1.bf16.msra.mxu1 %v9579_v25  ;;  %v9664_v25 = vld [vmem:[%s13633_s0 + $0x2a4] ss:$28 sps:$4 sm:$0xff]  }
  0x2f   :  { %3934 = vmatpush1.bf16.msra.mxu0 %v9580_v26  ;;  %3390 = vmatprep.subr.bf16.mxu1 %v10788_v1  ;;  %v9666_v26 = vld [vmem:[%s13633_s0 + $0x2ac] ss:$28 sps:$4 sm:$0xff]  }
  0x30   :  { %3935 = vmatprep.subr.bf16.mxu0 %v10788_v1 }
  0x32   :  { %3391 = vmatpush1.bf16.msra.mxu1 %v9581_v27  ;;  %v9764_v27 = vld [vmem:[%s13634_s1 + $0x180] sm:$0xff]  }
  0x33   :  { %3936 = vmatpush1.bf16.msra.mxu0 %v9582_v28  ;;  %3392 = vmatprep.subr.bf16.mxu1 %v10788_v1  ;;  %v9668_v28 = vld [vmem:[%s13633_s0 + $0x2a0] ss:$28 sps:$4 sm:$0xff]  }
  0x34   :  { %3937 = vmatprep.subr.bf16.mxu0 %v10788_v1 }
  0x36   :  { %3393 = vmatpush1.bf16.msra.mxu1 %v9583_v29  ;;  %v9669_v29 = vld [vmem:[%s13633_s0 + $0x2a8] ss:$28 sps:$4 sm:$0xff]  }
  0x37   :  { %3938 = vmatpush1.bf16.msra.mxu0 %v9584_v30  ;;  %3394 = vmatprep.subr.bf16.mxu1 %v10788_v1  ;;  %v9671_v30 = vld [vmem:[%s13633_s0 + $0x2dc] ss:$28 sps:$4 sm:$0xff]  }
  0x38   :  { %3939 = vmatprep.subr.bf16.mxu0 %v10788_v1 }
  0x3a   :  { %3395 = vmatpush1.bf16.msra.mxu1 %v9585_v31  ;;  %v9673_v31 = vld [vmem:[%s13633_s0 + $0x2e4] ss:$28 sps:$4 sm:$0xff]  }
  0x3b   :  { %3940 = vmatpush1.bf16.msra.mxu0 %v9586_v32  ;;  %3396 = vmatprep.subr.bf16.mxu1 %v10788_v1  ;;  %v9771_v32 = vld [vmem:[%s13634_s1 + $0x138] sm:$0xff]  }
  0x3c   :  { %3941 = vmatprep.subr.bf16.mxu0 %v10788_v1 }
  0x3e   :  { %3397 = vmatpush1.bf16.msra.mxu1 %v9587_v33  ;;  %v9675_v33 = vld [vmem:[%s13633_s0 + $0x2d8] ss:$28 sps:$4 sm:$0xff]  }
  0x3f   :  { %3942 = vmatpush1.bf16.msra.mxu0 %v9588_v34  ;;  %8703 = vmatprep.subr.bf16.mxu1 %v9764_v27  ;;  %v9676_v34 = vld [vmem:[%s13633_s0 + $0x2e0] ss:$28 sps:$4 sm:$0xff]  }
  0x40   :  { %4456 = vmatprep.subr.bf16.mxu0 %v10788_v1 }
  0x41   :  { %3399 = vmatmul.mubr.bf16.vlgmr.msra.gmra.mrb[0].mxu1 %v9589_v35  ;;  %v9677_v35 = vld [vmem:[%s13633_s0 + $0x314] ss:$28 sps:$4 sm:$0xff]  }
  0x42   :  { %3944 = vmatmul.mubr.bf16.vlgmr.msra.gmra.mrb[0].mxu0 %v9592_v36  ;;  %3406 = vmatprep.mubr.bf16.mxu1 %v9596_v37  ;;  %v9679_v36 = vld [vmem:[%s13633_s0 + $0x31c] ss:$28 sps:$4 sm:$0xff]   ;;  %v9681_v37 = vld [vmem:[%s13633_s0 + $0x310] ss:$28 sps:$4 sm:$0xff]  }
  0x43   :  { %4457 = vmatpush1.bf16.msra.mxu0 %v9595_v38  ;;  %3951 = vmatprep.mubr.bf16.mxu0 %v9598_v39  ;;  %v9682_v38 = vld [vmem:[%s13633_s0 + $0x318] ss:$28 sps:$4 sm:$0xff]   ;;  %v9683_v39 = vld [vmem:[%s13633_s0 + $0x34c] ss:$28 sps:$4 sm:$0xff]  }
  0x44   :  { %4458 = vmatprep.subr.bf16.mxu0 %v10788_v1  ;;  %8704 = vmatpush3.bf16.msra.mxu1 %v9764_v27  ;;  %v9758_v27 = vld [vmem:[%s13633_s0 + $0x5ec] ss:$28 sps:$4 sm:$0xff]  }
  0x47   :  { %4459 = vmatpush1.bf16.msra.mxu0 %v9620_v40  ;;  %v9685_v40 = vld [vmem:[%s13633_s0 + $0x354] ss:$28 sps:$4 sm:$0xff]  }
  0x48   :  { %4460 = vmatprep.subr.bf16.mxu0 %v10788_v1 }
  0x49   :  { %3407 = vmatmul.mubr.bf16.gmra.mrb[4].mxu1 %v9600_v41  ;;  %v9687_v41 = vld [vmem:[%s13633_s0 + $0x348] ss:$28 sps:$4 sm:$0xff]  }
  0x4a   :  { %3952 = vmatmul.mubr.bf16.gmra.mrb[4].mxu0 %v9601_v42  ;;  %3414 = vmatprep.mubr.bf16.mxu1 %v9602_v43  ;;  %v9688_v42 = vld [vmem:[%s13633_s0 + $0x350] ss:$28 sps:$4 sm:$0xff]   ;;  %v9689_v43 = vld [vmem:[%s13633_s0 + $0x384] ss:$28 sps:$4 sm:$0xff]  }
  0x4b   :  { %3959 = vmatprep.mubr.bf16.mxu0 %v9604_v44  ;;  %4461 = vmatpush1.bf16.msra.mxu0 %v9645_v45  ;;  %v9691_v44 = vld [vmem:[%s13633_s0 + $0x38c] ss:$28 sps:$4 sm:$0xff]   ;;  %v9693_v45 = vld [vmem:[%s13633_s0 + $0x380] ss:$28 sps:$4 sm:$0xff]  }
  0x4c   :  { %4462 = vmatprep.subr.bf16.mxu0 %v10788_v1 }
  0x4f   :  { %4463 = vmatpush1.bf16.msra.mxu0 %v9670_v46  ;;  %v9694_v46 = vld [vmem:[%s13633_s0 + $0x388] ss:$28 sps:$4 sm:$0xff]  }
  0x50   :  { %4464 = vmatprep.subr.bf16.mxu0 %v10788_v1 }
  0x51   :  { %3415 = vmatmul.mubr.bf16.gmra.mrb[8].mxu1 %v9606_v47  ;;  %v9696_v47 = vld [vmem:[%s13633_s0 + $0x3bc] ss:$28 sps:$4 sm:$0xff]  }
  0x52   :  { %3960 = vmatmul.mubr.bf16.gmra.mrb[8].mxu0 %v9607_v48  ;;  %3422 = vmatprep.mubr.bf16.mxu1 %v9608_v49  ;;  %v9698_v48 = vld [vmem:[%s13633_s0 + $0x3c4] ss:$28 sps:$4 sm:$0xff]  }
  0x53   :  { %3967 = vmatprep.mubr.bf16.mxu0 %v9610_v50  ;;  %4465 = vmatpush1.bf16.msra.mxu0 %v9695_v51  ;;  %v9796_v49 = vld [vmem:[%s13634_s1 + $0x140] sm:$0xff]   ;;  %v9700_v50 = vld [vmem:[%s13633_s0 + $0x3b8] ss:$28 sps:$4 sm:$0xff]  }
  0x54   :  { %4466 = vmatprep.subr.bf16.mxu0 %v10788_v1  ;;  %v9701_v51 = vld [vmem:[%s13633_s0 + $0x3c0] ss:$28 sps:$4 sm:$0xff]  }
  0x57   :  { %4467 = vmatpush1.bf16.msra.mxu0 %v9720_v60  ;;  %v9714_v60 = vld [vmem:[%s13633_s0 + $0x464] ss:$28 sps:$4 sm:$0xff]  }
  0x58   :  { %4468 = vmatprep.subr.bf16.mxu0 %v10788_v1 }
  0x59   :  { %3423 = vmatmul.mubr.bf16.gmra.mrb[12].mxu1 %v9612_v52  ;;  %v9702_v52 = vld [vmem:[%s13633_s0 + $0x3f4] ss:$28 sps:$4 sm:$0xff]  }
  0x5a   :  { %3968 = vmatmul.mubr.bf16.gmra.mrb[12].mxu0 %v9613_v53  ;;  %3430 = vmatprep.mubr.bf16.mxu1 %v9614_v54  ;;  %v9704_v53 = vld [vmem:[%s13633_s0 + $0x3fc] ss:$28 sps:$4 sm:$0xff]   ;;  %v9706_v54 = vld [vmem:[%s13633_s0 + $0x3f0] ss:$28 sps:$4 sm:$0xff]  }
  0x5b   :  { %3975 = vmatprep.mubr.bf16.mxu0 %v9616_v55  ;;  %4469 = vmatpush1.bf16.msra.mxu0 %v9745_v14  ;;  %v9707_v55 = vld [vmem:[%s13633_s0 + $0x3f8] ss:$28 sps:$4 sm:$0xff]   ;;  %v9739_v14 = vld [vmem:[%s13633_s0 + $0x544] ss:$28 sps:$4 sm:$0xff]  }
  0x5c   :  { %4470 = vmatprep.subr.bf16.mxu0 %v10788_v1 }
  0x5f   :  { %4471 = vmatpush1.bf16.msra.mxu0 %v9771_v32 }
  0x60   :  { %4472 = vmatprep.subr.bf16.mxu0 %v10788_v1 }
  0x61   :  { %3431 = vmatmul.mubr.bf16.gmra.mrb[16].mxu1 %v9618_v56  ;;  %v9708_v56 = vld [vmem:[%s13633_s0 + $0x42c] ss:$28 sps:$4 sm:$0xff]  }
  0x62   :  { %3976 = vmatmul.mubr.bf16.gmra.mrb[16].mxu0 %v9619_v57  ;;  %3438 = vmatprep.mubr.bf16.mxu1 %v9621_v58  ;;  %v9710_v57 = vld [vmem:[%s13633_s0 + $0x434] ss:$28 sps:$4 sm:$0xff]   ;;  %v9712_v58 = vld [vmem:[%s13633_s0 + $0x428] ss:$28 sps:$4 sm:$0xff]  }
  0x63   :  { %3983 = vmatprep.mubr.bf16.mxu0 %v9623_v59  ;;  %4473 = vmatpush1.bf16.msra.mxu0 %v9796_v49  ;;  %v9713_v59 = vld [vmem:[%s13633_s0 + $0x430] ss:$28 sps:$4 sm:$0xff]  }
  0x64   :  { %4474 = vmatprep.subr.bf16.mxu0 %v10788_v1 }
  0x69   :  { %3439 = vmatmul.mubr.bf16.gmra.mrb[20].mxu1 %v9625_v61  ;;  %v9716_v61 = vld [vmem:[%s13633_s0 + $0x46c] ss:$28 sps:$4 sm:$0xff]  }
  0x6a   :  { %3984 = vmatmul.mubr.bf16.gmra.mrb[20].mxu0 %v9626_v62  ;;  %3446 = vmatprep.mubr.bf16.mxu1 %v9627_v63  ;;  %v9718_v62 = vld [vmem:[%s13633_s0 + $0x460] ss:$28 sps:$4 sm:$0xff]   ;;  %v9719_v63 = vld [vmem:[%s13633_s0 + $0x468] ss:$28 sps:$4 sm:$0xff]  }
  0x6b   :  { %3991 = vmatprep.mubr.bf16.mxu0 %v9629_v0  ;;  %v9721_v0 = vld [vmem:[%s13633_s0 + $0x49c] ss:$28 sps:$4 sm:$0xff]  }
  0x71   :  { %3447 = vmatmul.mubr.bf16.gmra.mrb[24].mxu1 %v9631_v2  ;;  %v9723_v2 = vld [vmem:[%s13633_s0 + $0x4a4] ss:$28 sps:$4 sm:$0xff]  }
  0x72   :  { %3992 = vmatmul.mubr.bf16.gmra.mrb[24].mxu0 %v9632_v3  ;;  %3454 = vmatprep.mubr.bf16.mxu1 %v9633_v4  ;;  %v9821_v3 = vld [vmem:[%s13634_s1 + $0x148] sm:$0xff]   ;;  %v9725_v4 = vld [vmem:[%s13633_s0 + $0x498] ss:$28 sps:$4 sm:$0xff]  }
  0x73   :  { %3999 = vmatprep.mubr.bf16.mxu0 %v9635_v5  ;;  %v9726_v5 = vld [vmem:[%s13633_s0 + $0x4a0] ss:$28 sps:$4 sm:$0xff]   ;;  %4475 = vmatpush1.bf16.msra.mxu0 %v9821_v3 }
  0x74   :  { %4476 = vmatprep.subr.bf16.mxu0 %v10788_v1 }
  0x79   :  { %3455 = vmatmul.mubr.bf16.gmra.mrb[28].mxu1 %v9637_v6  ;;  %v9727_v6 = vld [vmem:[%s13633_s0 + $0x4d4] ss:$28 sps:$4 sm:$0xff]  }
  0x7a   :  { %4000 = vmatmul.mubr.bf16.gmra.mrb[28].mxu0 %v9638_v7  ;;  %3462 = vmatprep.mubr.bf16.mxu1 %v9639_v8  ;;  %v9729_v7 = vld [vmem:[%s13633_s0 + $0x4dc] ss:$28 sps:$4 sm:$0xff]   ;;  %v9731_v8 = vld [vmem:[%s13633_s0 + $0x4d0] ss:$28 sps:$4 sm:$0xff]  }
  0x7b   :  { %4007 = vmatprep.mubr.bf16.mxu0 %v9641_v9  ;;  %v9732_v9 = vld [vmem:[%s13633_s0 + $0x4d8] ss:$28 sps:$4 sm:$0xff]  }
  0x81   :  { %3463 = vmatmul.mubr.bf16.gmra.mrb[32].mxu1 %v9643_v10  ;;  %v9733_v10 = vld [vmem:[%s13633_s0 + $0x50c] ss:$28 sps:$4 sm:$0xff]  }
  0x82   :  { %4008 = vmatmul.mubr.bf16.gmra.mrb[32].mxu0 %v9644_v11  ;;  %3470 = vmatprep.mubr.bf16.mxu1 %v9646_v12  ;;  %v9735_v11 = vld [vmem:[%s13633_s0 + $0x514] ss:$28 sps:$4 sm:$0xff]   ;;  %v9737_v12 = vld [vmem:[%s13633_s0 + $0x508] ss:$28 sps:$4 sm:$0xff]  }
  0x83   :  { %4015 = vmatprep.mubr.bf16.mxu0 %v9648_v13  ;;  %v9738_v13 = vld [vmem:[%s13633_s0 + $0x510] ss:$28 sps:$4 sm:$0xff]  }
  0x89   :  { %3471 = vmatmul.mubr.bf16.gmra.mrb[36].mxu1 %v9650_v15  ;;  %v9741_v15 = vld [vmem:[%s13633_s0 + $0x54c] ss:$28 sps:$4 sm:$0xff]  }
  0x8a   :  { %4016 = vmatmul.mubr.bf16.gmra.mrb[36].mxu0 %v9651_v16  ;;  %3478 = vmatprep.mubr.bf16.mxu1 %v9652_v17  ;;  %v9743_v16 = vld [vmem:[%s13633_s0 + $0x540] ss:$28 sps:$4 sm:$0xff]   ;;  %v9744_v17 = vld [vmem:[%s13633_s0 + $0x548] ss:$28 sps:$4 sm:$0xff]  }
  0x8b   :  { %4023 = vmatprep.mubr.bf16.mxu0 %v9654_v18  ;;  %v9746_v18 = vld [vmem:[%s13633_s0 + $0x57c] ss:$28 sps:$4 sm:$0xff]  }
  0x91   :  { %3479 = vmatmul.mubr.bf16.gmra.mrb[40].mxu1 %v9656_v19  ;;  %v9748_v19 = vld [vmem:[%s13633_s0 + $0x584] ss:$28 sps:$4 sm:$0xff]  }
  0x92   :  { %4024 = vmatmul.mubr.bf16.gmra.mrb[40].mxu0 %v9657_v20  ;;  %3486 = vmatprep.mubr.bf16.mxu1 %v9658_v21  ;;  %v9846_v20 = vld [vmem:[%s13634_s1 + $0x150] sm:$0xff]  }
  0x93   :  { %4031 = vmatprep.mubr.bf16.mxu0 %v9660_v22  ;;  %v9750_v21 = vld [vmem:[%s13633_s0 + $0x578] ss:$28 sps:$4 sm:$0xff]   ;;  %v9751_v22 = vld [vmem:[%s13633_s0 + $0x580] ss:$28 sps:$4 sm:$0xff]   ;;  %4477 = vmatpush1.bf16.msra.mxu0 %v9846_v20 }
  0x94   :  { %4478 = vmatprep.subr.bf16.mxu0 %v10788_v1 }
  0x99   :  { %3487 = vmatmul.mubr.bf16.gmra.mrb[44].mxu1 %v9662_v23  ;;  %v9752_v23 = vld [vmem:[%s13633_s0 + $0x5b4] ss:$28 sps:$4 sm:$0xff]  }
  0x9a   :  { %4032 = vmatmul.mubr.bf16.gmra.mrb[44].mxu0 %v9663_v24  ;;  %3494 = vmatprep.mubr.bf16.mxu1 %v9664_v25  ;;  %v9754_v24 = vld [vmem:[%s13633_s0 + $0x5bc] ss:$28 sps:$4 sm:$0xff]   ;;  %v9756_v25 = vld [vmem:[%s13633_s0 + $0x5b0] ss:$28 sps:$4 sm:$0xff]  }
  0x9b   :  { %4039 = vmatprep.mubr.bf16.mxu0 %v9666_v26  ;;  %v9757_v26 = vld [vmem:[%s13633_s0 + $0x5b8] ss:$28 sps:$4 sm:$0xff]  }
  0xa1   :  { %3495 = vmatmul.mubr.bf16.gmra.mrb[48].mxu1 %v9668_v28  ;;  %v9760_v28 = vld [vmem:[%s13633_s0 + $0x5f4] ss:$28 sps:$4 sm:$0xff]  }
  0xa2   :  { %4040 = vmatmul.mubr.bf16.gmra.mrb[48].mxu0 %v9669_v29  ;;  %3502 = vmatprep.mubr.bf16.mxu1 %v9671_v30 }
  0xa3   :  { %4047 = vmatprep.mubr.bf16.mxu0 %v9673_v31 }
  0xa9   :  { %3503 = vmatmul.mubr.bf16.gmra.mrb[52].mxu1 %v9675_v33 }
  0xaa   :  { %4048 = vmatmul.mubr.bf16.gmra.mrb[52].mxu0 %v9676_v34  ;;  %3510 = vmatprep.mubr.bf16.mxu1 %v9677_v35 }
  0xab   :  { %4055 = vmatprep.mubr.bf16.mxu0 %v9679_v36 }
  0xb1   :  { %3511 = vmatmul.mubr.bf16.gmra.mrb[56].mxu1 %v9681_v37 }
  0xb2   :  { %4056 = vmatmul.mubr.bf16.gmra.mrb[56].mxu0 %v9682_v38  ;;  %3518 = vmatprep.mubr.bf16.mxu1 %v9683_v39 }
  0xb3   :  { %4063 = vmatprep.mubr.bf16.mxu0 %v9685_v40 }
  0xb9   :  { %3519 = vmatmul.mubr.bf16.gmra.mrb[60].mxu1 %v9687_v41 }
  0xba   :  { %4064 = vmatmul.mubr.bf16.gmra.mrb[60].mxu0 %v9688_v42  ;;  %3526 = vmatprep.mubr.bf16.mxu1 %v9689_v43 }
  0xbb   :  { %4071 = vmatprep.mubr.bf16.mxu0 %v9691_v44 }
  0xc1   :  { %3527 = vmatmul.mubr.bf16.gmra.mrb[64].mxu1 %v9693_v45 }
  0xc2   :  { %4072 = vmatmul.mubr.bf16.gmra.mrb[64].mxu0 %v9694_v46  ;;  %3534 = vmatprep.mubr.bf16.mxu1 %v9696_v47 }
  0xc3   :  { %4079 = vmatprep.mubr.bf16.mxu0 %v9698_v48 }
  0xc9   :  { %3535 = vmatmul.mubr.bf16.gmra.mrb[68].mxu1 %v9700_v50 }
  0xca   :  { %4080 = vmatmul.mubr.bf16.gmra.mrb[68].mxu0 %v9701_v51  ;;  %3542 = vmatprep.mubr.bf16.mxu1 %v9702_v52 }
  0xcb   :  { %4087 = vmatprep.mubr.bf16.mxu0 %v9704_v53 }
  0xd1   :  { %3543 = vmatmul.mubr.bf16.gmra.mrb[72].mxu1 %v9706_v54 }
  0xd2   :  { %4088 = vmatmul.mubr.bf16.gmra.mrb[72].mxu0 %v9707_v55  ;;  %3550 = vmatprep.mubr.bf16.mxu1 %v9708_v56 }
  0xd3   :  { %4095 = vmatprep.mubr.bf16.mxu0 %v9710_v57 }
  0xd9   :  { %3551 = vmatmul.mubr.bf16.gmra.mrb[76].mxu1 %v9712_v58 }
  0xda   :  { %4096 = vmatmul.mubr.bf16.gmra.mrb[76].mxu0 %v9713_v59  ;;  %3558 = vmatprep.mubr.bf16.mxu1 %v9714_v60 }
  0xdb   :  { %4103 = vmatprep.mubr.bf16.mxu0 %v9716_v61 }
  0xe1   :  { %3559 = vmatmul.mubr.bf16.gmra.mrb[80].mxu1 %v9718_v62 }
  0xe2   :  { %4104 = vmatmul.mubr.bf16.gmra.mrb[80].mxu0 %v9719_v63  ;;  %3566 = vmatprep.mubr.bf16.mxu1 %v9721_v0 }
  0xe3   :  { %4111 = vmatprep.mubr.bf16.mxu0 %v9723_v2 }
  0xe9   :  { %3567 = vmatmul.mubr.bf16.gmra.mrb[84].mxu1 %v9725_v4 }
  0xea   :  { %4112 = vmatmul.mubr.bf16.gmra.mrb[84].mxu0 %v9726_v5  ;;  %3574 = vmatprep.mubr.bf16.mxu1 %v9727_v6 }
  0xeb   :  { %4119 = vmatprep.mubr.bf16.mxu0 %v9729_v7 }
  0xf1   :  { %3575 = vmatmul.mubr.bf16.gmra.mrb[88].mxu1 %v9731_v8 }
  0xf2   :  { %4120 = vmatmul.mubr.bf16.gmra.mrb[88].mxu0 %v9732_v9  ;;  %3582 = vmatprep.mubr.bf16.mxu1 %v9733_v10 }
  0xf3   :  { %4127 = vmatprep.mubr.bf16.mxu0 %v9735_v11 }
  0xf9   :  { %3583 = vmatmul.mubr.bf16.gmra.mrb[92].mxu1 %v9737_v12 }
  0xfa   :  { %4128 = vmatmul.mubr.bf16.gmra.mrb[92].mxu0 %v9738_v13  ;;  %3590 = vmatprep.mubr.bf16.mxu1 %v9739_v14 }
  0xfb   :  { %4135 = vmatprep.mubr.bf16.mxu0 %v9741_v15 }
 0x101   :  { %3591 = vmatmul.mubr.bf16.gmra.mrb[96].mxu1 %v9743_v16 }
 0x102   :  { %4136 = vmatmul.mubr.bf16.gmra.mrb[96].mxu0 %v9744_v17  ;;  %3598 = vmatprep.mubr.bf16.mxu1 %v9746_v18 }
 0x103   :  { %4143 = vmatprep.mubr.bf16.mxu0 %v9748_v19 }
 0x109   :  { %3599 = vmatmul.mubr.bf16.gmra.mrb[100].mxu1 %v9750_v21 }
 0x10a   :  { %4144 = vmatmul.mubr.bf16.gmra.mrb[100].mxu0 %v9751_v22  ;;  %3606 = vmatprep.mubr.bf16.mxu1 %v9752_v23 }
 0x10b   :  { %4151 = vmatprep.mubr.bf16.mxu0 %v9754_v24 }
 0x111   :  { %3607 = vmatmul.mubr.bf16.gmra.mrb[104].mxu1 %v9756_v25 }
 0x112   :  { %4152 = vmatmul.mubr.bf16.gmra.mrb[104].mxu0 %v9757_v26  ;;  %3614 = vmatprep.mubr.bf16.mxu1 %v9758_v27 }
 0x113   :  { %4159 = vmatprep.mubr.bf16.mxu0 %v9760_v28 }
 0x114   :  { %10 = vsyncpa [#allocation3], 0  ;;  %v9762_v29 = vld [vmem:[%s13633_s0 + $0x5e8] ss:$28 sps:$4 sm:$0xff]   ;;  %v9763_v30 = vld [vmem:[%s13633_s0 + $0x5f0] ss:$28 sps:$4 sm:$0xff]  }
 0x115   :  { %v9765_v31 = vld [vmem:[%s13633_s0 + $0x624] ss:$28 sps:$4 sm:$0xff]   ;;  %v9767_v32 = vld [vmem:[%s13633_s0 + $0x62c] ss:$28 sps:$4 sm:$0xff]   ;;  %v9772_v35 = vld [vmem:[%s13633_s0 + $0x65c] ss:$28 sps:$4 sm:$0xff]  }
 0x116   :  { %v9769_v33 = vld [vmem:[%s13633_s0 + $0x620] ss:$28 sps:$4 sm:$0xff]   ;;  %v9770_v34 = vld [vmem:[%s13633_s0 + $0x628] ss:$28 sps:$4 sm:$0xff]   ;;  %v9776_v38 = vld [vmem:[%s13633_s0 + $0x658] ss:$28 sps:$4 sm:$0xff]  }
 0x117   :  { %v9774_v36 = vld [vmem:[%s13633_s0 + $0x664] ss:$28 sps:$4 sm:$0xff]   ;;  %v9871_v37 = vld [vmem:[%s13634_s1 + $0x158] sm:$0xff]   ;;  %v9778_v40 = vld [vmem:[%s13633_s0 + $0x694] ss:$28 sps:$4 sm:$0xff]   ;;  %v11472_v13 = vpop.f32.mrb[0].mxu1 }
 0x118   :  { %4479 = vmatpush1.bf16.msra.mxu0 %v9871_v37  ;;  %v9777_v39 = vld [vmem:[%s13633_s0 + $0x660] ss:$28 sps:$4 sm:$0xff]   ;;  %v9782_v42 = vld [vmem:[%s13633_s0 + $0x690] ss:$28 sps:$4 sm:$0xff]   ;;  %v9783_v43 = vld [vmem:[%s13633_s0 + $0x698] ss:$28 sps:$4 sm:$0xff]  }
 0x119   :  { %3615 = vmatmul.mubr.bf16.gmra.mrb[108].mxu1 %v9762_v29  ;;  %4480 = vmatprep.subr.bf16.mxu0 %v10788_v1  ;;  %v9780_v41 = vld [vmem:[%s13633_s0 + $0x69c] ss:$28 sps:$4 sm:$0xff]   ;;  %v9784_v44 = vld [vmem:[%s13633_s0 + $0x6cc] ss:$28 sps:$4 sm:$0xff]   ;;  %v9786_v45 = vld [vmem:[%s13633_s0 + $0x6d4] ss:$28 sps:$4 sm:$0xff]  }
 0x11a   :  { %4160 = vmatmul.mubr.bf16.gmra.mrb[108].mxu0 %v9763_v30  ;;  %3622 = vmatprep.mubr.bf16.mxu1 %v9765_v31  ;;  %v9788_v46 = vld [vmem:[%s13633_s0 + $0x6c8] ss:$28 sps:$4 sm:$0xff]   ;;  %v9789_v47 = vld [vmem:[%s13633_s0 + $0x6d0] ss:$28 sps:$4 sm:$0xff]   ;;  %v9794_v50 = vld [vmem:[%s13633_s0 + $0x700] ss:$28 sps:$4 sm:$0xff]  }
 0x11b   :  { %4167 = vmatprep.mubr.bf16.mxu0 %v9767_v32  ;;  %v9790_v48 = vld [vmem:[%s13633_s0 + $0x704] ss:$28 sps:$4 sm:$0xff]   ;;  %v9792_v49 = vld [vmem:[%s13633_s0 + $0x70c] ss:$28 sps:$4 sm:$0xff]   ;;  %v9797_v52 = vld [vmem:[%s13633_s0 + $0x73c] ss:$28 sps:$4 sm:$0xff]  }
 0x11c   :  { %v9795_v51 = vld [vmem:[%s13633_s0 + $0x708] ss:$28 sps:$4 sm:$0xff]   ;;  %v9801_v55 = vld [vmem:[%s13633_s0 + $0x738] ss:$28 sps:$4 sm:$0xff]   ;;  %v9802_v56 = vld [vmem:[%s13633_s0 + $0x740] ss:$28 sps:$4 sm:$0xff]  }
 0x11d   :  { %v9799_v53 = vld [vmem:[%s13633_s0 + $0x744] ss:$28 sps:$4 sm:$0xff]   ;;  %v9803_v57 = vld [vmem:[%s13633_s0 + $0x774] ss:$28 sps:$4 sm:$0xff]   ;;  %v9805_v58 = vld [vmem:[%s13633_s0 + $0x77c] ss:$28 sps:$4 sm:$0xff]  }
 0x11e   :  { %v9896_v54 = vld [vmem:[%s13634_s1 + $0x160] sm:$0xff]   ;;  %v9807_v59 = vld [vmem:[%s13633_s0 + $0x770] ss:$28 sps:$4 sm:$0xff]   ;;  %v9808_v60 = vld [vmem:[%s13633_s0 + $0x778] ss:$28 sps:$4 sm:$0xff]   ;;  %v3402_v14 = vpop.f32.mrb[1].mxu1 }
 0x11f   :  { %4481 = vmatpush1.bf16.msra.mxu0 %v9896_v54  ;;  %v9809_v61 = vld [vmem:[%s13633_s0 + $0x7ac] ss:$28 sps:$4 sm:$0xff]   ;;  %v9811_v62 = vld [vmem:[%s13633_s0 + $0x7b4] ss:$28 sps:$4 sm:$0xff]   ;;  %v9815_v2 = vld [vmem:[%s13633_s0 + $0x7e4] ss:$28 sps:$4 sm:$0xff]  }
 0x120   :  { %4482 = vmatprep.subr.bf16.mxu0 %v10788_v1  ;;  %v9813_v63 = vld [vmem:[%s13633_s0 + $0x7a8] ss:$28 sps:$4 sm:$0xff]   ;;  %v9814_v0 = vld [vmem:[%s13633_s0 + $0x7b0] ss:$28 sps:$4 sm:$0xff]   ;;  %v9819_v4 = vld [vmem:[%s13633_s0 + $0x7e0] ss:$28 sps:$4 sm:$0xff]  }
 0x121   :  { %3623 = vmatmul.mubr.bf16.gmra.mrb[112].mxu1 %v9769_v33  ;;  %v9817_v3 = vld [vmem:[%s13633_s0 + $0x7ec] ss:$28 sps:$4 sm:$0xff]   ;;  %v9822_v6 = vld [vmem:[%s13633_s0 + $0x81c] ss:$28 sps:$4 sm:$0xff]   ;;  %v9824_v7 = vld [vmem:[%s13633_s0 + $0x824] ss:$28 sps:$4 sm:$0xff]  }
 0x122   :  { %4168 = vmatmul.mubr.bf16.gmra.mrb[112].mxu0 %v9770_v34  ;;  %3630 = vmatprep.mubr.bf16.mxu1 %v9772_v35  ;;  %v9820_v5 = vld [vmem:[%s13633_s0 + $0x7e8] ss:$28 sps:$4 sm:$0xff]   ;;  %v9826_v9 = vld [vmem:[%s13633_s0 + $0x818] ss:$28 sps:$4 sm:$0xff]   ;;  %v9827_v10 = vld [vmem:[%s13633_s0 + $0x820] ss:$28 sps:$4 sm:$0xff]  }
 0x123   :  { %4175 = vmatprep.mubr.bf16.mxu0 %v9774_v36  ;;  %v9921_v8 = vld [vmem:[%s13634_s1 + $0x168] sm:$0xff]   ;;  %v9828_v11 = vld [vmem:[%s13633_s0 + $0x854] ss:$28 sps:$4 sm:$0xff]   ;;  %v9830_v12 = vld [vmem:[%s13633_s0 + $0x85c] ss:$28 sps:$4 sm:$0xff]   ;;  %v11474_v15 = vpop.f32.mrb[2].mxu1 }
 0x124   :  { %4483 = vmatpush1.bf16.msra.mxu0 %v9921_v8  ;;  %v9832_v16 = vld [vmem:[%s13633_s0 + $0x850] ss:$28 sps:$4 sm:$0xff]   ;;  %v3405_v17 = vpop.f32.mrb[3].mxu1  ;;  %v9833_v18 = vld [vmem:[%s13633_s0 + $0x858] ss:$28 sps:$4 sm:$0xff]   ;;  %vm3173_vm0 = vcmask 130048  }
 0x125   :  { %4484 = vmatprep.subr.bf16.mxu0 %v10788_v1  ;;  %v9834_v19 = vld [vmem:[%s13633_s0 + $0x88c] ss:$28 sps:$4 sm:$0xff]   ;;  %v9836_v20 = vld [vmem:[%s13633_s0 + $0x894] ss:$28 sps:$4 sm:$0xff]   ;;  %v11488_v21 = vpop.f32.mrb[4].mxu1  ;;  %vm5685_vm1 = vcmask 261120  }
 0x126   :  { %v3410_v22 = vpop.f32.mrb[5].mxu1  ;;  %v9838_v24 = vld [vmem:[%s13633_s0 + $0x888] ss:$28 sps:$4 sm:$0xff]   ;;  %v9839_v26 = vld [vmem:[%s13633_s0 + $0x890] ss:$28 sps:$4 sm:$0xff]  }
 0x127   :  { %v11490_v23 = vpop.f32.mrb[6].mxu1  ;;  %v9840_v27 = vld [vmem:[%s13633_s0 + $0x8c4] ss:$28 sps:$4 sm:$0xff]   ;;  %v9842_v28 = vld [vmem:[%s13633_s0 + $0x8cc] ss:$28 sps:$4 sm:$0xff]  }
 0x128   :  { %v3413_v25 = vpop.f32.mrb[7].mxu1  ;;  %v9844_v32 = vld [vmem:[%s13633_s0 + $0x8c0] ss:$28 sps:$4 sm:$0xff]   ;;  %v9845_v34 = vld [vmem:[%s13633_s0 + $0x8c8] ss:$28 sps:$4 sm:$0xff]  }
 0x129   :  { %3631 = vmatmul.mubr.bf16.gmra.mrb[116].mxu1 %v9776_v38  ;;  %v11504_v29 = vpop.f32.mrb[8].mxu1  ;;  %v9847_v35 = vld [vmem:[%s13633_s0 + $0x8fc] ss:$28 sps:$4 sm:$0xff]   ;;  %v9849_v36 = vld [vmem:[%s13633_s0 + $0x904] ss:$28 sps:$4 sm:$0xff]   ;;  %v9946_v38 = vld [vmem:[%s13634_s1 + $0x170] sm:$0xff]  }
 0x12a   :  { %4176 = vmatmul.mubr.bf16.gmra.mrb[116].mxu0 %v9777_v39  ;;  %3638 = vmatprep.mubr.bf16.mxu1 %v9778_v40  ;;  %v3418_v30 = vpop.f32.mrb[9].mxu1  ;;  %v9878_v14 = vld [vmem:[%s13633_s0 + $0xa14] ss:$28 sps:$4 sm:$0xff]   ;;  %v9884_v25 = vld [vmem:[%s13633_s0 + $0xa4c] ss:$28 sps:$4 sm:$0xff]  }
 0x12b   :  { %4183 = vmatprep.mubr.bf16.mxu0 %v9780_v41  ;;  %v11506_v31 = vpop.f32.mrb[10].mxu1  ;;  %4485 = vmatpush1.bf16.msra.mxu0 %v9946_v38  ;;  %v9851_v41 = vld [vmem:[%s13633_s0 + $0x8f8] ss:$28 sps:$4 sm:$0xff]  }
 0x12c   :  { %v3421_v33 = vpop.f32.mrb[11].mxu1  ;;  %4486 = vmatprep.subr.bf16.mxu0 %v10788_v1 }
 0x12d   :  { %v11520_v37 = vpop.f32.mrb[12].mxu1 }
 0x12e   :  { %v3426_v39 = vpop.f32.mrb[13].mxu1 }
 0x12f   :  { %v11525_v40 = vpop.f32.mrb[14].mxu1 }
 0x131   :  { %3639 = vmatmul.mubr.bf16.gmra.mrb[120].mxu1 %v9782_v42  ;;  %v3429_v42 = vpop.f32.mrb[15].mxu1 }
 0x132   :  { %4184 = vmatmul.mubr.bf16.gmra.mrb[120].mxu0 %v9783_v43  ;;  %3646 = vmatprep.mubr.bf16.mxu1 %v9784_v44  ;;  %v9852_v43 = vld [vmem:[%s13633_s0 + $0x900] ss:$28 sps:$4 sm:$0xff]   ;;  %v9853_v44 = vld [vmem:[%s13633_s0 + $0x934] ss:$28 sps:$4 sm:$0xff]  }
 0x133   :  { %4191 = vmatprep.mubr.bf16.mxu0 %v9786_v45  ;;  %v9855_v45 = vld [vmem:[%s13633_s0 + $0x93c] ss:$28 sps:$4 sm:$0xff]  }
 0x134   :  { %v9894_v42 = vld [vmem:[%s13633_s0 + $0xa80] ss:$28 sps:$4 sm:$0xff]  }
 0x139   :  { %3647 = vmatmul.mubr.bf16.gmra.mrb[124].mxu1 %v9788_v46  ;;  %v11540_v46 = vpop.f32.mrb[16].mxu1 }
 0x13a   :  { %4192 = vmatmul.mubr.bf16.gmra.mrb[124].mxu0 %v9789_v47  ;;  %3654 = vmatprep.mubr.bf16.mxu1 %v9790_v48  ;;  %v3434_v47 = vpop.f32.mrb[17].mxu1  ;;  %v9857_v48 = vld [vmem:[%s13633_s0 + $0x930] ss:$28 sps:$4 sm:$0xff]  }
 0x13b   :  { %4199 = vmatprep.mubr.bf16.mxu0 %v9792_v49  ;;  %v11542_v1 = vpop.f32.mrb[18].mxu1 }
 0x13c   :  { %v3437_v49 = vpop.f32.mrb[19].mxu1 }
 0x141   :  { %3655 = vmatmul.mubr.bf16.gmra.mrb[128].mxu1 %v9794_v50  ;;  %v9858_v50 = vld [vmem:[%s13633_s0 + $0x938] ss:$28 sps:$4 sm:$0xff]  }
 0x142   :  { %4200 = vmatmul.mubr.bf16.gmra.mrb[128].mxu0 %v9795_v51  ;;  %3662 = vmatprep.mubr.bf16.mxu1 %v9797_v52  ;;  %v9859_v51 = vld [vmem:[%s13633_s0 + $0x96c] ss:$28 sps:$4 sm:$0xff]   ;;  %v9861_v52 = vld [vmem:[%s13633_s0 + $0x974] ss:$28 sps:$4 sm:$0xff]  }
 0x143   :  { %4207 = vmatprep.mubr.bf16.mxu0 %v9799_v53  ;;  %v11556_v53 = vpop.f32.mrb[20].mxu1 }
 0x144   :  { %v3442_v54 = vpop.f32.mrb[21].mxu1 }
 0x145   :  { %v9901_v54 = vld [vmem:[%s13633_s0 + $0xab8] ss:$28 sps:$4 sm:$0xff]  }
 0x149   :  { %3663 = vmatmul.mubr.bf16.gmra.mrb[132].mxu1 %v9801_v55  ;;  %v11558_v55 = vpop.f32.mrb[22].mxu1 }
 0x14a   :  { %4208 = vmatmul.mubr.bf16.gmra.mrb[132].mxu0 %v9802_v56  ;;  %3670 = vmatprep.mubr.bf16.mxu1 %v9803_v57  ;;  %v9863_v56 = vld [vmem:[%s13633_s0 + $0x968] ss:$28 sps:$4 sm:$0xff]   ;;  %v3445_v57 = vpop.f32.mrb[23].mxu1 }
 0x14b   :  { %4215 = vmatprep.mubr.bf16.mxu0 %v9805_v58  ;;  %v9864_v58 = vld [vmem:[%s13633_s0 + $0x970] ss:$28 sps:$4 sm:$0xff]   ;;  %v9902_v57 = vld [vmem:[%s13633_s0 + $0xac0] ss:$28 sps:$4 sm:$0xff]  }
 0x151   :  { %3671 = vmatmul.mubr.bf16.gmra.mrb[136].mxu1 %v9807_v59  ;;  %v9865_v59 = vld [vmem:[%s13633_s0 + $0x9a4] ss:$28 sps:$4 sm:$0xff]  }
 0x152   :  { %4216 = vmatmul.mubr.bf16.gmra.mrb[136].mxu0 %v9808_v60  ;;  %3678 = vmatprep.mubr.bf16.mxu1 %v9809_v61  ;;  %v9867_v60 = vld [vmem:[%s13633_s0 + $0x9ac] ss:$28 sps:$4 sm:$0xff]   ;;  %v11572_v61 = vpop.f32.mrb[24].mxu1 }
 0x153   :  { %4223 = vmatprep.mubr.bf16.mxu0 %v9811_v62  ;;  %v3450_v62 = vpop.f32.mrb[25].mxu1 }
 0x159   :  { %3679 = vmatmul.mubr.bf16.gmra.mrb[140].mxu1 %v9813_v63  ;;  %v11574_v63 = vpop.f32.mrb[26].mxu1 }
 0x15a   :  { %4224 = vmatmul.mubr.bf16.gmra.mrb[140].mxu0 %v9814_v0  ;;  %3686 = vmatprep.mubr.bf16.mxu1 %v9815_v2  ;;  %v9869_v0 = vld [vmem:[%s13633_s0 + $0x9a0] ss:$28 sps:$4 sm:$0xff]   ;;  %v3453_v2 = vpop.f32.mrb[27].mxu1 }
 0x15b   :  { %4231 = vmatprep.mubr.bf16.mxu0 %v9817_v3  ;;  %v9870_v3 = vld [vmem:[%s13633_s0 + $0x9a8] ss:$28 sps:$4 sm:$0xff]  }
 0x161   :  { %3687 = vmatmul.mubr.bf16.gmra.mrb[144].mxu1 %v9819_v4  ;;  %v9872_v4 = vld [vmem:[%s13633_s0 + $0x9dc] ss:$28 sps:$4 sm:$0xff]  }
 0x162   :  { %4232 = vmatmul.mubr.bf16.gmra.mrb[144].mxu0 %v9820_v5  ;;  %3694 = vmatprep.mubr.bf16.mxu1 %v9822_v6  ;;  %v9874_v5 = vld [vmem:[%s13633_s0 + $0x9e4] ss:$28 sps:$4 sm:$0xff]   ;;  %v11588_v6 = vpop.f32.mrb[28].mxu1 }
 0x163   :  { %4239 = vmatprep.mubr.bf16.mxu0 %v9824_v7  ;;  %v9971_v7 = vld [vmem:[%s13634_s1 + $0x178] sm:$0xff]   ;;  %v3458_v8 = vpop.f32.mrb[29].mxu1 }
 0x164   :  { %4487 = vmatpush1.bf16.msra.mxu0 %v9971_v7  ;;  %v9907_v7 = vld [vmem:[%s13633_s0 + $0xaf0] ss:$28 sps:$4 sm:$0xff]  }
 0x169   :  { %3695 = vmatmul.mubr.bf16.gmra.mrb[148].mxu1 %v9826_v9  ;;  %v11593_v9 = vpop.f32.mrb[30].mxu1 }
 0x16a   :  { %4240 = vmatmul.mubr.bf16.gmra.mrb[148].mxu0 %v9827_v10  ;;  %3702 = vmatprep.mubr.bf16.mxu1 %v9828_v11  ;;  %v9876_v10 = vld [vmem:[%s13633_s0 + $0x9d8] ss:$28 sps:$4 sm:$0xff]   ;;  %v3461_v11 = vpop.f32.mrb[31].mxu1 }
 0x16b   :  { %4247 = vmatprep.mubr.bf16.mxu0 %v9830_v12  ;;  %v9877_v12 = vld [vmem:[%s13633_s0 + $0x9e0] ss:$28 sps:$4 sm:$0xff]   ;;  %v11607_v17 = vpop.f32.mrb[32].mxu1  ;;  %v9909_v11 = vld [vmem:[%s13633_s0 + $0xb2c] ss:$28 sps:$4 sm:$0xff]  }
 0x171   :  { %3703 = vmatmul.mubr.bf16.gmra.mrb[152].mxu1 %v9832_v16  ;;  %v9880_v16 = vld [vmem:[%s13633_s0 + $0xa1c] ss:$28 sps:$4 sm:$0xff]  }
 0x172   :  { %4248 = vmatmul.mubr.bf16.gmra.mrb[152].mxu0 %v9833_v18  ;;  %3710 = vmatprep.mubr.bf16.mxu1 %v9834_v19  ;;  %v3466_v18 = vpop.f32.mrb[33].mxu1 }
 0x173   :  { %4255 = vmatprep.mubr.bf16.mxu0 %v9836_v20  ;;  %v11609_v19 = vpop.f32.mrb[34].mxu1  ;;  %v9882_v20 = vld [vmem:[%s13633_s0 + $0xa10] ss:$28 sps:$4 sm:$0xff]  }
 0x174   :  { %v3469_v22 = vpop.f32.mrb[35].mxu1 }
 0x179   :  { %3711 = vmatmul.mubr.bf16.gmra.mrb[156].mxu1 %v9838_v24  ;;  %v9883_v24 = vld [vmem:[%s13633_s0 + $0xa18] ss:$28 sps:$4 sm:$0xff]  }
 0x17a   :  { %4256 = vmatmul.mubr.bf16.gmra.mrb[156].mxu0 %v9839_v26  ;;  %3718 = vmatprep.mubr.bf16.mxu1 %v9840_v27  ;;  %v9886_v26 = vld [vmem:[%s13633_s0 + $0xa54] ss:$28 sps:$4 sm:$0xff]   ;;  %v11623_v27 = vpop.f32.mrb[36].mxu1 }
 0x17b   :  { %4263 = vmatprep.mubr.bf16.mxu0 %v9842_v28  ;;  %v3474_v28 = vpop.f32.mrb[37].mxu1 }
 0x17c   :  { %v11625_v30 = vpop.f32.mrb[38].mxu1 }
 0x17d   :  { %v3477_v33 = vpop.f32.mrb[39].mxu1 }
 0x17e   :  { %v11639_v38 = vpop.f32.mrb[40].mxu1  ;;  %v9915_v33 = vld [vmem:[%s13633_s0 + $0xb64] ss:$28 sps:$4 sm:$0xff]  }
 0x17f   :  { %v3482_v39 = vpop.f32.mrb[41].mxu1 }
 0x181   :  { %3719 = vmatmul.mubr.bf16.gmra.mrb[160].mxu1 %v9844_v32  ;;  %v9888_v32 = vld [vmem:[%s13633_s0 + $0xa48] ss:$28 sps:$4 sm:$0xff]  }
 0x182   :  { %4264 = vmatmul.mubr.bf16.gmra.mrb[160].mxu0 %v9845_v34  ;;  %3726 = vmatprep.mubr.bf16.mxu1 %v9847_v35  ;;  %v9889_v34 = vld [vmem:[%s13633_s0 + $0xa50] ss:$28 sps:$4 sm:$0xff]   ;;  %v9890_v35 = vld [vmem:[%s13633_s0 + $0xa84] ss:$28 sps:$4 sm:$0xff]  }
 0x183   :  { %4271 = vmatprep.mubr.bf16.mxu0 %v9849_v36  ;;  %v9892_v36 = vld [vmem:[%s13633_s0 + $0xa8c] ss:$28 sps:$4 sm:$0xff]  }
 0x189   :  { %3727 = vmatmul.mubr.bf16.gmra.mrb[164].mxu1 %v9851_v41  ;;  %v11641_v41 = vpop.f32.mrb[42].mxu1 }
 0x18a   :  { %4272 = vmatmul.mubr.bf16.gmra.mrb[164].mxu0 %v9852_v43  ;;  %3734 = vmatprep.mubr.bf16.mxu1 %v9853_v44  ;;  %v3485_v43 = vpop.f32.mrb[43].mxu1  ;;  %v9895_v44 = vld [vmem:[%s13633_s0 + $0xa88] ss:$28 sps:$4 sm:$0xff]  }
 0x18b   :  { %4279 = vmatprep.mubr.bf16.mxu0 %v9855_v45  ;;  %v9897_v45 = vld [vmem:[%s13633_s0 + $0xabc] ss:$28 sps:$4 sm:$0xff]   ;;  %v11652_v47 = vpop.f32.mrb[44].mxu1 }
 0x18c   :  { %v3490_v49 = vpop.f32.mrb[45].mxu1 }
 0x191   :  { %3735 = vmatmul.mubr.bf16.gmra.mrb[168].mxu1 %v9857_v48  ;;  %v9899_v48 = vld [vmem:[%s13633_s0 + $0xac4] ss:$28 sps:$4 sm:$0xff]  }
 0x192   :  { %4280 = vmatmul.mubr.bf16.gmra.mrb[168].mxu0 %v9858_v50  ;;  %3742 = vmatprep.mubr.bf16.mxu1 %v9859_v51  ;;  %v11657_v50 = vpop.f32.mrb[46].mxu1 }
 0x193   :  { %4287 = vmatprep.mubr.bf16.mxu0 %v9861_v52  ;;  %v3493_v51 = vpop.f32.mrb[47].mxu1 }
 0x194   :  { %v11659_v52 = vpop.f32.mrb[48].mxu1  ;;  %v9920_v51 = vld [vmem:[%s13633_s0 + $0xb68] ss:$28 sps:$4 sm:$0xff]  }
 0x199   :  { %3743 = vmatmul.mubr.bf16.gmra.mrb[172].mxu1 %v9863_v56  ;;  %v3498_v56 = vpop.f32.mrb[49].mxu1 }
 0x19a   :  { %4288 = vmatmul.mubr.bf16.gmra.mrb[172].mxu0 %v9864_v58  ;;  %3750 = vmatprep.mubr.bf16.mxu1 %v9865_v59  ;;  %v9903_v58 = vld [vmem:[%s13633_s0 + $0xaf4] ss:$28 sps:$4 sm:$0xff]   ;;  %v11670_v59 = vpop.f32.mrb[50].mxu1 }
 0x19b   :  { %4295 = vmatprep.mubr.bf16.mxu0 %v9867_v60  ;;  %v9905_v60 = vld [vmem:[%s13633_s0 + $0xafc] ss:$28 sps:$4 sm:$0xff]   ;;  %v3501_v62 = vpop.f32.mrb[51].mxu1 }
 0x1a1   :  { %3751 = vmatmul.mubr.bf16.gmra.mrb[176].mxu1 %v9869_v0  ;;  %v11675_v0 = vpop.f32.mrb[52].mxu1 }
 0x1a2   :  { %4296 = vmatmul.mubr.bf16.gmra.mrb[176].mxu0 %v9870_v3  ;;  %3758 = vmatprep.mubr.bf16.mxu1 %v9872_v4  ;;  %v3506_v2 = vpop.f32.mrb[53].mxu1 }
 0x1a3   :  { %4303 = vmatprep.mubr.bf16.mxu0 %v9874_v5  ;;  %v11677_v3 = vpop.f32.mrb[54].mxu1 }
 0x1a4   :  { %v3509_v4 = vpop.f32.mrb[55].mxu1 }
 0x1a5   :  { %v11679_v5 = vpop.f32.mrb[56].mxu1 }
 0x1a6   :  { %v3514_v8 = vpop.f32.mrb[57].mxu1 }
 0x1a7   :  { %v9926_v8 = vld [vmem:[%s13633_s0 + $0xb98] ss:$28 sps:$4 sm:$0xff]  }
 0x1a9   :  { %3759 = vmatmul.mubr.bf16.gmra.mrb[180].mxu1 %v9876_v10  ;;  %v9908_v10 = vld [vmem:[%s13633_s0 + $0xaf8] ss:$28 sps:$4 sm:$0xff]  }
 0x1aa   :  { %4304 = vmatmul.mubr.bf16.gmra.mrb[180].mxu0 %v9877_v12  ;;  %3766 = vmatprep.mubr.bf16.mxu1 %v9878_v14  ;;  %v11690_v12 = vpop.f32.mrb[58].mxu1  ;;  %v9911_v14 = vld [vmem:[%s13633_s0 + $0xb34] ss:$28 sps:$4 sm:$0xff]  }
 0x1ab   :  { %4311 = vmatprep.mubr.bf16.mxu0 %v9880_v16  ;;  %v3517_v16 = vpop.f32.mrb[59].mxu1 }
 0x1ac   :  { %v11695_v18 = vpop.f32.mrb[60].mxu1 }
 0x1b1   :  { %3767 = vmatmul.mubr.bf16.gmra.mrb[184].mxu1 %v9882_v20  ;;  %v3522_v20 = vpop.f32.mrb[61].mxu1 }
 0x1b2   :  { %4312 = vmatmul.mubr.bf16.gmra.mrb[184].mxu0 %v9883_v24  ;;  %3774 = vmatprep.mubr.bf16.mxu1 %v9884_v25  ;;  %v11697_v22 = vpop.f32.mrb[62].mxu1  ;;  %v9930_v20 = vld [vmem:[%s13633_s0 + $0xbdc] ss:$28 sps:$4 sm:$0xff]  }
 0x1b3   :  { %4319 = vmatprep.mubr.bf16.mxu0 %v9886_v26  ;;  %v3525_v24 = vpop.f32.mrb[63].mxu1  ;;  %v9913_v26 = vld [vmem:[%s13633_s0 + $0xb28] ss:$28 sps:$4 sm:$0xff]  }
 0x1b4   :  { %v11699_v25 = vpop.f32.mrb[64].mxu1 }
 0x1b5   :  { %v3530_v28 = vpop.f32.mrb[65].mxu1 }
 0x1b9   :  { %3775 = vmatmul.mubr.bf16.gmra.mrb[188].mxu1 %v9888_v32  ;;  %v9914_v32 = vld [vmem:[%s13633_s0 + $0xb30] ss:$28 sps:$4 sm:$0xff]  }
 0x1ba   :  { %4320 = vmatmul.mubr.bf16.gmra.mrb[188].mxu0 %v9889_v34  ;;  %3782 = vmatprep.mubr.bf16.mxu1 %v9890_v35  ;;  %v11710_v34 = vpop.f32.mrb[66].mxu1  ;;  %v9917_v35 = vld [vmem:[%s13633_s0 + $0xb6c] ss:$28 sps:$4 sm:$0xff]  }
 0x1bb   :  { %4327 = vmatprep.mubr.bf16.mxu0 %v9892_v36  ;;  %v3533_v36 = vpop.f32.mrb[67].mxu1 }
 0x1bc   :  { %v11715_v39 = vpop.f32.mrb[68].mxu1  ;;  %v9932_v36 = vld [vmem:[%s13633_s0 + $0xbd0] ss:$28 sps:$4 sm:$0xff]  }
 0x1c1   :  { %3783 = vmatmul.mubr.bf16.gmra.mrb[192].mxu1 %v9894_v42  ;;  %v3538_v42 = vpop.f32.mrb[69].mxu1 }
 0x1c2   :  { %4328 = vmatmul.mubr.bf16.gmra.mrb[192].mxu0 %v9895_v44  ;;  %3790 = vmatprep.mubr.bf16.mxu1 %v9897_v45  ;;  %v11717_v43 = vpop.f32.mrb[70].mxu1 }
 0x1c3   :  { %4335 = vmatprep.mubr.bf16.mxu0 %v9899_v48  ;;  %v3541_v44 = vpop.f32.mrb[71].mxu1  ;;  %v9919_v48 = vld [vmem:[%s13633_s0 + $0xb60] ss:$28 sps:$4 sm:$0xff]  }
 0x1c4   :  { %v11719_v45 = vpop.f32.mrb[72].mxu1  ;;  %v9933_v44 = vld [vmem:[%s13633_s0 + $0xbd8] ss:$28 sps:$4 sm:$0xff]  }
 0x1c5   :  { %v3546_v49 = vpop.f32.mrb[73].mxu1 }
 0x1c6   :  { %v11730_v56 = vpop.f32.mrb[74].mxu1 }
 0x1c9   :  { %3791 = vmatmul.mubr.bf16.gmra.mrb[196].mxu1 %v9901_v54  ;;  %v9922_v54 = vld [vmem:[%s13633_s0 + $0xb9c] ss:$28 sps:$4 sm:$0xff]  }
 0x1ca   :  { %4336 = vmatmul.mubr.bf16.gmra.mrb[196].mxu0 %v9902_v57  ;;  %3798 = vmatprep.mubr.bf16.mxu1 %v9903_v58  ;;  %v9924_v57 = vld [vmem:[%s13633_s0 + $0xba4] ss:$28 sps:$4 sm:$0xff]   ;;  %v3549_v58 = vpop.f32.mrb[75].mxu1 }
 0x1cb   :  { %4343 = vmatprep.mubr.bf16.mxu0 %v9905_v60  ;;  %v11735_v60 = vpop.f32.mrb[76].mxu1 }
 0x1cc   :  { %13639 = vst [vmem:[#allocation5_spill] sm:$0xff] %v11735_v60  ;;  %v3554_v62 = vpop.f32.mrb[77].mxu1 }
 0x1cd   :  { %v11737_v2 = vpop.f32.mrb[78].mxu1 }
 0x1ce   :  { %13640 = vst [vmem:[#allocation6_spill] sm:$0xff] %v11737_v2  ;;  %v3557_v4 = vpop.f32.mrb[79].mxu1 }
 0x1d1   :  { %3799 = vmatmul.mubr.bf16.gmra.mrb[200].mxu1 %v9907_v7  ;;  %v11739_v7 = vpop.f32.mrb[80].mxu1 }
 0x1d2   :  { %4344 = vmatmul.mubr.bf16.gmra.mrb[200].mxu0 %v9908_v10  ;;  %3806 = vmatprep.mubr.bf16.mxu1 %v9909_v11  ;;  %13641 = vst [vmem:[#allocation7_spill] sm:$0xff] %v11739_v7  ;;  %v3562_v10 = vpop.f32.mrb[81].mxu1  ;;  %v9927_v11 = vld [vmem:[%s13633_s0 + $0xba0] ss:$28 sps:$4 sm:$0xff]  }
 0x1d3   :  { %4351 = vmatprep.mubr.bf16.mxu0 %v9911_v14  ;;  %v9928_v14 = vld [vmem:[%s13633_s0 + $0xbd4] ss:$28 sps:$4 sm:$0xff]   ;;  %v11750_v16 = vpop.f32.mrb[82].mxu1  ;;  %v9938_v10 = vld [vmem:[%s13633_s0 + $0xc08] ss:$28 sps:$4 sm:$0xff]  }
 0x1d4   :  { %13642 = vst [vmem:[#allocation8_spill] sm:$0xff] %v11750_v16  ;;  %v3565_v24 = vpop.f32.mrb[83].mxu1 }
 0x1d9   :  { %3807 = vmatmul.mubr.bf16.gmra.mrb[204].mxu1 %v9913_v26  ;;  %v11755_v26 = vpop.f32.mrb[84].mxu1 }
 0x1da   :  { %4352 = vmatmul.mubr.bf16.gmra.mrb[204].mxu0 %v9914_v32  ;;  %3814 = vmatprep.mubr.bf16.mxu1 %v9915_v33  ;;  %13643 = vst [vmem:[#allocation9_spill] sm:$0xff] %v11755_v26  ;;  %v3570_v28 = vpop.f32.mrb[85].mxu1 }
 0x1db   :  { %4359 = vmatprep.mubr.bf16.mxu0 %v9917_v35  ;;  %v11757_v32 = vpop.f32.mrb[86].mxu1  ;;  %v9942_v28 = vld [vmem:[%s13633_s0 + $0xc4c] ss:$28 sps:$4 sm:$0xff]  }
 0x1dc   :  { %13644 = vst [vmem:[#allocation10_spill] sm:$0xff] %v11757_v32  ;;  %v3573_v33 = vpop.f32.mrb[87].mxu1 }
 0x1dd   :  { %v11759_v35 = vpop.f32.mrb[88].mxu1 }
 0x1de   :  { %13645 = vst [vmem:[#allocation11_spill] sm:$0xff] %v11759_v35  ;;  %v3578_v42 = vpop.f32.mrb[89].mxu1 }
 0x1df   :  { %v11770_v49 = vpop.f32.mrb[90].mxu1 }
 0x1e0   :  { %13646 = vst [vmem:[#allocation12_spill] sm:$0xff] %v11770_v49 }
 0x1e1   :  { %3815 = vmatmul.mubr.bf16.gmra.mrb[208].mxu1 %v9919_v48  ;;  %v9934_v48 = vld [vmem:[%s13633_s0 + $0xc0c] ss:$28 sps:$4 sm:$0xff]  }
 0x1e2   :  { %4360 = vmatmul.mubr.bf16.gmra.mrb[208].mxu0 %v9920_v51  ;;  %3822 = vmatprep.mubr.bf16.mxu1 %v9922_v54  ;;  %v9936_v51 = vld [vmem:[%s13633_s0 + $0xc14] ss:$28 sps:$4 sm:$0xff]   ;;  %v3581_v54 = vpop.f32.mrb[91].mxu1 }
 0x1e3   :  { %4367 = vmatprep.mubr.bf16.mxu0 %v9924_v57  ;;  %v11775_v57 = vpop.f32.mrb[92].mxu1  ;;  %v9944_v54 = vld [vmem:[%s13633_s0 + $0xc40] ss:$28 sps:$4 sm:$0xff]  }
 0x1e4   :  { %13647 = vst [vmem:[#allocation13_spill] sm:$0xff] %v11775_v57  ;;  %v3586_v58 = vpop.f32.mrb[93].mxu1 }
 0x1e5   :  { %v11777_v62 = vpop.f32.mrb[94].mxu1 }
 0x1e6   :  { %13648 = vst [vmem:[#allocation14_spill] sm:$0xff] %v11777_v62  ;;  %v3589_v4 = vpop.f32.mrb[95].mxu1 }
 0x1e7   :  { %v9945_v4 = vld [vmem:[%s13633_s0 + $0xc48] ss:$28 sps:$4 sm:$0xff]  }
 0x1e9   :  { %3823 = vmatmul.mubr.bf16.gmra.mrb[212].mxu1 %v9926_v8  ;;  %v11779_v8 = vpop.f32.mrb[96].mxu1 }
 0x1ea   :  { %4368 = vmatmul.mubr.bf16.gmra.mrb[212].mxu0 %v9927_v11  ;;  %3830 = vmatprep.mubr.bf16.mxu1 %v9928_v14  ;;  %13649 = vst [vmem:[#allocation15_spill] sm:$0xff] %v11779_v8  ;;  %v3594_v11 = vpop.f32.mrb[97].mxu1  ;;  %v9939_v14 = vld [vmem:[%s13633_s0 + $0xc10] ss:$28 sps:$4 sm:$0xff]  }
 0x1eb   :  { %4375 = vmatprep.mubr.bf16.mxu0 %v9930_v20  ;;  %v9940_v20 = vld [vmem:[%s13633_s0 + $0xc44] ss:$28 sps:$4 sm:$0xff]   ;;  %v11790_v24 = vpop.f32.mrb[98].mxu1 }
 0x1ec   :  { %13650 = vst [vmem:[#allocation16_spill] sm:$0xff] %v11790_v24  ;;  %v3597_v33 = vpop.f32.mrb[99].mxu1 }
 0x1f1   :  { %3831 = vmatmul.mubr.bf16.gmra.mrb[216].mxu1 %v9932_v36  ;;  %v11795_v36 = vpop.f32.mrb[100].mxu1 }
 0x1f2   :  { %4376 = vmatmul.mubr.bf16.gmra.mrb[216].mxu0 %v9933_v44  ;;  %3838 = vmatprep.mubr.bf16.mxu1 %v9934_v48  ;;  %13651 = vst [vmem:[#allocation17_spill] sm:$0xff] %v11795_v36  ;;  %v3602_v42 = vpop.f32.mrb[101].mxu1  ;;  %v10130_v36 = vld [vmem:[%s13633_s0 + $0x634] ss:$28 sps:$4 sm:$0xff]  }
 0x1f3   :  { %4383 = vmatprep.mubr.bf16.mxu0 %v9936_v51  ;;  %v11797_v44 = vpop.f32.mrb[102].mxu1 }
 0x1f4   :  { %13652 = vst [vmem:[#allocation18_spill] sm:$0xff] %v11797_v44  ;;  %v3605_v48 = vpop.f32.mrb[103].mxu1 }
 0x1f5   :  { %v11799_v51 = vpop.f32.mrb[104].mxu1 }
 0x1f6   :  { %13653 = vst [vmem:[#allocation19_spill] sm:$0xff] %v11799_v51  ;;  %v3610_v58 = vpop.f32.mrb[105].mxu1 }
 0x1f7   :  { %v11810_v11 = vpop.f32.mrb[106].mxu1 }
 0x1f8   :  { %13654 = vst [vmem:[#allocation20_spill] sm:$0xff] %v11810_v11  ;;  %v9951_v11 = vld [vmem:[%s13633_s0 + $0xc78] ss:$28 sps:$4 sm:$0xff]  }
 0x1f9   :  { %3839 = vmatmul.mubr.bf16.gmra.mrb[220].mxu1 %v9938_v10  ;;  %v9947_v10 = vld [vmem:[%s13633_s0 + $0xc7c] ss:$28 sps:$4 sm:$0xff]  }
 0x1fa   :  { %4384 = vmatmul.mubr.bf16.gmra.mrb[220].mxu0 %v9939_v14  ;;  %3846 = vmatprep.mubr.bf16.mxu1 %v9940_v20  ;;  %v9949_v14 = vld [vmem:[%s13633_s0 + $0xc84] ss:$28 sps:$4 sm:$0xff]   ;;  %v3613_v20 = vpop.f32.mrb[107].mxu1 }
 0x1fb   :  { %4391 = vmatprep.mubr.bf16.mxu0 %v9942_v28  ;;  %v11815_v28 = vpop.f32.mrb[108].mxu1  ;;  %v9952_v20 = vld [vmem:[%s13633_s0 + $0xc80] ss:$28 sps:$4 sm:$0xff]  }
 0x1fc   :  { %13655 = vst [vmem:[#allocation21_spill] sm:$0xff] %v11815_v28  ;;  %v3618_v33 = vpop.f32.mrb[109].mxu1 }
 0x1fd   :  { %v11817_v42 = vpop.f32.mrb[110].mxu1 }
 0x1fe   :  { %13656 = vst [vmem:[#allocation22_spill] sm:$0xff] %v11817_v42  ;;  %v3621_v48 = vpop.f32.mrb[111].mxu1 }
 0x1ff   :  { %v11819_v58 = vpop.f32.mrb[112].mxu1 }
 0x200   :  { %13657 = vst [vmem:[#allocation23_spill] sm:$0xff] %v11819_v58  ;;  %v3626_v51 = vpop.f32.mrb[113].mxu1 }
 0x201   :  { %3847 = vmatmul.mubr.bf16.gmra.mrb[224].mxu1 %v9944_v54  ;;  %v9953_v54 = vld [vmem:[%s13633_s0 + $0xcb4] ss:$28 sps:$4 sm:$0xff]  }
 0x202   :  { %4392 = vmatmul.mubr.bf16.gmra.mrb[224].mxu0 %v9945_v4  ;;  %3854 = vmatprep.mubr.bf16.mxu1 %v9947_v10  ;;  %v11830_v4 = vpop.f32.mrb[114].mxu1  ;;  %v9955_v10 = vld [vmem:[%s13633_s0 + $0xcbc] ss:$28 sps:$4 sm:$0xff]  }
 0x203   :  { %4399 = vmatprep.mubr.bf16.mxu0 %v9949_v14  ;;  %13658 = vst [vmem:[#allocation24_spill] sm:$0xff] %v11830_v4  ;;  %v3629_v14 = vpop.f32.mrb[115].mxu1  ;;  %v9957_v4 = vld [vmem:[%s13633_s0 + $0xcb0] ss:$28 sps:$4 sm:$0xff]  }
 0x204   :  { %v11835_v33 = vpop.f32.mrb[116].mxu1  ;;  %v9958_v14 = vld [vmem:[%s13633_s0 + $0xcb8] ss:$28 sps:$4 sm:$0xff]  }
 0x205   :  { %13659 = vst [vmem:[#allocation25_spill] sm:$0xff] %v11835_v33  ;;  %v3634_v48 = vpop.f32.mrb[117].mxu1 }
 0x206   :  { %v11837_v51 = vpop.f32.mrb[118].mxu1 }
 0x207   :  { %13660 = vst [vmem:[#allocation26_spill] sm:$0xff] %v11837_v51  ;;  %v3637_v58 = vpop.f32.mrb[119].mxu1 }
 0x208   :  { %v11839_v42 = vpop.f32.mrb[120].mxu1  ;;  %v9961_v58 = vld [vmem:[%s13633_s0 + $0xcf4] ss:$28 sps:$4 sm:$0xff]  }
 0x209   :  { %3855 = vmatmul.mubr.bf16.gmra.mrb[228].mxu1 %v9951_v11  ;;  %13661 = vst [vmem:[#allocation27_spill] sm:$0xff] %v11839_v42  ;;  %v3642_v28 = vpop.f32.mrb[121].mxu1  ;;  %v9959_v11 = vld [vmem:[%s13633_s0 + $0xcec] ss:$28 sps:$4 sm:$0xff]  }
 0x20a   :  { %4400 = vmatmul.mubr.bf16.gmra.mrb[228].mxu0 %v9952_v20  ;;  %3862 = vmatprep.mubr.bf16.mxu1 %v9953_v54  ;;  %v11850_v20 = vpop.f32.mrb[122].mxu1 }
 0x20b   :  { %4407 = vmatprep.mubr.bf16.mxu0 %v9955_v10  ;;  %13662 = vst [vmem:[#allocation28_spill] sm:$0xff] %v11850_v20  ;;  %v3645_v54 = vpop.f32.mrb[123].mxu1  ;;  %v9963_v20 = vld [vmem:[%s13633_s0 + $0xce8] ss:$28 sps:$4 sm:$0xff]  }
 0x20c   :  { %v11855_v10 = vpop.f32.mrb[124].mxu1  ;;  %v9964_v54 = vld [vmem:[%s13633_s0 + $0xcf0] ss:$28 sps:$4 sm:$0xff]  }
 0x20d   :  { %13663 = vst [vmem:[#allocation29_spill] sm:$0xff] %v11855_v10  ;;  %v3650_v48 = vpop.f32.mrb[125].mxu1 }
 0x20e   :  { %v11857_v28 = vpop.f32.mrb[126].mxu1 }
 0x20f   :  { %13664 = vst [vmem:[#allocation30_spill] sm:$0xff] %v11857_v28  ;;  %v3653_v42 = vpop.f32.mrb[127].mxu1 }
 0x210   :  { %v9967_v42 = vld [vmem:[%s13633_s0 + $0xd2c] ss:$28 sps:$4 sm:$0xff]  }
 0x211   :  { %3863 = vmatmul.mubr.bf16.gmra.mrb[232].mxu1 %v9957_v4  ;;  %v9965_v4 = vld [vmem:[%s13633_s0 + $0xd24] ss:$28 sps:$4 sm:$0xff]  }
 0x212   :  { %4408 = vmatmul.mubr.bf16.gmra.mrb[232].mxu0 %v9958_v14  ;;  %3870 = vmatprep.mubr.bf16.mxu1 %v9959_v11 }
 0x213   :  { %4415 = vmatprep.mubr.bf16.mxu0 %v9961_v58  ;;  %v9969_v58 = vld [vmem:[%s13633_s0 + $0xd20] ss:$28 sps:$4 sm:$0xff]  }
 0x214   :  { %v11859_v51 = vpop.f32.mrb[128].mxu1 }
 0x215   :  { %13665 = vst [vmem:[#allocation31_spill] sm:$0xff] %v11859_v51  ;;  %v3658_v33 = vpop.f32.mrb[129].mxu1  ;;  %v9972_v51 = vld [vmem:[%s13633_s0 + $0xd5c] ss:$28 sps:$4 sm:$0xff]  }
 0x216   :  { %v11870_v14 = vpop.f32.mrb[130].mxu1 }
 0x217   :  { %13666 = vst [vmem:[#allocation32_spill] sm:$0xff] %v11870_v14  ;;  %v3661_v11 = vpop.f32.mrb[131].mxu1  ;;  %v9970_v14 = vld [vmem:[%s13633_s0 + $0xd28] ss:$28 sps:$4 sm:$0xff]  }
 0x219   :  { %3871 = vmatmul.mubr.bf16.gmra.mrb[236].mxu1 %v9963_v20  ;;  %v9974_v20 = vld [vmem:[%s13633_s0 + $0xd64] ss:$28 sps:$4 sm:$0xff]  }
 0x21a   :  { %4416 = vmatmul.mubr.bf16.gmra.mrb[236].mxu0 %v9964_v54  ;;  %3878 = vmatprep.mubr.bf16.mxu1 %v9965_v4 }
 0x21b   :  { %4423 = vmatprep.mubr.bf16.mxu0 %v9967_v42  ;;  %v9976_v42 = vld [vmem:[%s13633_s0 + $0xd58] ss:$28 sps:$4 sm:$0xff]  }
 0x21c   :  { %v11875_v33 = vpop.f32.mrb[132].mxu1 }
 0x21d   :  { %13667 = vst [vmem:[#allocation33_spill] sm:$0xff] %v11875_v33  ;;  %v3666_v48 = vpop.f32.mrb[133].mxu1  ;;  %v9978_v33 = vld [vmem:[%s13633_s0 + $0xd94] ss:$28 sps:$4 sm:$0xff]  }
 0x21e   :  { %v11886_v11 = vpop.f32.mrb[134].mxu1 }
 0x21f   :  { %13668 = vst [vmem:[#allocation34_spill] sm:$0xff] %v11886_v11  ;;  %v3669_v54 = vpop.f32.mrb[135].mxu1  ;;  %v9977_v11 = vld [vmem:[%s13633_s0 + $0xd60] ss:$28 sps:$4 sm:$0xff]  }
 0x221   :  { %3879 = vmatmul.mubr.bf16.gmra.mrb[240].mxu1 %v9969_v58 }
 0x222   :  { %4424 = vmatmul.mubr.bf16.gmra.mrb[240].mxu0 %v9970_v14  ;;  %3886 = vmatprep.mubr.bf16.mxu1 %v9972_v51  ;;  %v9980_v51 = vld [vmem:[%s13633_s0 + $0xd9c] ss:$28 sps:$4 sm:$0xff]  }
 0x223   :  { %4431 = vmatprep.mubr.bf16.mxu0 %v9974_v20  ;;  %v9982_v20 = vld [vmem:[%s13633_s0 + $0xd90] ss:$28 sps:$4 sm:$0xff]  }
 0x224   :  { %v11891_v4 = vpop.f32.mrb[136].mxu1 }
 0x225   :  { %13669 = vst [vmem:[#allocation35_spill] sm:$0xff] %v11891_v4  ;;  %v3674_v48 = vpop.f32.mrb[137].mxu1  ;;  %v9984_v4 = vld [vmem:[%s13633_s0 + $0xdcc] ss:$28 sps:$4 sm:$0xff]  }
 0x226   :  { %v11902_v54 = vpop.f32.mrb[138].mxu1 }
 0x227   :  { %13670 = vst [vmem:[#allocation36_spill] sm:$0xff] %v11902_v54  ;;  %v3677_v14 = vpop.f32.mrb[139].mxu1  ;;  %v9983_v54 = vld [vmem:[%s13633_s0 + $0xd98] ss:$28 sps:$4 sm:$0xff]  }
 0x229   :  { %3887 = vmatmul.mubr.bf16.gmra.mrb[244].mxu1 %v9976_v42 }
 0x22a   :  { %4432 = vmatmul.mubr.bf16.gmra.mrb[244].mxu0 %v9977_v11  ;;  %3894 = vmatprep.mubr.bf16.mxu1 %v9978_v33  ;;  %v9986_v33 = vld [vmem:[%s13633_s0 + $0xdd4] ss:$28 sps:$4 sm:$0xff]  }
 0x22b   :  { %4439 = vmatprep.mubr.bf16.mxu0 %v9980_v51  ;;  %v9988_v51 = vld [vmem:[%s13633_s0 + $0xdc8] ss:$28 sps:$4 sm:$0xff]  }
 0x22c   :  { %v11907_v58 = vpop.f32.mrb[140].mxu1 }
 0x22d   :  { %13671 = vst [vmem:[#allocation37_spill] sm:$0xff] %v11907_v58  ;;  %v3682_v48 = vpop.f32.mrb[141].mxu1  ;;  %v9993_v58 = vld [vmem:[%s13633_s0 + $0x18] ss:$28 sps:$4 sm:$0xff]  }
 0x22e   :  { %v11918_v14 = vpop.f32.mrb[142].mxu1 }
 0x22f   :  { %13672 = vst [vmem:[#allocation38_spill] sm:$0xff] %v11918_v14  ;;  %v3685_v11 = vpop.f32.mrb[143].mxu1  ;;  %v9989_v14 = vld [vmem:[%s13633_s0 + $0xdd0] ss:$28 sps:$4 sm:$0xff]  }
 0x231   :  { %3895 = vmatmul.mubr.bf16.gmra.mrb[248].mxu1 %v9982_v20 }
 0x232   :  { %4440 = vmatmul.mubr.bf16.gmra.mrb[248].mxu0 %v9983_v54  ;;  %3902 = vmatprep.mubr.bf16.mxu1 %v9984_v4  ;;  %v9992_v4 = vld [vmem:[%s13633_s0 + $0x14] ss:$28 sps:$4 sm:$0xff]  }
 0x233   :  { %4447 = vmatprep.mubr.bf16.mxu0 %v9986_v33  ;;  %v9994_v33 = vld [vmem:[%s13633_s0 + $0x50] ss:$28 sps:$4 sm:$0xff]  }
 0x234   :  { %v11923_v42 = vpop.f32.mrb[144].mxu1 }
 0x235   :  { %13673 = vst [vmem:[#allocation39_spill] sm:$0xff] %v11923_v42  ;;  %v3690_v48 = vpop.f32.mrb[145].mxu1 }
 0x236   :  { %v11934_v11 = vpop.f32.mrb[146].mxu1 }
 0x237   :  { %13674 = vst [vmem:[#allocation40_spill] sm:$0xff] %v11934_v11  ;;  %v3693_v54 = vpop.f32.mrb[147].mxu1  ;;  %v9990_v11 = vld [vmem:[%s13633_s0 + $0x10] ss:$28 sps:$4 sm:$0xff]  }
 0x238   :  { %v9997_v54 = vld [vmem:[%s13633_s0 + $0x88] ss:$28 sps:$4 sm:$0xff]  }
 0x239   :  { %3903 = vmatmul.mubr.bf16.gmra.mrb[252].mxu1 %v9988_v51 }
 0x23a   :  { %4448 = vmatmul.mubr.bf16.gmra.mrb[252].mxu0 %v9989_v14  ;;  %8705 = vmatprep.mubr.msk.bf16.mxu1 %vm3173_vm0, %v9993_v58  ;;  %v9995_v58 = vld [vmem:[%s13633_s0 + $0x4c] ss:$28 sps:$4 sm:$0xff]  }
 0x23b   :  { %4488 = vmatprep.mubr.bf16.mxu0 %v9992_v4 }
 0x23c   :  { %v11940_v20 = vpop.f32.mrb[148].mxu1 }
 0x23d   :  { %13675 = vst [vmem:[#allocation41_spill] sm:$0xff] %v11940_v20  ;;  %v3698_v48 = vpop.f32.mrb[149].mxu1 }
 0x23e   :  { %v11951_v51 = vpop.f32.mrb[150].mxu1  ;;  %v9999_v48 = vld [vmem:[%s13633_s0 + $0xc0] ss:$28 sps:$4 sm:$0xff]  }
 0x23f   :  { %13676 = vst [vmem:[#allocation42_spill] sm:$0xff] %v11951_v51  ;;  %v3701_v14 = vpop.f32.mrb[151].mxu1  ;;  %v9998_v51 = vld [vmem:[%s13633_s0 + $0x48] ss:$28 sps:$4 sm:$0xff]  }
 0x240   :  { %v10002_v14 = vld [vmem:[%s13633_s0 + $0xf8] ss:$28 sps:$4 sm:$0xff]  }
 0x241   :  { %8706 = vmatmul.mubr.msk.bf16.vlgmr.msra.gmra.mrb[0].mxu1 %vm3173_vm0, %v9994_v33 }
 0x242   :  { %4489 = vmatmul.mubr.bf16.vlgmr.msra.gmra.mrb[0].mxu0 %v9990_v11  ;;  %8709 = vmatprep.mubr.msk.bf16.mxu1 %vm3173_vm0, %v9997_v54  ;;  %v10000_v11 = vld [vmem:[%s13633_s0 + $0x84] ss:$28 sps:$4 sm:$0xff]  }
 0x243   :  { %4496 = vmatprep.mubr.bf16.mxu0 %v9995_v58  ;;  %v10004_v58 = vld [vmem:[%s13633_s0 + $0x130] ss:$28 sps:$4 sm:$0xff]  }
 0x244   :  { %v11958_v4 = vpop.f32.mrb[152].mxu1 }
 0x245   :  { %13677 = vst [vmem:[#allocation43_spill] sm:$0xff] %v11958_v4  ;;  %v3706_v20 = vpop.f32.mrb[153].mxu1 }
 0x246   :  { %v11969_v33 = vpop.f32.mrb[154].mxu1 }
 0x247   :  { %13678 = vst [vmem:[#allocation44_spill] sm:$0xff] %v11969_v33  ;;  %v3709_v54 = vpop.f32.mrb[155].mxu1  ;;  %v10003_v33 = vld [vmem:[%s13633_s0 + $0x80] ss:$28 sps:$4 sm:$0xff]  }
 0x248   :  { %v10007_v54 = vld [vmem:[%s13633_s0 + $0x168] ss:$28 sps:$4 sm:$0xff]  }
 0x249   :  { %8710 = vmatmul.mubr.msk.bf16.gmra.mrb[4].mxu1 %vm3173_vm0, %v9999_v48 }
 0x24a   :  { %4497 = vmatmul.mubr.bf16.gmra.mrb[4].mxu0 %v9998_v51  ;;  %8713 = vmatprep.mubr.msk.bf16.mxu1 %vm3173_vm0, %v10002_v14  ;;  %v10005_v51 = vld [vmem:[%s13633_s0 + $0xbc] ss:$28 sps:$4 sm:$0xff]  }
 0x24b   :  { %4504 = vmatprep.mubr.bf16.mxu0 %v10000_v11  ;;  %v10009_v11 = vld [vmem:[%s13633_s0 + $0x1a0] ss:$28 sps:$4 sm:$0xff]  }
 0x24c   :  { %v11976_v20 = vpop.f32.mrb[156].mxu1 }
 0x24d   :  { %13679 = vst [vmem:[#allocation45_spill] sm:$0xff] %v11976_v20  ;;  %v3714_v4 = vpop.f32.mrb[157].mxu1 }
 0x24e   :  { %v11987_v48 = vpop.f32.mrb[158].mxu1 }
 0x24f   :  { %13680 = vst [vmem:[#allocation46_spill] sm:$0xff] %v11987_v48  ;;  %v3717_v14 = vpop.f32.mrb[159].mxu1  ;;  %v10008_v48 = vld [vmem:[%s13633_s0 + $0xb8] ss:$28 sps:$4 sm:$0xff]  }
 0x250   :  { %v10012_v14 = vld [vmem:[%s13633_s0 + $0x1d8] ss:$28 sps:$4 sm:$0xff]  }
 0x251   :  { %8714 = vmatmul.mubr.msk.bf16.gmra.mrb[8].mxu1 %vm3173_vm0, %v10004_v58 }
 0x252   :  { %4505 = vmatmul.mubr.bf16.gmra.mrb[8].mxu0 %v10003_v33  ;;  %8717 = vmatprep.mubr.msk.bf16.mxu1 %vm3173_vm0, %v10007_v54  ;;  %v10010_v33 = vld [vmem:[%s13633_s0 + $0xf4] ss:$28 sps:$4 sm:$0xff]  }
 0x253   :  { %4512 = vmatprep.mubr.bf16.mxu0 %v10005_v51  ;;  %v10014_v51 = vld [vmem:[%s13633_s0 + $0x210] ss:$28 sps:$4 sm:$0xff]  }
 0x254   :  { %v11994_v4 = vpop.f32.mrb[160].mxu1 }
 0x255   :  { %13681 = vst [vmem:[#allocation47_spill] sm:$0xff] %v11994_v4  ;;  %v3722_v20 = vpop.f32.mrb[161].mxu1 }
 0x256   :  { %v12005_v58 = vpop.f32.mrb[162].mxu1 }
 0x257   :  { %13682 = vst [vmem:[#allocation48_spill] sm:$0xff] %v12005_v58  ;;  %v3725_v54 = vpop.f32.mrb[163].mxu1  ;;  %v10013_v58 = vld [vmem:[%s13633_s0 + $0xf0] ss:$28 sps:$4 sm:$0xff]  }
 0x258   :  { %v10017_v54 = vld [vmem:[%s13633_s0 + $0x248] ss:$28 sps:$4 sm:$0xff]  }
 0x259   :  { %8718 = vmatmul.mubr.msk.bf16.gmra.mrb[12].mxu1 %vm3173_vm0, %v10009_v11 }
 0x25a   :  { %4513 = vmatmul.mubr.bf16.gmra.mrb[12].mxu0 %v10008_v48  ;;  %8721 = vmatprep.mubr.msk.bf16.mxu1 %vm3173_vm0, %v10012_v14  ;;  %v10015_v48 = vld [vmem:[%s13633_s0 + $0x12c] ss:$28 sps:$4 sm:$0xff]  }
 0x25b   :  { %4520 = vmatprep.mubr.bf16.mxu0 %v10010_v33  ;;  %v10019_v33 = vld [vmem:[%s13633_s0 + $0x280] ss:$28 sps:$4 sm:$0xff]  }
 0x25c   :  { %v12012_v20 = vpop.f32.mrb[164].mxu1 }
 0x25d   :  { %13683 = vst [vmem:[#allocation49_spill] sm:$0xff] %v12012_v20  ;;  %v3730_v4 = vpop.f32.mrb[165].mxu1 }
 0x25e   :  { %v12023_v11 = vpop.f32.mrb[166].mxu1 }
 0x25f   :  { %13684 = vst [vmem:[#allocation50_spill] sm:$0xff] %v12023_v11  ;;  %v3733_v14 = vpop.f32.mrb[167].mxu1  ;;  %v10018_v11 = vld [vmem:[%s13633_s0 + $0x128] ss:$28 sps:$4 sm:$0xff]  }
 0x260   :  { %v10022_v14 = vld [vmem:[%s13633_s0 + $0x2b8] ss:$28 sps:$4 sm:$0xff]  }
 0x261   :  { %8722 = vmatmul.mubr.msk.bf16.gmra.mrb[16].mxu1 %vm3173_vm0, %v10014_v51 }
 0x262   :  { %4521 = vmatmul.mubr.bf16.gmra.mrb[16].mxu0 %v10013_v58  ;;  %8725 = vmatprep.mubr.msk.bf16.mxu1 %vm3173_vm0, %v10017_v54  ;;  %v10020_v58 = vld [vmem:[%s13633_s0 + $0x164] ss:$28 sps:$4 sm:$0xff]  }
 0x263   :  { %4528 = vmatprep.mubr.bf16.mxu0 %v10015_v48  ;;  %v10024_v48 = vld [vmem:[%s13633_s0 + $0x2f0] ss:$28 sps:$4 sm:$0xff]  }
 0x264   :  { %v12030_v4 = vpop.f32.mrb[168].mxu1 }
 0x265   :  { %13685 = vst [vmem:[#allocation51_spill] sm:$0xff] %v12030_v4  ;;  %v3738_v20 = vpop.f32.mrb[169].mxu1 }
 0x266   :  { %v12041_v51 = vpop.f32.mrb[170].mxu1 }
 0x267   :  { %13686 = vst [vmem:[#allocation52_spill] sm:$0xff] %v12041_v51  ;;  %v3741_v54 = vpop.f32.mrb[171].mxu1  ;;  %v10023_v51 = vld [vmem:[%s13633_s0 + $0x160] ss:$28 sps:$4 sm:$0xff]  }
 0x268   :  { %v10027_v54 = vld [vmem:[%s13633_s0 + $0x328] ss:$28 sps:$4 sm:$0xff]  }
 0x269   :  { %8726 = vmatmul.mubr.msk.bf16.gmra.mrb[20].mxu1 %vm3173_vm0, %v10019_v33 }
 0x26a   :  { %4529 = vmatmul.mubr.bf16.gmra.mrb[20].mxu0 %v10018_v11  ;;  %8729 = vmatprep.mubr.msk.bf16.mxu1 %vm3173_vm0, %v10022_v14  ;;  %v10025_v11 = vld [vmem:[%s13633_s0 + $0x19c] ss:$28 sps:$4 sm:$0xff]  }
 0x26b   :  { %4536 = vmatprep.mubr.bf16.mxu0 %v10020_v58  ;;  %v10029_v58 = vld [vmem:[%s13633_s0 + $0x360] ss:$28 sps:$4 sm:$0xff]  }
 0x26c   :  { %v12048_v20 = vpop.f32.mrb[172].mxu1 }
 0x26d   :  { %13687 = vst [vmem:[#allocation53_spill] sm:$0xff] %v12048_v20  ;;  %v3746_v4 = vpop.f32.mrb[173].mxu1 }
 0x26e   :  { %v12059_v33 = vpop.f32.mrb[174].mxu1 }
 0x26f   :  { %13688 = vst [vmem:[#allocation54_spill] sm:$0xff] %v12059_v33  ;;  %v3749_v14 = vpop.f32.mrb[175].mxu1  ;;  %v10028_v33 = vld [vmem:[%s13633_s0 + $0x198] ss:$28 sps:$4 sm:$0xff]  }
 0x270   :  { %v10032_v14 = vld [vmem:[%s13633_s0 + $0x398] ss:$28 sps:$4 sm:$0xff]  }
 0x271   :  { %8730 = vmatmul.mubr.msk.bf16.gmra.mrb[24].mxu1 %vm3173_vm0, %v10024_v48 }
 0x272   :  { %4537 = vmatmul.mubr.bf16.gmra.mrb[24].mxu0 %v10023_v51  ;;  %8733 = vmatprep.mubr.msk.bf16.mxu1 %vm3173_vm0, %v10027_v54  ;;  %v10030_v51 = vld [vmem:[%s13633_s0 + $0x1d4] ss:$28 sps:$4 sm:$0xff]  }
 0x273   :  { %4544 = vmatprep.mubr.bf16.mxu0 %v10025_v11  ;;  %v10034_v11 = vld [vmem:[%s13633_s0 + $0x3d0] ss:$28 sps:$4 sm:$0xff]  }
 0x274   :  { %v12066_v4 = vpop.f32.mrb[176].mxu1 }
 0x275   :  { %13689 = vst [vmem:[#allocation55_spill] sm:$0xff] %v12066_v4  ;;  %v3754_v20 = vpop.f32.mrb[177].mxu1 }
 0x276   :  { %v12077_v48 = vpop.f32.mrb[178].mxu1 }
 0x277   :  { %13690 = vst [vmem:[#allocation56_spill] sm:$0xff] %v12077_v48  ;;  %v3757_v54 = vpop.f32.mrb[179].mxu1  ;;  %v10033_v48 = vld [vmem:[%s13633_s0 + $0x1d0] ss:$28 sps:$4 sm:$0xff]  }
 0x278   :  { %v10037_v54 = vld [vmem:[%s13633_s0 + $0x408] ss:$28 sps:$4 sm:$0xff]  }
 0x279   :  { %8734 = vmatmul.mubr.msk.bf16.gmra.mrb[28].mxu1 %vm3173_vm0, %v10029_v58 }
 0x27a   :  { %4545 = vmatmul.mubr.bf16.gmra.mrb[28].mxu0 %v10028_v33  ;;  %8737 = vmatprep.mubr.msk.bf16.mxu1 %vm3173_vm0, %v10032_v14  ;;  %v10035_v33 = vld [vmem:[%s13633_s0 + $0x20c] ss:$28 sps:$4 sm:$0xff]  }
 0x27b   :  { %4552 = vmatprep.mubr.bf16.mxu0 %v10030_v51  ;;  %v10039_v51 = vld [vmem:[%s13633_s0 + $0x440] ss:$28 sps:$4 sm:$0xff]  }
 0x27c   :  { %v12084_v20 = vpop.f32.mrb[180].mxu1 }
 0x27d   :  { %13691 = vst [vmem:[#allocation57_spill] sm:$0xff] %v12084_v20  ;;  %v3762_v4 = vpop.f32.mrb[181].mxu1 }
 0x27e   :  { %v12095_v58 = vpop.f32.mrb[182].mxu1 }
 0x27f   :  { %13692 = vst [vmem:[#allocation58_spill] sm:$0xff] %v12095_v58  ;;  %v3765_v14 = vpop.f32.mrb[183].mxu1  ;;  %v10038_v58 = vld [vmem:[%s13633_s0 + $0x208] ss:$28 sps:$4 sm:$0xff]  }
 0x280   :  { %v10042_v14 = vld [vmem:[%s13633_s0 + $0x478] ss:$28 sps:$4 sm:$0xff]  }
 0x281   :  { %8738 = vmatmul.mubr.msk.bf16.gmra.mrb[32].mxu1 %vm3173_vm0, %v10034_v11 }
 0x282   :  { %4553 = vmatmul.mubr.bf16.gmra.mrb[32].mxu0 %v10033_v48  ;;  %8741 = vmatprep.mubr.msk.bf16.mxu1 %vm3173_vm0, %v10037_v54  ;;  %v10040_v48 = vld [vmem:[%s13633_s0 + $0x244] ss:$28 sps:$4 sm:$0xff]  }
 0x283   :  { %4560 = vmatprep.mubr.bf16.mxu0 %v10035_v33  ;;  %v10044_v33 = vld [vmem:[%s13633_s0 + $0x4b0] ss:$28 sps:$4 sm:$0xff]  }
 0x284   :  { %v12102_v4 = vpop.f32.mrb[184].mxu1 }
 0x285   :  { %13693 = vst [vmem:[#allocation59_spill] sm:$0xff] %v12102_v4  ;;  %v3770_v20 = vpop.f32.mrb[185].mxu1 }
 0x286   :  { %v12113_v11 = vpop.f32.mrb[186].mxu1 }
 0x287   :  { %13694 = vst [vmem:[#allocation60_spill] sm:$0xff] %v12113_v11  ;;  %v3773_v54 = vpop.f32.mrb[187].mxu1  ;;  %v10043_v11 = vld [vmem:[%s13633_s0 + $0x240] ss:$28 sps:$4 sm:$0xff]  }
 0x288   :  { %v10047_v54 = vld [vmem:[%s13633_s0 + $0x4e8] ss:$28 sps:$4 sm:$0xff]  }
 0x289   :  { %8742 = vmatmul.mubr.msk.bf16.gmra.mrb[36].mxu1 %vm3173_vm0, %v10039_v51 }
 0x28a   :  { %4561 = vmatmul.mubr.bf16.gmra.mrb[36].mxu0 %v10038_v58  ;;  %8745 = vmatprep.mubr.msk.bf16.mxu1 %vm3173_vm0, %v10042_v14  ;;  %v10045_v58 = vld [vmem:[%s13633_s0 + $0x27c] ss:$28 sps:$4 sm:$0xff]  }
 0x28b   :  { %4568 = vmatprep.mubr.bf16.mxu0 %v10040_v48  ;;  %v10049_v48 = vld [vmem:[%s13633_s0 + $0x520] ss:$28 sps:$4 sm:$0xff]  }
 0x28c   :  { %v12120_v20 = vpop.f32.mrb[188].mxu1 }
 0x28d   :  { %13695 = vst [vmem:[#allocation61_spill] sm:$0xff] %v12120_v20  ;;  %v3778_v4 = vpop.f32.mrb[189].mxu1 }
 0x28e   :  { %v12131_v51 = vpop.f32.mrb[190].mxu1 }
 0x28f   :  { %13696 = vst [vmem:[#allocation62_spill] sm:$0xff] %v12131_v51  ;;  %v3781_v14 = vpop.f32.mrb[191].mxu1  ;;  %v10048_v51 = vld [vmem:[%s13633_s0 + $0x278] ss:$28 sps:$4 sm:$0xff]  }
 0x290   :  { %v10052_v14 = vld [vmem:[%s13633_s0 + $0x558] ss:$28 sps:$4 sm:$0xff]  }
 0x291   :  { %8746 = vmatmul.mubr.msk.bf16.gmra.mrb[40].mxu1 %vm3173_vm0, %v10044_v33 }
 0x292   :  { %4569 = vmatmul.mubr.bf16.gmra.mrb[40].mxu0 %v10043_v11  ;;  %8749 = vmatprep.mubr.msk.bf16.mxu1 %vm3173_vm0, %v10047_v54  ;;  %v10050_v11 = vld [vmem:[%s13633_s0 + $0x2b4] ss:$28 sps:$4 sm:$0xff]  }
 0x293   :  { %4576 = vmatprep.mubr.bf16.mxu0 %v10045_v58  ;;  %v5674_v58 = vld [vmem:[%s13636_s3] sm:$0xff] }
 0x294   :  { %v12138_v4 = vpop.f32.mrb[192].mxu1 }
 0x295   :  { %13697 = vst [vmem:[#allocation63_spill] sm:$0xff] %v12138_v4  ;;  %v3786_v20 = vpop.f32.mrb[193].mxu1 }
 0x296   :  { %v12149_v33 = vpop.f32.mrb[194].mxu1 }
 0x297   :  { %13698 = vst [vmem:[#allocation64_spill] sm:$0xff] %v12149_v33  ;;  %v3789_v54 = vpop.f32.mrb[195].mxu1  ;;  %v5675_v33 = vld [vmem:[%s13636_s3 + $0x8] sm:$0xff] }
 0x298   :  { %v10054_v54 = vld [vmem:[%s13633_s0 + $0x590] ss:$28 sps:$4 sm:$0xff]  }
 0x299   :  { %8750 = vmatmul.mubr.msk.bf16.gmra.mrb[44].mxu1 %vm3173_vm0, %v10049_v48  ;;  %v9033_v48 = vpack.c.bf16 %v5675_v33, %v5674_v58  ;;  %v10059_v33 = vld [vmem:[%s13633_s0 + $0x600] ss:$28 sps:$4 sm:$0xff]  }
 0x29a   :  { %4577 = vmatmul.mubr.bf16.gmra.mrb[44].mxu0 %v10048_v51  ;;  %8753 = vmatprep.mubr.msk.bf16.mxu1 %vm3173_vm0, %v10052_v14  ;;  %v10053_v51 = vld [vmem:[%s13633_s0 + $0x2b0] ss:$28 sps:$4 sm:$0xff]   ;;  %v10057_v14 = vld [vmem:[%s13633_s0 + $0x5c8] ss:$28 sps:$4 sm:$0xff]  }
 0x29b   :  { %4584 = vmatprep.mubr.bf16.mxu0 %v10050_v11  ;;  %9034 = vmatprep.subr.bf16.mxu1 %v9033_v48 }
 0x29c   :  { %v12156_v20 = vpop.f32.mrb[196].mxu1  ;;  %9036 = vmatpush3.bf16.msra.mxu1 %v9033_v48 }
 0x29d   :  { %13699 = vst [vmem:[#allocation65_spill] sm:$0xff] %v12156_v20  ;;  %v3794_v4 = vpop.f32.mrb[197].mxu1  ;;  %v10055_v20 = vld [vmem:[%s13633_s0 + $0x2ec] ss:$28 sps:$4 sm:$0xff]  }
 0x29e   :  { %v12173_v11 = vpop.f32.mrb[198].mxu1 }
 0x29f   :  { %13700 = vst [vmem:[#allocation66_spill] sm:$0xff] %v12173_v11  ;;  %v3797_v42 = vpop.f32.mrb[199].mxu1  ;;  %v10058_v11 = vld [vmem:[%s13633_s0 + $0x2e8] ss:$28 sps:$4 sm:$0xff]  }
 0x2a0   :  { %v10062_v42 = vld [vmem:[%s13633_s0 + $0x638] ss:$28 sps:$4 sm:$0xff]  }
 0x2a1   :  { %8754 = vmatmul.mubr.msk.bf16.gmra.mrb[48].mxu1 %vm3173_vm0, %v10054_v54 }
 0x2a2   :  { %4585 = vmatmul.mubr.bf16.gmra.mrb[48].mxu0 %v10053_v51  ;;  %8757 = vmatprep.mubr.msk.bf16.mxu1 %vm3173_vm0, %v10057_v14  ;;  %v10064_v14 = vld [vmem:[%s13633_s0 + $0x670] ss:$28 sps:$4 sm:$0xff]  }
 0x2a3   :  { %4592 = vmatprep.mubr.bf16.mxu0 %v10055_v20  ;;  %v10060_v20 = vld [vmem:[%s13633_s0 + $0x324] ss:$28 sps:$4 sm:$0xff]  }
 0x2a4   :  { %v12180_v4 = vpop.f32.mrb[200].mxu1 }
 0x2a5   :  { %13701 = vst [vmem:[#allocation67_spill] sm:$0xff] %v12180_v4  ;;  %v3802_v58 = vpop.f32.mrb[201].mxu1  ;;  %v10078_v4 = vld [vmem:[%s13633_s0 + $0x3c8] ss:$28 sps:$4 sm:$0xff]  }
 0x2a6   :  { %v12191_v54 = vpop.f32.mrb[202].mxu1 }
 0x2a7   :  { %13702 = vst [vmem:[#allocation68_spill] sm:$0xff] %v12191_v54  ;;  %v3805_v48 = vpop.f32.mrb[203].mxu1  ;;  %v10063_v54 = vld [vmem:[%s13633_s0 + $0x320] ss:$28 sps:$4 sm:$0xff]  }
 0x2a8   :  { %v10067_v48 = vld [vmem:[%s13633_s0 + $0x6a8] ss:$28 sps:$4 sm:$0xff]  }
 0x2a9   :  { %8758 = vmatmul.mubr.msk.bf16.gmra.mrb[52].mxu1 %vm3173_vm0, %v10059_v33 }
 0x2aa   :  { %4593 = vmatmul.mubr.bf16.gmra.mrb[52].mxu0 %v10058_v11  ;;  %8761 = vmatprep.mubr.msk.bf16.mxu1 %vm3173_vm0, %v10062_v42  ;;  %v10065_v11 = vld [vmem:[%s13633_s0 + $0x35c] ss:$28 sps:$4 sm:$0xff]  }
 0x2ab   :  { %4600 = vmatprep.mubr.bf16.mxu0 %v10060_v20 }
 0x2ac   :  { %v12198_v51 = vpop.f32.mrb[204].mxu1 }
 0x2ad   :  { %13703 = vst [vmem:[#allocation69_spill] sm:$0xff] %v12198_v51  ;;  %v3810_v58 = vpop.f32.mrb[205].mxu1 }
 0x2ae   :  { %v12209_v33 = vpop.f32.mrb[206].mxu1  ;;  %v10069_v58 = vld [vmem:[%s13633_s0 + $0x6e0] ss:$28 sps:$4 sm:$0xff]  }
 0x2af   :  { %13704 = vst [vmem:[#allocation70_spill] sm:$0xff] %v12209_v33  ;;  %v3813_v42 = vpop.f32.mrb[207].mxu1  ;;  %v10068_v33 = vld [vmem:[%s13633_s0 + $0x358] ss:$28 sps:$4 sm:$0xff]  }
 0x2b0   :  { %v10072_v42 = vld [vmem:[%s13633_s0 + $0x718] ss:$28 sps:$4 sm:$0xff]  }
 0x2b1   :  { %8762 = vmatmul.mubr.msk.bf16.gmra.mrb[56].mxu1 %vm3173_vm0, %v10064_v14 }
 0x2b2   :  { %4601 = vmatmul.mubr.bf16.gmra.mrb[56].mxu0 %v10063_v54  ;;  %8765 = vmatprep.mubr.msk.bf16.mxu1 %vm3173_vm0, %v10067_v48  ;;  %v10070_v54 = vld [vmem:[%s13633_s0 + $0x394] ss:$28 sps:$4 sm:$0xff]  }
 0x2b3   :  { %4608 = vmatprep.mubr.bf16.mxu0 %v10065_v11  ;;  %v5677_v11 = vld [vmem:[%s13636_s3 + $0x18] sm:$0xff] }
 0x2b4   :  { %v12216_v20 = vpop.f32.mrb[208].mxu1 }
 0x2b5   :  { %13705 = vst [vmem:[#allocation71_spill] sm:$0xff] %v12216_v20  ;;  %v3818_v51 = vpop.f32.mrb[209].mxu1 }
 0x2b6   :  { %v12227_v14 = vpop.f32.mrb[210].mxu1  ;;  %v5676_v51 = vld [vmem:[%s13636_s3 + $0x10] sm:$0xff] }
 0x2b7   :  { %13706 = vst [vmem:[#allocation72_spill] sm:$0xff] %v12227_v14  ;;  %v3821_v48 = vpop.f32.mrb[211].mxu1  ;;  %v9037_v20 = vpack.c.bf16 %v5677_v11, %v5676_v51  ;;  %v10075_v51 = vld [vmem:[%s13633_s0 + $0x3cc] ss:$28 sps:$4 sm:$0xff]  }
 0x2b8   :  { %v10074_v48 = vld [vmem:[%s13633_s0 + $0x750] ss:$28 sps:$4 sm:$0xff]  }
 0x2b9   :  { %8766 = vmatmul.mubr.msk.bf16.gmra.mrb[60].mxu1 %vm3173_vm0, %v10069_v58  ;;  %9038 = vmatprep.subr.bf16.mxu1 %v9037_v20 }
 0x2ba   :  { %4609 = vmatmul.mubr.bf16.gmra.mrb[60].mxu0 %v10068_v33  ;;  %8769 = vmatprep.mubr.msk.bf16.mxu1 %vm3173_vm0, %v10072_v42  ;;  %v10073_v33 = vld [vmem:[%s13633_s0 + $0x390] ss:$28 sps:$4 sm:$0xff]   ;;  %v10077_v42 = vld [vmem:[%s13633_s0 + $0x788] ss:$28 sps:$4 sm:$0xff]  }
 0x2bb   :  { %4616 = vmatprep.mubr.bf16.mxu0 %v10070_v54  ;;  %9040 = vmatpush3.bf16.msra.mxu1 %v9037_v20  ;;  %v10082_v20 = vld [vmem:[%s13633_s0 + $0x7f8] ss:$28 sps:$4 sm:$0xff]  }
 0x2bc   :  { %v12240_v14 = vpop.f32.mrb[212].mxu1 }
 0x2bd   :  { %13707 = vst [vmem:[#allocation73_spill] sm:$0xff] %v12240_v14  ;;  %v3826_v58 = vpop.f32.mrb[213].mxu1  ;;  %v10079_v14 = vld [vmem:[%s13633_s0 + $0x7c0] ss:$28 sps:$4 sm:$0xff]  }
 0x2be   :  { %v12251_v54 = vpop.f32.mrb[214].mxu1 }
 0x2bf   :  { %13708 = vst [vmem:[#allocation74_spill] sm:$0xff] %v12251_v54  ;;  %v3829_v11 = vpop.f32.mrb[215].mxu1 }
 0x2c1   :  { %8770 = vmatmul.mubr.msk.bf16.gmra.mrb[64].mxu1 %vm3173_vm0, %v10074_v48 }
 0x2c2   :  { %4617 = vmatmul.mubr.bf16.gmra.mrb[64].mxu0 %v10073_v33  ;;  %8773 = vmatprep.mubr.msk.bf16.mxu1 %vm3173_vm0, %v10077_v42  ;;  %v10080_v33 = vld [vmem:[%s13633_s0 + $0x404] ss:$28 sps:$4 sm:$0xff]  }
 0x2c3   :  { %4624 = vmatprep.mubr.bf16.mxu0 %v10075_v51  ;;  %v10084_v51 = vld [vmem:[%s13633_s0 + $0x830] ss:$28 sps:$4 sm:$0xff]  }
 0x2c4   :  { %v12258_v58 = vpop.f32.mrb[216].mxu1 }
 0x2c5   :  { %13709 = vst [vmem:[#allocation75_spill] sm:$0xff] %v12258_v58  ;;  %v3834_v54 = vpop.f32.mrb[217].mxu1 }
 0x2c6   :  { %v12269_v48 = vpop.f32.mrb[218].mxu1 }
 0x2c7   :  { %13710 = vst [vmem:[#allocation76_spill] sm:$0xff] %v12269_v48  ;;  %v3837_v42 = vpop.f32.mrb[219].mxu1  ;;  %v10083_v48 = vld [vmem:[%s13633_s0 + $0x400] ss:$28 sps:$4 sm:$0xff]  }
 0x2c8   :  { %v10087_v42 = vld [vmem:[%s13633_s0 + $0x868] ss:$28 sps:$4 sm:$0xff]  }
 0x2c9   :  { %8774 = vmatmul.mubr.msk.bf16.gmra.mrb[68].mxu1 %vm3173_vm0, %v10079_v14 }
 0x2ca   :  { %4625 = vmatmul.mubr.bf16.gmra.mrb[68].mxu0 %v10078_v4  ;;  %8777 = vmatprep.mubr.msk.bf16.mxu1 %vm3173_vm0, %v10082_v20  ;;  %v10085_v4 = vld [vmem:[%s13633_s0 + $0x43c] ss:$28 sps:$4 sm:$0xff]  }
 0x2cb   :  { %4632 = vmatprep.mubr.bf16.mxu0 %v10080_v33 }
 0x2cc   :  { %v12276_v54 = vpop.f32.mrb[220].mxu1 }
 0x2cd   :  { %13711 = vst [vmem:[#allocation77_spill] sm:$0xff] %v12276_v54  ;;  %v3842_v11 = vpop.f32.mrb[221].mxu1 }
 0x2ce   :  { %v12287_v14 = vpop.f32.mrb[222].mxu1  ;;  %v10089_v11 = vld [vmem:[%s13633_s0 + $0x8a0] ss:$28 sps:$4 sm:$0xff]  }
 0x2cf   :  { %13712 = vst [vmem:[#allocation78_spill] sm:$0xff] %v12287_v14  ;;  %v3845_v20 = vpop.f32.mrb[223].mxu1  ;;  %v10088_v14 = vld [vmem:[%s13633_s0 + $0x438] ss:$28 sps:$4 sm:$0xff]  }
 0x2d0   :  { %v10092_v20 = vld [vmem:[%s13633_s0 + $0x8d8] ss:$28 sps:$4 sm:$0xff]  }
 0x2d1   :  { %8778 = vmatmul.mubr.msk.bf16.gmra.mrb[72].mxu1 %vm3173_vm0, %v10084_v51 }
 0x2d2   :  { %4633 = vmatmul.mubr.bf16.gmra.mrb[72].mxu0 %v10083_v48  ;;  %8781 = vmatprep.mubr.msk.bf16.mxu1 %vm3173_vm0, %v10087_v42  ;;  %v10090_v48 = vld [vmem:[%s13633_s0 + $0x474] ss:$28 sps:$4 sm:$0xff]  }
 0x2d3   :  { %4640 = vmatprep.mubr.bf16.mxu0 %v10085_v4  ;;  %v10094_v4 = vld [vmem:[%s13633_s0 + $0x910] ss:$28 sps:$4 sm:$0xff]  }
 0x2d4   :  { %v12294_v33 = vpop.f32.mrb[224].mxu1 }
 0x2d5   :  { %13713 = vst [vmem:[#allocation79_spill] sm:$0xff] %v12294_v33  ;;  %v3850_v54 = vpop.f32.mrb[225].mxu1 }
 0x2d6   :  { %v12305_v51 = vpop.f32.mrb[226].mxu1 }
 0x2d7   :  { %13714 = vst [vmem:[#allocation80_spill] sm:$0xff] %v12305_v51  ;;  %v3853_v42 = vpop.f32.mrb[227].mxu1  ;;  %v10093_v51 = vld [vmem:[%s13633_s0 + $0x470] ss:$28 sps:$4 sm:$0xff]  }
 0x2d8   :  { %v10097_v42 = vld [vmem:[%s13633_s0 + $0x948] ss:$28 sps:$4 sm:$0xff]  }
 0x2d9   :  { %8782 = vmatmul.mubr.msk.bf16.gmra.mrb[76].mxu1 %vm3173_vm0, %v10089_v11 }
 0x2da   :  { %4641 = vmatmul.mubr.bf16.gmra.mrb[76].mxu0 %v10088_v14  ;;  %8785 = vmatprep.mubr.msk.bf16.mxu1 %vm3173_vm0, %v10092_v20  ;;  %v10095_v14 = vld [vmem:[%s13633_s0 + $0x4ac] ss:$28 sps:$4 sm:$0xff]  }
 0x2db   :  { %4648 = vmatprep.mubr.bf16.mxu0 %v10090_v48  ;;  %v10099_v48 = vld [vmem:[%s13633_s0 + $0x980] ss:$28 sps:$4 sm:$0xff]  }
 0x2dc   :  { %v12312_v54 = vpop.f32.mrb[228].mxu1 }
 0x2dd   :  { %13715 = vst [vmem:[#allocation81_spill] sm:$0xff] %v12312_v54  ;;  %v3858_v33 = vpop.f32.mrb[229].mxu1 }
 0x2de   :  { %v12323_v11 = vpop.f32.mrb[230].mxu1 }
 0x2df   :  { %13716 = vst [vmem:[#allocation82_spill] sm:$0xff] %v12323_v11  ;;  %v3861_v20 = vpop.f32.mrb[231].mxu1  ;;  %v10098_v11 = vld [vmem:[%s13633_s0 + $0x4a8] ss:$28 sps:$4 sm:$0xff]  }
 0x2e0   :  { %v10102_v20 = vld [vmem:[%s13633_s0 + $0x9b8] ss:$28 sps:$4 sm:$0xff]  }
 0x2e1   :  { %8786 = vmatmul.mubr.msk.bf16.gmra.mrb[80].mxu1 %vm3173_vm0, %v10094_v4 }
 0x2e2   :  { %4649 = vmatmul.mubr.bf16.gmra.mrb[80].mxu0 %v10093_v51  ;;  %8789 = vmatprep.mubr.msk.bf16.mxu1 %vm3173_vm0, %v10097_v42  ;;  %v10100_v51 = vld [vmem:[%s13633_s0 + $0x4e4] ss:$28 sps:$4 sm:$0xff]  }
 0x2e3   :  { %4656 = vmatprep.mubr.bf16.mxu0 %v10095_v14  ;;  %v10104_v14 = vld [vmem:[%s13633_s0 + $0x9f0] ss:$28 sps:$4 sm:$0xff]  }
 0x2e4   :  { %v12330_v33 = vpop.f32.mrb[232].mxu1 }
 0x2e5   :  { %13717 = vst [vmem:[#allocation83_spill] sm:$0xff] %v12330_v33  ;;  %v3866_v54 = vpop.f32.mrb[233].mxu1 }
 0x2e6   :  { %v12341_v4 = vpop.f32.mrb[234].mxu1 }
 0x2e7   :  { %13718 = vst [vmem:[#allocation84_spill] sm:$0xff] %v12341_v4  ;;  %v3869_v42 = vpop.f32.mrb[235].mxu1  ;;  %v10103_v4 = vld [vmem:[%s13633_s0 + $0x4e0] ss:$28 sps:$4 sm:$0xff]  }
 0x2e8   :  { %v10107_v42 = vld [vmem:[%s13633_s0 + $0xa28] ss:$28 sps:$4 sm:$0xff]  }
 0x2e9   :  { %8790 = vmatmul.mubr.msk.bf16.gmra.mrb[84].mxu1 %vm3173_vm0, %v10099_v48 }
 0x2ea   :  { %4657 = vmatmul.mubr.bf16.gmra.mrb[84].mxu0 %v10098_v11  ;;  %8793 = vmatprep.mubr.msk.bf16.mxu1 %vm3173_vm0, %v10102_v20  ;;  %v10105_v11 = vld [vmem:[%s13633_s0 + $0x51c] ss:$28 sps:$4 sm:$0xff]  }
 0x2eb   :  { %4664 = vmatprep.mubr.bf16.mxu0 %v10100_v51  ;;  %v10109_v51 = vld [vmem:[%s13633_s0 + $0xa60] ss:$28 sps:$4 sm:$0xff]  }
 0x2ec   :  { %v12348_v54 = vpop.f32.mrb[236].mxu1 }
 0x2ed   :  { %13719 = vst [vmem:[#allocation85_spill] sm:$0xff] %v12348_v54  ;;  %v3874_v33 = vpop.f32.mrb[237].mxu1 }
 0x2ee   :  { %v12359_v48 = vpop.f32.mrb[238].mxu1 }
 0x2ef   :  { %13720 = vst [vmem:[#allocation86_spill] sm:$0xff] %v12359_v48  ;;  %v3877_v20 = vpop.f32.mrb[239].mxu1  ;;  %v10108_v48 = vld [vmem:[%s13633_s0 + $0x518] ss:$28 sps:$4 sm:$0xff]  }
 0x2f0   :  { %v10112_v20 = vld [vmem:[%s13633_s0 + $0xa98] ss:$28 sps:$4 sm:$0xff]  }
 0x2f1   :  { %8794 = vmatmul.mubr.msk.bf16.gmra.mrb[88].mxu1 %vm3173_vm0, %v10104_v14 }
 0x2f2   :  { %4665 = vmatmul.mubr.bf16.gmra.mrb[88].mxu0 %v10103_v4  ;;  %8797 = vmatprep.mubr.msk.bf16.mxu1 %vm3173_vm0, %v10107_v42  ;;  %v10110_v4 = vld [vmem:[%s13633_s0 + $0x554] ss:$28 sps:$4 sm:$0xff]  }
 0x2f3   :  { %4672 = vmatprep.mubr.bf16.mxu0 %v10105_v11  ;;  %v10114_v11 = vld [vmem:[%s13633_s0 + $0xad0] ss:$28 sps:$4 sm:$0xff]  }
 0x2f4   :  { %v12366_v33 = vpop.f32.mrb[240].mxu1 }
 0x2f5   :  { %13721 = vst [vmem:[#allocation87_spill] sm:$0xff] %v12366_v33  ;;  %v3882_v54 = vpop.f32.mrb[241].mxu1 }
 0x2f6   :  { %v12377_v14 = vpop.f32.mrb[242].mxu1 }
 0x2f7   :  { %13722 = vst [vmem:[#allocation88_spill] sm:$0xff] %v12377_v14  ;;  %v3885_v42 = vpop.f32.mrb[243].mxu1  ;;  %v10113_v14 = vld [vmem:[%s13633_s0 + $0x550] ss:$28 sps:$4 sm:$0xff]  }
 0x2f8   :  { %v10117_v42 = vld [vmem:[%s13633_s0 + $0xb08] ss:$28 sps:$4 sm:$0xff]  }
 0x2f9   :  { %8798 = vmatmul.mubr.msk.bf16.gmra.mrb[92].mxu1 %vm3173_vm0, %v10109_v51 }
 0x2fa   :  { %4673 = vmatmul.mubr.bf16.gmra.mrb[92].mxu0 %v10108_v48  ;;  %8801 = vmatprep.mubr.msk.bf16.mxu1 %vm3173_vm0, %v10112_v20  ;;  %v10115_v48 = vld [vmem:[%s13633_s0 + $0x58c] ss:$28 sps:$4 sm:$0xff]  }
 0x2fb   :  { %4680 = vmatprep.mubr.bf16.mxu0 %v10110_v4  ;;  %v10119_v4 = vld [vmem:[%s13633_s0 + $0xb40] ss:$28 sps:$4 sm:$0xff]  }
 0x2fc   :  { %v12384_v54 = vpop.f32.mrb[244].mxu1 }
 0x2fd   :  { %13723 = vst [vmem:[#allocation89_spill] sm:$0xff] %v12384_v54  ;;  %v3890_v33 = vpop.f32.mrb[245].mxu1 }
 0x2fe   :  { %v12395_v51 = vpop.f32.mrb[246].mxu1 }
 0x2ff   :  { %13724 = vst [vmem:[#allocation90_spill] sm:$0xff] %v12395_v51  ;;  %v3893_v20 = vpop.f32.mrb[247].mxu1  ;;  %v10118_v51 = vld [vmem:[%s13633_s0 + $0x588] ss:$28 sps:$4 sm:$0xff]  }
 0x301   :  { %8802 = vmatmul.mubr.msk.bf16.gmra.mrb[96].mxu1 %vm3173_vm0, %v10114_v11 }
 0x302   :  { %4681 = vmatmul.mubr.bf16.gmra.mrb[96].mxu0 %v10113_v14  ;;  %8805 = vmatprep.mubr.msk.bf16.mxu1 %vm3173_vm0, %v10117_v42  ;;  %v10122_v14 = vld [vmem:[%s13633_s0 + $0xb78] ss:$28 sps:$4 sm:$0xff]   ;;  %v10120_v42 = vld [vmem:[%s13633_s0 + $0x5c4] ss:$28 sps:$4 sm:$0xff]  }
 0x303   :  { %4688 = vmatprep.mubr.bf16.mxu0 %v10115_v48  ;;  %v10124_v48 = vld [vmem:[%s13633_s0 + $0xbb0] ss:$28 sps:$4 sm:$0xff]  }
 0x304   :  { %v12402_v33 = vpop.f32.mrb[248].mxu1 }
 0x305   :  { %13725 = vst [vmem:[#allocation91_spill] sm:$0xff] %v12402_v33  ;;  %v3898_v54 = vpop.f32.mrb[249].mxu1  ;;  %v10129_v33 = vld [vmem:[%s13633_s0 + $0xc20] ss:$28 sps:$4 sm:$0xff]  }
 0x306   :  { %v12410_v58 = vpop.f32.mrb[250].mxu1 }
 0x307   :  { %13726 = vst [vmem:[#allocation92_spill] sm:$0xff] %v12410_v58  ;;  %v3901_v11 = vpop.f32.mrb[251].mxu1 }
 0x308   :  { %v10123_v11 = vld [vmem:[%s13633_s0 + $0x5c0] ss:$28 sps:$4 sm:$0xff]  }
 0x309   :  { %8806 = vmatmul.mubr.msk.bf16.gmra.mrb[100].mxu1 %vm3173_vm0, %v10119_v4 }
 0x30a   :  { %4689 = vmatmul.mubr.bf16.gmra.mrb[100].mxu0 %v10118_v51  ;;  %8809 = vmatprep.mubr.msk.bf16.mxu1 %vm3173_vm0, %v10122_v14  ;;  %v10127_v51 = vld [vmem:[%s13633_s0 + $0xbe8] ss:$28 sps:$4 sm:$0xff]   ;;  %v10125_v14 = vld [vmem:[%s13633_s0 + $0x5fc] ss:$28 sps:$4 sm:$0xff]  }
 0x30b   :  { %4696 = vmatprep.mubr.bf16.mxu0 %v10120_v42  ;;  %v12440_v42 = vld [vmem:[%s13635_s2] ss:$0 sm:$0xff] }
 0x30c   :  { %v12420_v54 = vpop.f32.mrb[252].mxu1  ;;  %v3404_v10 = vadd.f32 %v12440_v42, %v11474_v15  ;;  %v3409_v24 = vadd.f32 %v12440_v42, %v11488_v21  ;;  %v10137_v21 = vld [vmem:[%s13633_s0 + $0xcc8] ss:$28 sps:$4 sm:$0xff]  }
 0x30d   :  { %13727 = vst [vmem:[#allocation93_spill] sm:$0xff] %v12420_v54  ;;  %v3906_v20 = vpop.f32.mrb[253].mxu1 }
 0x30e   :  { %v12428_v58 = vpop.f32.mrb[254].mxu1  ;;  %v3401_v20 = vadd.f32 %v12440_v42, %v11472_v13  ;;  %v10132_v13 = vld [vmem:[%s13633_s0 + $0xc58] ss:$28 sps:$4 sm:$0xff]  }
 0x30f   :  { %13728 = vst [vmem:[#allocation94_spill] sm:$0xff] %v12428_v58  ;;  %v3909_v4 = vpop.f32.mrb[255].mxu1 }
 0x311   :  { %8810 = vmatmul.mubr.msk.bf16.gmra.mrb[104].mxu1 %vm3173_vm0, %v10124_v48 }
 0x312   :  { %4697 = vmatmul.mubr.bf16.gmra.mrb[104].mxu0 %v10123_v11  ;;  %8813 = vmatprep.mubr.msk.bf16.mxu1 %vm3173_vm0, %v10127_v51  ;;  %v10128_v11 = vld [vmem:[%s13633_s0 + $0x5f8] ss:$28 sps:$4 sm:$0xff]  }
 0x313   :  { %4704 = vmatprep.mubr.bf16.mxu0 %v10125_v14 }
 0x314   :  { %v8707_v58 = vpop.f32.mrb[0].mxu1 }
 0x315   :  { %v4490_v4 = vpop.f32.mrb[0].mxu0  ;;  %v5035_v54 = vpop.f32.mrb[1].mxu1 }
 0x316   :  { %v9042_v48 = vadd.f32 %v4490_v4, %v3401_v20  ;;  %v4492_v28 = vpop.f32.mrb[1].mxu0  ;;  %v8708_v44 = vpop.f32.mrb[2].mxu1 }
 0x317   :  { %v4493_v51 = vpop.f32.mrb[2].mxu0  ;;  %v5038_v14 = vpop.f32.mrb[3].mxu1 }
 0x318   :  { %v9044_v20 = vadd.f32 %v4493_v51, %v3404_v10  ;;  %v12459_v28 = vadd.f32 %v9042_v48, %v5035_v54  ;;  %v4495_v4 = vpop.f32.mrb[3].mxu0  ;;  %v10134_v10 = vld [vmem:[%s13633_s0 + $0xc90] ss:$28 sps:$4 sm:$0xff]  }
 0x319   :  { %8814 = vmatmul.mubr.msk.bf16.gmra.mrb[108].mxu1 %vm3173_vm0, %v10129_v33  ;;  %v3412_v33 = vadd.f32 %v12440_v42, %v11490_v23 }
 0x31a   :  { %v12462_v15 = vadd.f32 %v9044_v20, %v5038_v14  ;;  %4705 = vmatmul.mubr.bf16.gmra.mrb[108].mxu0 %v10128_v11  ;;  %8817 = vmatprep.mubr.msk.bf16.mxu1 %vm3173_vm0, %v10132_v13  ;;  %v10133_v11 = vld [vmem:[%s13633_s0 + $0x630] ss:$28 sps:$4 sm:$0xff]  }
 0x31b   :  { %4712 = vmatprep.mubr.bf16.mxu0 %v10130_v36  ;;  %v10135_v14 = vld [vmem:[%s13633_s0 + $0x66c] ss:$28 sps:$4 sm:$0xff]  }
 0x31c   :  { %v8711_v8 = vpop.f32.mrb[4].mxu1 }
 0x31d   :  { %v4498_v62 = vpop.f32.mrb[4].mxu0  ;;  %v5051_v54 = vpop.f32.mrb[5].mxu1 }
 0x31e   :  { %v9046_v48 = vadd.f32 %v4498_v62, %v3409_v24  ;;  %v4500_v51 = vpop.f32.mrb[5].mxu0  ;;  %v8712_v36 = vpop.f32.mrb[6].mxu1 }
 0x31f   :  { %v4501_v13 = vpop.f32.mrb[6].mxu0  ;;  %v5054_v20 = vpop.f32.mrb[7].mxu1  ;;  %v3417_v51 = vadd.f32 %v12440_v42, %v11504_v29  ;;  %v10142_v29 = vld [vmem:[%s13633_s0 + $0xd38] ss:$28 sps:$4 sm:$0xff]  }
 0x320   :  { %v12481_v62 = vadd.f32 %v9046_v48, %v8707_v58  ;;  %v9048_v24 = vadd.f32 %v4501_v13, %v3412_v33  ;;  %v4503_v4 = vpop.f32.mrb[7].mxu0  ;;  %v10139_v58 = vld [vmem:[%s13633_s0 + $0xd00] ss:$28 sps:$4 sm:$0xff]  }
 0x321   :  { %8818 = vmatmul.mubr.msk.bf16.gmra.mrb[112].mxu1 %vm3173_vm0, %v10134_v10  ;;  %v10138_v10 = vld [vmem:[%s13633_s0 + $0x668] ss:$28 sps:$4 sm:$0xff]  }
 0x322   :  { %v12484_v23 = vadd.f32 %v9048_v24, %v8708_v44  ;;  %4713 = vmatmul.mubr.bf16.gmra.mrb[112].mxu0 %v10133_v11  ;;  %8821 = vmatprep.mubr.msk.bf16.mxu1 %vm3173_vm0, %v10137_v21  ;;  %v3420_v44 = vadd.f32 %v12440_v42, %v11506_v31 }
 0x323   :  { %4720 = vmatprep.mubr.bf16.mxu0 %v10135_v14  ;;  %v10140_v14 = vld [vmem:[%s13633_s0 + $0x6a4] ss:$28 sps:$4 sm:$0xff]  }
 0x324   :  { %v12489_v57 = vpop.f32.mrb[8].mxu1 }
 0x325   :  { %v4506_v49 = vpop.f32.mrb[8].mxu0  ;;  %v5067_v48 = vpop.f32.mrb[9].mxu1 }
 0x326   :  { %v9050_v33 = vadd.f32 %v4506_v49, %v3417_v51  ;;  %v4508_v13 = vpop.f32.mrb[9].mxu0  ;;  %v12502_v11 = vpop.f32.mrb[10].mxu1 }
 0x327   :  { %v4509_v21 = vpop.f32.mrb[10].mxu0  ;;  %v5070_v49 = vpop.f32.mrb[11].mxu1  ;;  %v3425_v13 = vadd.f32 %v12440_v42, %v11520_v37  ;;  %v10147_v37 = vld [vmem:[%s13633_s0 + $0xda8] ss:$28 sps:$4 sm:$0xff]  }
 0x328   :  { %v9052_v24 = vadd.f32 %v4509_v21, %v3420_v44  ;;  %v12507_v4 = vadd.f32 %v9050_v33, %v5051_v54  ;;  %v4511_v31 = vpop.f32.mrb[11].mxu0  ;;  %v10144_v54 = vld [vmem:[%s13633_s0 + $0xd70] ss:$28 sps:$4 sm:$0xff]  }
 0x329   :  { %8822 = vmatmul.mubr.msk.bf16.gmra.mrb[116].mxu1 %vm3173_vm0, %v10139_v58 }
 0x32a   :  { %v12510_v51 = vadd.f32 %v9052_v24, %v5054_v20  ;;  %4721 = vmatmul.mubr.bf16.gmra.mrb[116].mxu0 %v10138_v10  ;;  %8825 = vmatprep.mubr.msk.bf16.mxu1 %vm3173_vm0, %v10142_v29  ;;  %v3428_v20 = vadd.f32 %v12440_v42, %v11525_v40  ;;  %v10143_v10 = vld [vmem:[%s13633_s0 + $0x6a0] ss:$28 sps:$4 sm:$0xff]  }
 0x32b   :  { %4728 = vmatprep.mubr.bf16.mxu0 %v10140_v14  ;;  %v10145_v14 = vld [vmem:[%s13633_s0 + $0x6dc] ss:$28 sps:$4 sm:$0xff]  }
 0x32c   :  { %v12515_v35 = vpop.f32.mrb[12].mxu1 }
 0x32d   :  { %v4514_v32 = vpop.f32.mrb[12].mxu0  ;;  %v12520_v33 = vpop.f32.mrb[13].mxu1 }
 0x32e   :  { %v9054_v44 = vadd.f32 %v4514_v32, %v3425_v13  ;;  %v4516_v58 = vpop.f32.mrb[13].mxu0  ;;  %v12530_v29 = vpop.f32.mrb[14].mxu1 }
 0x32f   :  { %v4517_v21 = vpop.f32.mrb[14].mxu0  ;;  %v12535_v32 = vpop.f32.mrb[15].mxu1  ;;  %v3433_v58 = vadd.f32 %v12440_v42, %v11540_v46 }
 0x330   :  { %v12537_v24 = vadd.f32 %v9054_v44, %v8711_v8  ;;  %v9056_v40 = vadd.f32 %v4517_v21, %v3428_v20  ;;  %v4519_v31 = vpop.f32.mrb[15].mxu0  ;;  %v10149_v8 = vld [vmem:[%s13633_s0 + $0xde0] ss:$28 sps:$4 sm:$0xff]   ;;  %v10150_v21 = vld [vmem:[%s13633_s0 + $0x714] ss:$28 sps:$4 sm:$0xff]  }
 0x331   :  { %8826 = vmatmul.mubr.msk.bf16.gmra.mrb[120].mxu1 %vm3173_vm0, %v10144_v54 }
 0x332   :  { %v12540_v13 = vadd.f32 %v9056_v40, %v8712_v36  ;;  %4729 = vmatmul.mubr.bf16.gmra.mrb[120].mxu0 %v10143_v10  ;;  %8829 = vmatprep.mubr.msk.bf16.mxu1 %vm3173_vm0, %v10147_v37  ;;  %v3436_v36 = vadd.f32 %v12440_v42, %v11542_v1  ;;  %v10148_v10 = vld [vmem:[%s13633_s0 + $0x6d8] ss:$28 sps:$4 sm:$0xff]  }
 0x333   :  { %4736 = vmatprep.mubr.bf16.mxu0 %v10145_v14 }
 0x334   :  { %v12545_v26 = vpop.f32.mrb[16].mxu1 }
 0x335   :  { %v4522_v16 = vpop.f32.mrb[16].mxu0  ;;  %v12550_v44 = vpop.f32.mrb[17].mxu1 }
 0x336   :  { %v9058_v20 = vadd.f32 %v4522_v16, %v3433_v58  ;;  %v4524_v54 = vpop.f32.mrb[17].mxu0  ;;  %v12557_v37 = vpop.f32.mrb[18].mxu1  ;;  %v5546_v16 = vmax.f32 %v12459_v28, 0.0 }
 0x337   :  { %v4525_v46 = vpop.f32.mrb[18].mxu0  ;;  %v12562_v14 = vpop.f32.mrb[19].mxu1  ;;  %v3441_v54 = vadd.f32 %v12440_v42, %v11556_v53  ;;  %v10153_v53 = vld [vmem:[%s13633_s0 + $0x74c] ss:$28 sps:$4 sm:$0xff]  }
 0x338   :  { %v9060_v40 = vadd.f32 %v4525_v46, %v3436_v36  ;;  %v12565_v31 = vadd.f32 %v9058_v20, %v5067_v48  ;;  %v4527_v1 = vpop.f32.mrb[19].mxu0  ;;  %v3444_v20 = vadd.f32 %v12440_v42, %v11558_v55  ;;  %v5547_v36 = vmax.f32 %v12462_v15, 0.0 }
 0x339   :  { %8830 = vmatmul.mubr.msk.bf16.gmra.mrb[124].mxu1 %vm3173_vm0, %v10149_v8  ;;  %v5549_v15 = vmax.f32 %v12484_v23, 0.0  ;;  %v5550_v1 = vmax.f32 %v12507_v4, 0.0  ;;  %v10155_v23 = vld [vmem:[%s13633_s0 + $0x748] ss:$28 sps:$4 sm:$0xff]  }
 0x33a   :  { %v12568_v58 = vadd.f32 %v9060_v40, %v5070_v49  ;;  %4737 = vmatmul.mubr.bf16.gmra.mrb[124].mxu0 %v10148_v10  ;;  %8841 = vmatprep.mubr.msk.f32.mxu1 %vm5685_vm1, %v5546_v16  ;;  %v10152_v49 = vld [vmem:[%s13633_s0 + $0x710] ss:$28 sps:$4 sm:$0xff]  }
 0x33b   :  { %4744 = vmatprep.mubr.bf16.mxu0 %v10150_v21 }
 0x33c   :  { %v12573_v7 = vpop.f32.mrb[20].mxu1 }
 0x33d   :  { %v4530_v2 = vpop.f32.mrb[20].mxu0  ;;  %v12575_v60 = vpop.f32.mrb[21].mxu1 }
 0x33e   :  { %v9062_v28 = vadd.f32 %v4530_v2, %v3441_v54  ;;  %v4532_v48 = vpop.f32.mrb[21].mxu0  ;;  %v12582_v8 = vpop.f32.mrb[22].mxu1  ;;  %v5548_v2 = vmax.f32 %v12481_v62, 0.0  ;;  %v3449_v54 = vadd.f32 %v12440_v42, %v11572_v61  ;;  %v5551_v61 = vmax.f32 %v12510_v51, 0.0 }
 0x33f   :  { %v4533_v10 = vpop.f32.mrb[22].mxu0  ;;  %v12588_v46 = vpop.f32.mrb[23].mxu1  ;;  %v5553_v51 = vmax.f32 %v12540_v13, 0.0  ;;  %v10158_v13 = vld [vmem:[%s13633_s0 + $0x780] ss:$28 sps:$4 sm:$0xff]  }
 0x340   :  { %v5076_v21 = vadd.f32 %v9062_v28, %v12489_v57  ;;  %v9064_v55 = vadd.f32 %v4533_v10, %v3444_v20  ;;  %v4535_v16 = vpop.f32.mrb[23].mxu0  ;;  %v3452_v20 = vadd.f32 %v12440_v42, %v11574_v63 }
 0x341   :  { %8842 = vmatmul.mubr.msk.f32.vlgmr.msra.gmra.mrb[128].mxu1 %vm5685_vm1, %v5547_v36  ;;  %v10156_v36 = vld [vmem:[%s13633_s0 + $0x784] ss:$28 sps:$4 sm:$0xff]  }
 0x342   :  { %v5079_v40 = vadd.f32 %v9064_v55, %v12502_v11  ;;  %4745 = vmatmul.mubr.bf16.gmra.mrb[128].mxu0 %v10152_v49  ;;  %8844 = vmatprep.mubr.msk.f32.mxu1 %vm5685_vm1, %v5548_v2 }
 0x343   :  { %4752 = vmatprep.mubr.bf16.mxu0 %v10153_v53  ;;  %v5552_v53 = vmax.f32 %v12537_v24, 0.0 }
 0x344   :  { %v12599_v62 = vpop.f32.mrb[24].mxu1 }
 0x345   :  { %v4538_v57 = vpop.f32.mrb[24].mxu0  ;;  %8845 = vmatmul.mubr.msk.f32.gmra.mrb[130].mxu1 %vm5685_vm1, %v5549_v15  ;;  %v12602_v28 = vpop.f32.mrb[25].mxu1  ;;  %v5554_v15 = vmax.f32 %v12565_v31, 0.0 }
 0x346   :  { %v9066_v48 = vadd.f32 %v4538_v57, %v3449_v54  ;;  %v4540_v11 = vpop.f32.mrb[25].mxu0  ;;  %8847 = vmatprep.mubr.msk.f32.mxu1 %vm5685_vm1, %v5550_v1  ;;  %v12610_v4 = vpop.f32.mrb[26].mxu1  ;;  %v3457_v1 = vadd.f32 %v12440_v42, %v11588_v6  ;;  %v5555_v6 = vmax.f32 %v12568_v58, 0.0  ;;  %v5557_v58 = vmax.f32 %v5079_v40, 0.0  ;;  %v10161_v40 = vld [vmem:[%s13633_s0 + $0x7b8] ss:$28 sps:$4 sm:$0xff]  }
 0x347   :  { %v4541_v49 = vpop.f32.mrb[26].mxu0  ;;  %v12616_v10 = vpop.f32.mrb[27].mxu1 }
 0x348   :  { %v9068_v63 = vadd.f32 %v4541_v49, %v3452_v20  ;;  %v5084_v2 = vadd.f32 %v9066_v48, %v12520_v33  ;;  %v4543_v55 = vpop.f32.mrb[27].mxu0  ;;  %v3460_v48 = vadd.f32 %v12440_v42, %v11593_v9  ;;  %v10159_v20 = vld [vmem:[%s13633_s0 + $0x7bc] ss:$28 sps:$4 sm:$0xff]  }
 0x349   :  { %8848 = vmatmul.mubr.msk.f32.gmra.mrb[132].mxu1 %vm5685_vm1, %v5551_v61  ;;  %v5556_v61 = vmax.f32 %v5076_v21, 0.0  ;;  %v3465_v55 = vadd.f32 %v12440_v42, %v11607_v17 }
 0x34a   :  { %v5087_v16 = vadd.f32 %v9068_v63, %v12535_v32  ;;  %4753 = vmatmul.mubr.bf16.gmra.mrb[132].mxu0 %v10155_v23  ;;  %8850 = vmatprep.mubr.msk.f32.mxu1 %vm5685_vm1, %v5552_v53  ;;  %v5558_v63 = vmax.f32 %v5084_v2, 0.0 }
 0x34b   :  { %4760 = vmatprep.mubr.bf16.mxu0 %v10156_v36 }
 0x34c   :  { %v12627_v24 = vpop.f32.mrb[28].mxu1  ;;  %v5559_v17 = vmax.f32 %v5087_v16, 0.0 }
 0x34d   :  { %v4546_v54 = vpop.f32.mrb[28].mxu0  ;;  %8851 = vmatmul.mubr.msk.f32.gmra.mrb[134].mxu1 %vm5685_vm1, %v5553_v51  ;;  %v12630_v33 = vpop.f32.mrb[29].mxu1 }
 0x34e   :  { %v9070_v57 = vadd.f32 %v4546_v54, %v3457_v1  ;;  %v4548_v32 = vpop.f32.mrb[29].mxu0  ;;  %8853 = vmatprep.mubr.msk.f32.mxu1 %vm5685_vm1, %v5554_v15  ;;  %v12638_v31 = vpop.f32.mrb[30].mxu1 }
 0x34f   :  { %v4549_v11 = vpop.f32.mrb[30].mxu0  ;;  %v12644_v23 = vpop.f32.mrb[31].mxu1 }
 0x350   :  { %v5092_v9 = vadd.f32 %v9070_v57, %v12515_v35  ;;  %v9072_v49 = vadd.f32 %v4549_v11, %v3460_v48  ;;  %v4551_v36 = vpop.f32.mrb[31].mxu0  ;;  %v10162_v57 = vld [vmem:[%s13633_s0 + $0x7f4] ss:$28 sps:$4 sm:$0xff]  }
 0x351   :  { %8854 = vmatmul.mubr.msk.f32.gmra.mrb[136].mxu1 %vm5685_vm1, %v5555_v6 }
 0x352   :  { %v5095_v53 = vadd.f32 %v9072_v49, %v12530_v29  ;;  %4761 = vmatmul.mubr.bf16.gmra.mrb[136].mxu0 %v10158_v13  ;;  %8856 = vmatprep.mubr.msk.f32.mxu1 %vm5685_vm1, %v5556_v61  ;;  %v3468_v29 = vadd.f32 %v12440_v42, %v11609_v19  ;;  %v5560_v48 = vmax.f32 %v5092_v9, 0.0  ;;  %v3473_v61 = vadd.f32 %v12440_v42, %v11623_v27 }
 0x353   :  { %4768 = vmatprep.mubr.bf16.mxu0 %v10159_v20 }
 0x354   :  { %v12652_v51 = vpop.f32.mrb[32].mxu1  ;;  %v5561_v16 = vmax.f32 %v5095_v53, 0.0  ;;  %v10164_v53 = vld [vmem:[%s13633_s0 + $0x7f0] ss:$28 sps:$4 sm:$0xff]  }
 0x355   :  { %v4554_v21 = vpop.f32.mrb[32].mxu0  ;;  %8857 = vmatmul.mubr.msk.f32.gmra.mrb[138].mxu1 %vm5685_vm1, %v5557_v58  ;;  %v12655_v35 = vpop.f32.mrb[33].mxu1 }
 0x356   :  { %v9074_v15 = vadd.f32 %v4554_v21, %v3465_v55  ;;  %v4556_v1 = vpop.f32.mrb[33].mxu0  ;;  %8859 = vmatprep.mubr.msk.f32.mxu1 %vm5685_vm1, %v5558_v63  ;;  %v12663_v2 = vpop.f32.mrb[34].mxu1  ;;  %v10165_v21 = vld [vmem:[%s13633_s0 + $0x82c] ss:$28 sps:$4 sm:$0xff]  }
 0x357   :  { %v4557_v54 = vpop.f32.mrb[34].mxu0  ;;  %v12668_v32 = vpop.f32.mrb[35].mxu1 }
 0x358   :  { %v9076_v13 = vadd.f32 %v4557_v54, %v3468_v29  ;;  %v5100_v19 = vadd.f32 %v9074_v15, %v12550_v44  ;;  %v4559_v6 = vpop.f32.mrb[35].mxu0 }
 0x359   :  { %8860 = vmatmul.mubr.msk.f32.gmra.mrb[140].mxu1 %vm5685_vm1, %v5559_v17 }
 0x35a   :  { %v5103_v11 = vadd.f32 %v9076_v13, %v12562_v14  ;;  %4769 = vmatmul.mubr.bf16.gmra.mrb[140].mxu0 %v10161_v40  ;;  %8862 = vmatprep.mubr.msk.f32.mxu1 %vm5685_vm1, %v5560_v48  ;;  %v5562_v20 = vmax.f32 %v5100_v19, 0.0  ;;  %v3476_v14 = vadd.f32 %v12440_v42, %v11625_v30 }
 0x35b   :  { %4776 = vmatprep.mubr.bf16.mxu0 %v10162_v57  ;;  %v3481_v57 = vadd.f32 %v12440_v42, %v11639_v38  ;;  %v10168_v38 = vld [vmem:[%s13633_s0 + $0x864] ss:$28 sps:$4 sm:$0xff]  }
 0x35c   :  { %v12676_v49 = vpop.f32.mrb[36].mxu1  ;;  %v5563_v27 = vmax.f32 %v5103_v11, 0.0  ;;  %v10167_v11 = vld [vmem:[%s13633_s0 + $0x828] ss:$28 sps:$4 sm:$0xff]  }
 0x35d   :  { %v4562_v9 = vpop.f32.mrb[36].mxu0  ;;  %8863 = vmatmul.mubr.msk.f32.gmra.mrb[142].mxu1 %vm5685_vm1, %v5561_v16  ;;  %v12679_v44 = vpop.f32.mrb[37].mxu1 }
 0x35e   :  { %v9078_v36 = vadd.f32 %v4562_v9, %v3473_v61  ;;  %v4564_v58 = vpop.f32.mrb[37].mxu0  ;;  %8865 = vmatprep.mubr.msk.f32.mxu1 %vm5685_vm1, %v5562_v20  ;;  %v12687_v63 = vpop.f32.mrb[38].mxu1 }
 0x35f   :  { %v4565_v55 = vpop.f32.mrb[38].mxu0  ;;  %v12692_v15 = vpop.f32.mrb[39].mxu1 }
 0x360   :  { %v5108_v1 = vadd.f32 %v9078_v36, %v12545_v26  ;;  %v9080_v29 = vadd.f32 %v4565_v55, %v3476_v14  ;;  %v4567_v30 = vpop.f32.mrb[39].mxu0 }
 0x361   :  { %8866 = vmatmul.mubr.msk.f32.gmra.mrb[144].mxu1 %vm5685_vm1, %v5563_v27  ;;  %v3489_v27 = vadd.f32 %v12440_v42, %v11652_v47  ;;  %v10171_v47 = vld [vmem:[%s13633_s0 + $0x89c] ss:$28 sps:$4 sm:$0xff]  }
 0x362   :  { %v5564_v40 = vmax.f32 %v5108_v1, 0.0  ;;  %v5111_v17 = vadd.f32 %v9080_v29, %v12557_v37  ;;  %4777 = vmatmul.mubr.bf16.gmra.mrb[144].mxu0 %v10164_v53  ;;  %v3484_v37 = vadd.f32 %v12440_v42, %v11641_v41 }
 0x363   :  { %4784 = vmatprep.mubr.bf16.mxu0 %v10165_v21 }
 0x364   :  { %v5565_v54 = vmax.f32 %v5111_v17, 0.0  ;;  %8868 = vmatprep.mubr.msk.f32.mxu1 %vm5685_vm1, %v5564_v40  ;;  %v12700_v48 = vpop.f32.mrb[40].mxu1 }
 0x365   :  { %v4570_v13 = vpop.f32.mrb[40].mxu0  ;;  %v12702_v19 = vpop.f32.mrb[41].mxu1 }
 0x366   :  { %v9082_v26 = vadd.f32 %v4570_v13, %v3481_v57  ;;  %v4572_v6 = vpop.f32.mrb[41].mxu0  ;;  %8869 = vmatmul.mubr.msk.f32.gmra.mrb[146].mxu1 %vm5685_vm1, %v5565_v54  ;;  %v12710_v16 = vpop.f32.mrb[42].mxu1 }
 0x367   :  { %v4573_v20 = vpop.f32.mrb[42].mxu0  ;;  %v12715_v61 = vpop.f32.mrb[43].mxu1 }
 0x368   :  { %v9084_v9 = vadd.f32 %v4573_v20, %v3484_v37  ;;  %v5116_v36 = vadd.f32 %v9082_v26, %v12575_v60  ;;  %v4575_v58 = vpop.f32.mrb[43].mxu0  ;;  %v3492_v60 = vadd.f32 %v12440_v42, %v11657_v50 }
 0x369   :  { %v10173_v58 = vld [vmem:[%s13633_s0 + $0x898] ss:$28 sps:$4 sm:$0xff]  }
 0x36a   :  { %v5566_v14 = vmax.f32 %v5116_v36, 0.0  ;;  %v5119_v41 = vadd.f32 %v9084_v9, %v12588_v46  ;;  %4785 = vmatmul.mubr.bf16.gmra.mrb[148].mxu0 %v10167_v11  ;;  %v10170_v46 = vld [vmem:[%s13633_s0 + $0x860] ss:$28 sps:$4 sm:$0xff]   ;;  %v3497_v11 = vadd.f32 %v12440_v42, %v11659_v52  ;;  %v10174_v52 = vld [vmem:[%s13633_s0 + $0x8d4] ss:$28 sps:$4 sm:$0xff]  }
 0x36b   :  { %4792 = vmatprep.mubr.bf16.mxu0 %v10168_v38 }
 0x36c   :  { %v5567_v53 = vmax.f32 %v5119_v41, 0.0  ;;  %8871 = vmatprep.mubr.msk.f32.mxu1 %vm5685_vm1, %v5566_v14  ;;  %v12722_v55 = vpop.f32.mrb[44].mxu1 }
 0x36d   :  { %v4578_v21 = vpop.f32.mrb[44].mxu0  ;;  %v12724_v1 = vpop.f32.mrb[45].mxu1 }
 0x36e   :  { %v9086_v29 = vadd.f32 %v4578_v21, %v3489_v27  ;;  %v4580_v30 = vpop.f32.mrb[45].mxu0  ;;  %8872 = vmatmul.mubr.msk.f32.gmra.mrb[148].mxu1 %vm5685_vm1, %v5567_v53  ;;  %v12732_v40 = vpop.f32.mrb[46].mxu1 }
 0x36f   :  { %v4581_v17 = vpop.f32.mrb[46].mxu0  ;;  %v12737_v54 = vpop.f32.mrb[47].mxu1 }
 0x370   :  { %v5124_v57 = vadd.f32 %v9086_v29, %v12573_v7  ;;  %v9088_v13 = vadd.f32 %v4581_v17, %v3492_v60  ;;  %v4583_v26 = vpop.f32.mrb[47].mxu0 }
 0x372   :  { %v5568_v6 = vmax.f32 %v5124_v57, 0.0  ;;  %v5127_v50 = vadd.f32 %v9088_v13, %v12582_v8  ;;  %4793 = vmatmul.mubr.bf16.gmra.mrb[152].mxu0 %v10170_v46  ;;  %v3500_v8 = vadd.f32 %v12440_v42, %v11670_v59  ;;  %v3505_v46 = vadd.f32 %v12440_v42, %v11675_v0  ;;  %v10177_v0 = vld [vmem:[%s13633_s0 + $0x90c] ss:$28 sps:$4 sm:$0xff]  }
 0x373   :  { %4800 = vmatprep.mubr.bf16.mxu0 %v10171_v47 }
 0x374   :  { %v5569_v37 = vmax.f32 %v5127_v50, 0.0  ;;  %8874 = vmatprep.mubr.msk.f32.mxu1 %vm5685_vm1, %v5568_v6  ;;  %v12744_v20 = vpop.f32.mrb[48].mxu1 }
 0x375   :  { %v4586_v38 = vpop.f32.mrb[48].mxu0  ;;  %v12746_v9 = vpop.f32.mrb[49].mxu1 }
 0x376   :  { %v9090_v36 = vadd.f32 %v4586_v38, %v3497_v11  ;;  %v4588_v7 = vpop.f32.mrb[49].mxu0  ;;  %8875 = vmatmul.mubr.msk.f32.gmra.mrb[150].mxu1 %vm5685_vm1, %v5569_v37  ;;  %v12754_v14 = vpop.f32.mrb[50].mxu1 }
 0x377   :  { %v4589_v41 = vpop.f32.mrb[50].mxu0  ;;  %v12759_v53 = vpop.f32.mrb[51].mxu1 }
 0x378   :  { %v9092_v27 = vadd.f32 %v4589_v41, %v3500_v8  ;;  %v5132_v21 = vadd.f32 %v9090_v36, %v12602_v28  ;;  %v4591_v29 = vpop.f32.mrb[51].mxu0  ;;  %v3508_v28 = vadd.f32 %v12440_v42, %v11677_v3 }
 0x379   :  { %v10179_v29 = vld [vmem:[%s13633_s0 + $0x908] ss:$28 sps:$4 sm:$0xff]  }
 0x37a   :  { %v5570_v30 = vmax.f32 %v5132_v21, 0.0  ;;  %v5135_v59 = vadd.f32 %v9092_v27, %v12616_v10  ;;  %4801 = vmatmul.mubr.bf16.gmra.mrb[156].mxu0 %v10173_v58  ;;  %v10176_v10 = vld [vmem:[%s13633_s0 + $0x8d0] ss:$28 sps:$4 sm:$0xff]   ;;  %v3513_v58 = vadd.f32 %v12440_v42, %v11679_v5  ;;  %v10180_v5 = vld [vmem:[%s13633_s0 + $0x944] ss:$28 sps:$4 sm:$0xff]  }
 0x37b   :  { %4808 = vmatprep.mubr.bf16.mxu0 %v10174_v52 }
 0x37c   :  { %v5571_v60 = vmax.f32 %v5135_v59, 0.0  ;;  %8877 = vmatprep.mubr.msk.f32.mxu1 %vm5685_vm1, %v5570_v30  ;;  %v12766_v17 = vpop.f32.mrb[52].mxu1 }
 0x37d   :  { %v4594_v47 = vpop.f32.mrb[52].mxu0  ;;  %v12768_v57 = vpop.f32.mrb[53].mxu1 }
 0x37e   :  { %v9094_v13 = vadd.f32 %v4594_v47, %v3505_v46  ;;  %v4596_v26 = vpop.f32.mrb[53].mxu0  ;;  %8878 = vmatmul.mubr.msk.f32.gmra.mrb[152].mxu1 %vm5685_vm1, %v5571_v60  ;;  %v12776_v6 = vpop.f32.mrb[54].mxu1 }
 0x37f   :  { %v4597_v50 = vpop.f32.mrb[54].mxu0  ;;  %v12781_v37 = vpop.f32.mrb[55].mxu1 }
 0x380   :  { %v5140_v11 = vadd.f32 %v9094_v13, %v12599_v62  ;;  %v9096_v38 = vadd.f32 %v4597_v50, %v3508_v28  ;;  %v4599_v36 = vpop.f32.mrb[55].mxu0 }
 0x382   :  { %v5572_v7 = vmax.f32 %v5140_v11, 0.0  ;;  %v5143_v3 = vadd.f32 %v9096_v38, %v12610_v4  ;;  %4809 = vmatmul.mubr.bf16.gmra.mrb[160].mxu0 %v10176_v10  ;;  %v3516_v4 = vadd.f32 %v12440_v42, %v11690_v12  ;;  %v3521_v10 = vadd.f32 %v12440_v42, %v11695_v18  ;;  %v10183_v18 = vld [vmem:[%s13633_s0 + $0x97c] ss:$28 sps:$4 sm:$0xff]  }
 0x383   :  { %4816 = vmatprep.mubr.bf16.mxu0 %v10177_v0 }
 0x384   :  { %v5573_v8 = vmax.f32 %v5143_v3, 0.0  ;;  %8880 = vmatprep.mubr.msk.f32.mxu1 %vm5685_vm1, %v5572_v7  ;;  %v12788_v41 = vpop.f32.mrb[56].mxu1 }
 0x385   :  { %v4602_v52 = vpop.f32.mrb[56].mxu0  ;;  %v12790_v27 = vpop.f32.mrb[57].mxu1 }
 0x386   :  { %v9098_v21 = vadd.f32 %v4602_v52, %v3513_v58  ;;  %v4604_v62 = vpop.f32.mrb[57].mxu0  ;;  %8881 = vmatmul.mubr.msk.f32.gmra.mrb[154].mxu1 %vm5685_vm1, %v5573_v8  ;;  %v12798_v30 = vpop.f32.mrb[58].mxu1 }
 0x387   :  { %v4605_v59 = vpop.f32.mrb[58].mxu0  ;;  %v12803_v60 = vpop.f32.mrb[59].mxu1 }
 0x388   :  { %v9100_v46 = vadd.f32 %v4605_v59, %v3516_v4  ;;  %v5148_v47 = vadd.f32 %v9098_v21, %v12630_v33  ;;  %v4607_v13 = vpop.f32.mrb[59].mxu0  ;;  %v3524_v33 = vadd.f32 %v12440_v42, %v11697_v22 }
 0x389   :  { %v10185_v13 = vld [vmem:[%s13633_s0 + $0x978] ss:$28 sps:$4 sm:$0xff]  }
 0x38a   :  { %v5574_v26 = vmax.f32 %v5148_v47, 0.0  ;;  %v5151_v12 = vadd.f32 %v9100_v46, %v12644_v23  ;;  %4817 = vmatmul.mubr.bf16.gmra.mrb[164].mxu0 %v10179_v29  ;;  %v10182_v23 = vld [vmem:[%s13633_s0 + $0x940] ss:$28 sps:$4 sm:$0xff]   ;;  %v3529_v29 = vadd.f32 %v12440_v42, %v11699_v25  ;;  %v10186_v25 = vld [vmem:[%s13633_s0 + $0x9b4] ss:$28 sps:$4 sm:$0xff]  }
 0x38b   :  { %4824 = vmatprep.mubr.bf16.mxu0 %v10180_v5 }
 0x38c   :  { %v5575_v28 = vmax.f32 %v5151_v12, 0.0  ;;  %8883 = vmatprep.mubr.msk.f32.mxu1 %vm5685_vm1, %v5574_v26  ;;  %v12810_v50 = vpop.f32.mrb[60].mxu1 }
 0x38d   :  { %v4610_v0 = vpop.f32.mrb[60].mxu0  ;;  %v12812_v11 = vpop.f32.mrb[61].mxu1 }
 0x38e   :  { %v9102_v38 = vadd.f32 %v4610_v0, %v3521_v10  ;;  %v4612_v36 = vpop.f32.mrb[61].mxu0  ;;  %8884 = vmatmul.mubr.msk.f32.gmra.mrb[156].mxu1 %vm5685_vm1, %v5575_v28  ;;  %v12820_v7 = vpop.f32.mrb[62].mxu1 }
 0x38f   :  { %v4613_v3 = vpop.f32.mrb[62].mxu0  ;;  %v12825_v8 = vpop.f32.mrb[63].mxu1 }
 0x390   :  { %v5156_v58 = vadd.f32 %v9102_v38, %v12627_v24  ;;  %v9104_v52 = vadd.f32 %v4613_v3, %v3524_v33  ;;  %v4615_v21 = vpop.f32.mrb[63].mxu0 }
 0x392   :  { %v5576_v62 = vmax.f32 %v5156_v58, 0.0  ;;  %v5159_v22 = vadd.f32 %v9104_v52, %v12638_v31  ;;  %4825 = vmatmul.mubr.bf16.gmra.mrb[168].mxu0 %v10182_v23  ;;  %v3532_v31 = vadd.f32 %v12440_v42, %v11710_v34  ;;  %v3537_v23 = vadd.f32 %v12440_v42, %v11715_v39  ;;  %v10189_v39 = vld [vmem:[%s13633_s0 + $0x9ec] ss:$28 sps:$4 sm:$0xff]  }
 0x393   :  { %4832 = vmatprep.mubr.bf16.mxu0 %v10183_v18 }
 0x394   :  { %v5577_v4 = vmax.f32 %v5159_v22, 0.0  ;;  %8886 = vmatprep.mubr.msk.f32.mxu1 %vm5685_vm1, %v5576_v62  ;;  %v12832_v59 = vpop.f32.mrb[64].mxu1 }
 0x395   :  { %v4618_v5 = vpop.f32.mrb[64].mxu0  ;;  %v12834_v46 = vpop.f32.mrb[65].mxu1 }
 0x396   :  { %v9106_v47 = vadd.f32 %v4618_v5, %v3529_v29  ;;  %v4620_v24 = vpop.f32.mrb[65].mxu0  ;;  %8887 = vmatmul.mubr.msk.f32.gmra.mrb[158].mxu1 %vm5685_vm1, %v5577_v4  ;;  %v12842_v26 = vpop.f32.mrb[66].mxu1 }
 0x397   :  { %v4621_v12 = vpop.f32.mrb[66].mxu0  ;;  %v12847_v28 = vpop.f32.mrb[67].mxu1 }
 0x398   :  { %v9108_v10 = vadd.f32 %v4621_v12, %v3532_v31  ;;  %v5164_v0 = vadd.f32 %v9106_v47, %v12655_v35  ;;  %v4623_v38 = vpop.f32.mrb[67].mxu0  ;;  %v3540_v35 = vadd.f32 %v12440_v42, %v11717_v43 }
 0x399   :  { %v10191_v38 = vld [vmem:[%s13633_s0 + $0x9e8] ss:$28 sps:$4 sm:$0xff]  }
 0x39a   :  { %v5578_v36 = vmax.f32 %v5164_v0, 0.0  ;;  %v5167_v34 = vadd.f32 %v9108_v10, %v12668_v32  ;;  %4833 = vmatmul.mubr.bf16.gmra.mrb[172].mxu0 %v10185_v13  ;;  %v10188_v32 = vld [vmem:[%s13633_s0 + $0x9b0] ss:$28 sps:$4 sm:$0xff]   ;;  %v3545_v13 = vadd.f32 %v12440_v42, %v11719_v45  ;;  %v10192_v45 = vld [vmem:[%s13633_s0 + $0xa24] ss:$28 sps:$4 sm:$0xff]  }
 0x39b   :  { %4840 = vmatprep.mubr.bf16.mxu0 %v10186_v25 }
 0x39c   :  { %v5579_v33 = vmax.f32 %v5167_v34, 0.0  ;;  %8889 = vmatprep.mubr.msk.f32.mxu1 %vm5685_vm1, %v5578_v36  ;;  %v12854_v3 = vpop.f32.mrb[68].mxu1 }
 0x39d   :  { %v4626_v18 = vpop.f32.mrb[68].mxu0  ;;  %v12856_v58 = vpop.f32.mrb[69].mxu1 }
 0x39e   :  { %v9110_v52 = vadd.f32 %v4626_v18, %v3537_v23  ;;  %v4628_v21 = vpop.f32.mrb[69].mxu0  ;;  %8890 = vmatmul.mubr.msk.f32.gmra.mrb[160].mxu1 %vm5685_vm1, %v5579_v33  ;;  %v12864_v62 = vpop.f32.mrb[70].mxu1 }
 0x39f   :  { %v4629_v22 = vpop.f32.mrb[70].mxu0  ;;  %v12869_v4 = vpop.f32.mrb[71].mxu1 }
 0x3a0   :  { %v5172_v29 = vadd.f32 %v9110_v52, %v12652_v51  ;;  %v9112_v5 = vadd.f32 %v4629_v22, %v3540_v35  ;;  %v4631_v47 = vpop.f32.mrb[71].mxu0 }
 0x3a2   :  { %v5580_v24 = vmax.f32 %v5172_v29, 0.0  ;;  %v5175_v43 = vadd.f32 %v9112_v5, %v12663_v2  ;;  %4841 = vmatmul.mubr.bf16.gmra.mrb[176].mxu0 %v10188_v32  ;;  %v3548_v2 = vadd.f32 %v12440_v42, %v11730_v56  ;;  %v13729_v32 = vld [vmem:[#allocation5_spill] sm:$0xff] }
 0x3a3   :  { %4848 = vmatprep.mubr.bf16.mxu0 %v10189_v39  ;;  %v3553_v22 = vadd.f32 %v12440_v42, %v13729_v32 }
 0x3a4   :  { %v5581_v31 = vmax.f32 %v5175_v43, 0.0  ;;  %8892 = vmatprep.mubr.msk.f32.mxu1 %vm5685_vm1, %v5580_v24  ;;  %v12876_v12 = vpop.f32.mrb[72].mxu1  ;;  %v10194_v43 = vld [vmem:[%s13633_s0 + $0xa20] ss:$28 sps:$4 sm:$0xff]  }
 0x3a5   :  { %v4634_v25 = vpop.f32.mrb[72].mxu0  ;;  %v12878_v10 = vpop.f32.mrb[73].mxu1 }
 0x3a6   :  { %v9114_v0 = vadd.f32 %v4634_v25, %v3545_v13  ;;  %v4636_v51 = vpop.f32.mrb[73].mxu0  ;;  %8893 = vmatmul.mubr.msk.f32.gmra.mrb[162].mxu1 %vm5685_vm1, %v5581_v31  ;;  %v12886_v36 = vpop.f32.mrb[74].mxu1  ;;  %v10195_v25 = vld [vmem:[%s13633_s0 + $0xa5c] ss:$28 sps:$4 sm:$0xff]  }
 0x3a7   :  { %v4637_v34 = vpop.f32.mrb[74].mxu0  ;;  %v12891_v33 = vpop.f32.mrb[75].mxu1 }
 0x3a8   :  { %v9116_v23 = vadd.f32 %v4637_v34, %v3548_v2  ;;  %v5180_v18 = vadd.f32 %v9114_v0, %v12679_v44  ;;  %v4639_v52 = vpop.f32.mrb[75].mxu0  ;;  %v13730_v44 = vld [vmem:[#allocation6_spill] sm:$0xff] }
 0x3aa   :  { %v5582_v21 = vmax.f32 %v5180_v18, 0.0  ;;  %v5183_v56 = vadd.f32 %v9116_v23, %v12692_v15  ;;  %4849 = vmatmul.mubr.bf16.gmra.mrb[180].mxu0 %v10191_v38  ;;  %v3556_v15 = vadd.f32 %v12440_v42, %v13730_v44  ;;  %v13731_v18 = vld [vmem:[#allocation7_spill] sm:$0xff] }
 0x3ab   :  { %4856 = vmatprep.mubr.bf16.mxu0 %v10192_v45  ;;  %v3561_v52 = vadd.f32 %v12440_v42, %v13731_v18  ;;  %v10198_v44 = vld [vmem:[%s13633_s0 + $0xa94] ss:$28 sps:$4 sm:$0xff]  }
 0x3ac   :  { %v5583_v35 = vmax.f32 %v5183_v56, 0.0  ;;  %8895 = vmatprep.mubr.msk.f32.mxu1 %vm5685_vm1, %v5582_v21  ;;  %v12898_v39 = vpop.f32.mrb[76].mxu1 }
 0x3ad   :  { %v4642_v29 = vpop.f32.mrb[76].mxu0  ;;  %v12900_v5 = vpop.f32.mrb[77].mxu1 }
 0x3ae   :  { %v9118_v47 = vadd.f32 %v4642_v29, %v3553_v22  ;;  %v4644_v24 = vpop.f32.mrb[77].mxu0  ;;  %8896 = vmatmul.mubr.msk.f32.gmra.mrb[164].mxu1 %vm5685_vm1, %v5583_v35  ;;  %v12908_v31 = vpop.f32.mrb[78].mxu1  ;;  %v13732_v22 = vld [vmem:[#allocation8_spill] sm:$0xff] }
 0x3af   :  { %v4645_v13 = vpop.f32.mrb[78].mxu0  ;;  %v12913_v0 = vpop.f32.mrb[79].mxu1  ;;  %v10197_v29 = vld [vmem:[%s13633_s0 + $0xa58] ss:$28 sps:$4 sm:$0xff]  }
 0x3b0   :  { %v5188_v51 = vadd.f32 %v9118_v47, %v12676_v49  ;;  %v9120_v2 = vadd.f32 %v4645_v13, %v3556_v15  ;;  %v4647_v38 = vpop.f32.mrb[79].mxu0 }
 0x3b2   :  { %v5584_v34 = vmax.f32 %v5188_v51, 0.0  ;;  %v5191_v45 = vadd.f32 %v9120_v2, %v12687_v63  ;;  %4857 = vmatmul.mubr.bf16.gmra.mrb[184].mxu0 %v10194_v43  ;;  %v3564_v63 = vadd.f32 %v12440_v42, %v13732_v22 }
 0x3b3   :  { %4864 = vmatprep.mubr.bf16.mxu0 %v10195_v25 }
 0x3b4   :  { %v5585_v23 = vmax.f32 %v5191_v45, 0.0  ;;  %8898 = vmatprep.mubr.msk.f32.mxu1 %vm5685_vm1, %v5584_v34  ;;  %v12920_v21 = vpop.f32.mrb[80].mxu1  ;;  %v13733_v34 = vld [vmem:[#allocation9_spill] sm:$0xff] }
 0x3b5   :  { %v4650_v56 = vpop.f32.mrb[80].mxu0  ;;  %v12922_v35 = vpop.f32.mrb[81].mxu1  ;;  %v3569_v45 = vadd.f32 %v12440_v42, %v13733_v34 }
 0x3b6   :  { %v9122_v32 = vadd.f32 %v4650_v56, %v3561_v52  ;;  %v4652_v49 = vpop.f32.mrb[81].mxu0  ;;  %8899 = vmatmul.mubr.msk.f32.gmra.mrb[166].mxu1 %vm5685_vm1, %v5585_v23  ;;  %v12930_v47 = vpop.f32.mrb[82].mxu1 }
 0x3b7   :  { %v4653_v24 = vpop.f32.mrb[82].mxu0  ;;  %v12935_v15 = vpop.f32.mrb[83].mxu1 }
 0x3b8   :  { %v9124_v43 = vadd.f32 %v4653_v24, %v3564_v63  ;;  %v5196_v13 = vadd.f32 %v9122_v32, %v12702_v19  ;;  %v4655_v25 = vpop.f32.mrb[83].mxu0  ;;  %v13734_v19 = vld [vmem:[#allocation10_spill] sm:$0xff] }
 0x3b9   :  { %v10200_v32 = vld [vmem:[%s13633_s0 + $0xa90] ss:$28 sps:$4 sm:$0xff]  }
 0x3ba   :  { %v5586_v51 = vmax.f32 %v5196_v13, 0.0  ;;  %v5199_v2 = vadd.f32 %v9124_v43, %v12715_v61  ;;  %4865 = vmatmul.mubr.bf16.gmra.mrb[188].mxu0 %v10197_v29  ;;  %v3572_v61 = vadd.f32 %v12440_v42, %v13734_v19  ;;  %v10201_v29 = vld [vmem:[%s13633_s0 + $0xacc] ss:$28 sps:$4 sm:$0xff]  }
 0x3bb   :  { %4872 = vmatprep.mubr.bf16.mxu0 %v10198_v44 }
 0x3bc   :  { %v5587_v38 = vmax.f32 %v5199_v2, 0.0  ;;  %8901 = vmatprep.mubr.msk.f32.mxu1 %vm5685_vm1, %v5586_v51  ;;  %v12942_v23 = vpop.f32.mrb[84].mxu1 }
 0x3bd   :  { %v4658_v18 = vpop.f32.mrb[84].mxu0  ;;  %v12944_v52 = vpop.f32.mrb[85].mxu1 }
 0x3be   :  { %v9126_v56 = vadd.f32 %v4658_v18, %v3569_v45  ;;  %v4660_v49 = vpop.f32.mrb[85].mxu0  ;;  %8902 = vmatmul.mubr.msk.f32.gmra.mrb[168].mxu1 %vm5685_vm1, %v5587_v38  ;;  %v12952_v22 = vpop.f32.mrb[86].mxu1  ;;  %v13735_v38 = vld [vmem:[#allocation11_spill] sm:$0xff] }
 0x3bf   :  { %v4661_v63 = vpop.f32.mrb[86].mxu0  ;;  %v12957_v24 = vpop.f32.mrb[87].mxu1  ;;  %v3577_v34 = vadd.f32 %v12440_v42, %v13735_v38  ;;  %v10203_v42 = vld [vmem:[%s13633_s0 + $0xac8] ss:$28 sps:$4 sm:$0xff]  }
 0x3c0   :  { %v5204_v44 = vadd.f32 %v9126_v56, %v12700_v48  ;;  %v9128_v43 = vadd.f32 %v4661_v63, %v3572_v61  ;;  %v4663_v13 = vpop.f32.mrb[87].mxu0  ;;  %v13737_v56 = vld [vmem:[#allocation12_spill] sm:$0xff] }
 0x3c2   :  { %v5588_v25 = vmax.f32 %v5204_v44, 0.0  ;;  %v5207_v51 = vadd.f32 %v9128_v43, %v12710_v16  ;;  %4873 = vmatmul.mubr.bf16.gmra.mrb[192].mxu0 %v10200_v32  ;;  %v12972_v16 = vld [vmem:[%s13635_s2] ss:$0 sm:$0xff] }
 0x3c3   :  { %4880 = vmatprep.mubr.bf16.mxu0 %v10201_v29  ;;  %v3580_v61 = vadd.f32 %v12972_v16, %v13737_v56  ;;  %v10204_v29 = vld [vmem:[%s13633_s0 + $0xb04] ss:$28 sps:$4 sm:$0xff]  }
 0x3c4   :  { %v5589_v2 = vmax.f32 %v5207_v51, 0.0  ;;  %8904 = vmatprep.mubr.msk.f32.mxu1 %vm5685_vm1, %v5588_v25  ;;  %v12964_v45 = vpop.f32.mrb[88].mxu1 }
 0x3c5   :  { %13736 = vst [vmem:[#allocation5_spill] sm:$0xff] %v12964_v45  ;;  %v4666_v18 = vpop.f32.mrb[88].mxu0  ;;  %v12966_v49 = vpop.f32.mrb[89].mxu1 }
 0x3c6   :  { %v9130_v19 = vadd.f32 %v4666_v18, %v3577_v34  ;;  %v4668_v48 = vpop.f32.mrb[89].mxu0  ;;  %8905 = vmatmul.mubr.msk.f32.gmra.mrb[170].mxu1 %vm5685_vm1, %v5589_v2  ;;  %v12979_v32 = vpop.f32.mrb[90].mxu1  ;;  %v13739_v34 = vld [vmem:[#allocation13_spill] sm:$0xff] }
 0x3c7   :  { %13738 = vst [vmem:[#allocation6_spill] sm:$0xff] %v12979_v32  ;;  %v4669_v63 = vpop.f32.mrb[90].mxu0  ;;  %v12984_v44 = vpop.f32.mrb[91].mxu1  ;;  %v3585_v18 = vadd.f32 %v12972_v16, %v13739_v34 }
 0x3c8   :  { %v5212_v43 = vadd.f32 %v9130_v19, %v12724_v1  ;;  %v9132_v13 = vadd.f32 %v4669_v63, %v3580_v61  ;;  %v4671_v25 = vpop.f32.mrb[91].mxu0  ;;  %v13741_v19 = vld [vmem:[#allocation14_spill] sm:$0xff]  ;;  %v10206_v61 = vld [vmem:[%s13633_s0 + $0xb00] ss:$28 sps:$4 sm:$0xff]  }
 0x3ca   :  { %v5590_v51 = vmax.f32 %v5212_v43, 0.0  ;;  %v5215_v2 = vadd.f32 %v9132_v13, %v12737_v54  ;;  %4881 = vmatmul.mubr.bf16.gmra.mrb[196].mxu0 %v10203_v42  ;;  %v3588_v54 = vadd.f32 %v12972_v16, %v13741_v19 }
 0x3cb   :  { %4888 = vmatprep.mubr.bf16.mxu0 %v10204_v29  ;;  %v10207_v29 = vld [vmem:[%s13633_s0 + $0xb3c] ss:$28 sps:$4 sm:$0xff]  }
 0x3cc   :  { %v5591_v38 = vmax.f32 %v5215_v2, 0.0  ;;  %8907 = vmatprep.mubr.msk.f32.mxu1 %vm5685_vm1, %v5590_v51  ;;  %v12991_v48 = vpop.f32.mrb[92].mxu1 }
 0x3cd   :  { %13740 = vst [vmem:[#allocation7_spill] sm:$0xff] %v12991_v48  ;;  %v4674_v56 = vpop.f32.mrb[92].mxu0  ;;  %v12993_v32 = vpop.f32.mrb[93].mxu1 }
 0x3ce   :  { %v9134_v45 = vadd.f32 %v4674_v56, %v3585_v18  ;;  %v4676_v1 = vpop.f32.mrb[93].mxu0  ;;  %8908 = vmatmul.mubr.msk.f32.gmra.mrb[172].mxu1 %vm5685_vm1, %v5591_v38  ;;  %v13001_v42 = vpop.f32.mrb[94].mxu1  ;;  %v13743_v18 = vld [vmem:[#allocation15_spill] sm:$0xff] }
 0x3cf   :  { %13742 = vst [vmem:[#allocation8_spill] sm:$0xff] %v13001_v42  ;;  %v4677_v63 = vpop.f32.mrb[94].mxu0  ;;  %v13006_v43 = vpop.f32.mrb[95].mxu1  ;;  %v3593_v56 = vadd.f32 %v12972_v16, %v13743_v18 }
 0x3d0   :  { %v5220_v13 = vadd.f32 %v9134_v45, %v12722_v55  ;;  %v9136_v25 = vadd.f32 %v4677_v63, %v3588_v54  ;;  %v4679_v51 = vpop.f32.mrb[95].mxu0  ;;  %v13745_v45 = vld [vmem:[#allocation16_spill] sm:$0xff] }
 0x3d1   :  { %v10209_v54 = vld [vmem:[%s13633_s0 + $0xb38] ss:$28 sps:$4 sm:$0xff]  }
 0x3d2   :  { %v5592_v2 = vmax.f32 %v5220_v13, 0.0  ;;  %v5223_v38 = vadd.f32 %v9136_v25, %v12732_v40  ;;  %4889 = vmatmul.mubr.bf16.gmra.mrb[200].mxu0 %v10206_v61  ;;  %v3596_v40 = vadd.f32 %v12972_v16, %v13745_v45 }
 0x3d3   :  { %4896 = vmatprep.mubr.bf16.mxu0 %v10207_v29  ;;  %v10210_v29 = vld [vmem:[%s13633_s0 + $0xb74] ss:$28 sps:$4 sm:$0xff]  }
 0x3d4   :  { %v5593_v34 = vmax.f32 %v5223_v38, 0.0  ;;  %8910 = vmatprep.mubr.msk.f32.mxu1 %vm5685_vm1, %v5592_v2  ;;  %v13013_v1 = vpop.f32.mrb[96].mxu1 }
 0x3d5   :  { %13744 = vst [vmem:[#allocation9_spill] sm:$0xff] %v13013_v1  ;;  %v4682_v19 = vpop.f32.mrb[96].mxu0  ;;  %v13015_v42 = vpop.f32.mrb[97].mxu1 }
 0x3d6   :  { %v9138_v48 = vadd.f32 %v4682_v19, %v3593_v56  ;;  %v4684_v55 = vpop.f32.mrb[97].mxu0  ;;  %8911 = vmatmul.mubr.msk.f32.gmra.mrb[174].mxu1 %vm5685_vm1, %v5593_v34  ;;  %v13023_v61 = vpop.f32.mrb[98].mxu1  ;;  %v13747_v56 = vld [vmem:[#allocation17_spill] sm:$0xff] }
 0x3d7   :  { %13746 = vst [vmem:[#allocation10_spill] sm:$0xff] %v13023_v61  ;;  %v4685_v63 = vpop.f32.mrb[98].mxu0  ;;  %v13028_v13 = vpop.f32.mrb[99].mxu1  ;;  %v3601_v19 = vadd.f32 %v12972_v16, %v13747_v56 }
 0x3d8   :  { %v5228_v25 = vadd.f32 %v9138_v48, %v12746_v9  ;;  %v9140_v51 = vadd.f32 %v4685_v63, %v3596_v40  ;;  %v4687_v2 = vpop.f32.mrb[99].mxu0  ;;  %v13749_v48 = vld [vmem:[#allocation18_spill] sm:$0xff] }
 0x3d9   :  { %v10212_v40 = vld [vmem:[%s13633_s0 + $0xb70] ss:$28 sps:$4 sm:$0xff]  }
 0x3da   :  { %v5594_v38 = vmax.f32 %v5228_v25, 0.0  ;;  %v5231_v34 = vadd.f32 %v9140_v51, %v12759_v53  ;;  %4897 = vmatmul.mubr.bf16.gmra.mrb[204].mxu0 %v10209_v54  ;;  %v3604_v53 = vadd.f32 %v12972_v16, %v13749_v48 }
 0x3db   :  { %4904 = vmatprep.mubr.bf16.mxu0 %v10210_v29  ;;  %v10213_v29 = vld [vmem:[%s13633_s0 + $0xbac] ss:$28 sps:$4 sm:$0xff]  }
 0x3dc   :  { %v5595_v18 = vmax.f32 %v5231_v34, 0.0  ;;  %8913 = vmatprep.mubr.msk.f32.mxu1 %vm5685_vm1, %v5594_v38  ;;  %v13035_v55 = vpop.f32.mrb[100].mxu1 }
 0x3dd   :  { %13748 = vst [vmem:[#allocation11_spill] sm:$0xff] %v13035_v55  ;;  %v4690_v45 = vpop.f32.mrb[100].mxu0  ;;  %v13037_v61 = vpop.f32.mrb[101].mxu1 }
 0x3de   :  { %v9142_v1 = vadd.f32 %v4690_v45, %v3601_v19  ;;  %v4692_v9 = vpop.f32.mrb[101].mxu0  ;;  %8914 = vmatmul.mubr.msk.f32.gmra.mrb[176].mxu1 %vm5685_vm1, %v5595_v18  ;;  %v13045_v54 = vpop.f32.mrb[102].mxu1  ;;  %v13751_v19 = vld [vmem:[#allocation19_spill] sm:$0xff] }
 0x3df   :  { %13750 = vst [vmem:[#allocation12_spill] sm:$0xff] %v13045_v54  ;;  %v4693_v63 = vpop.f32.mrb[102].mxu0  ;;  %v13050_v25 = vpop.f32.mrb[103].mxu1  ;;  %v3609_v45 = vadd.f32 %v12972_v16, %v13751_v19 }
 0x3e0   :  { %v5236_v51 = vadd.f32 %v9142_v1, %v12744_v20  ;;  %v9144_v2 = vadd.f32 %v4693_v63, %v3604_v53  ;;  %v4695_v38 = vpop.f32.mrb[103].mxu0  ;;  %v13753_v1 = vld [vmem:[#allocation20_spill] sm:$0xff]  ;;  %v10215_v53 = vld [vmem:[%s13633_s0 + $0xba8] ss:$28 sps:$4 sm:$0xff]  }
 0x3e2   :  { %v5596_v34 = vmax.f32 %v5236_v51, 0.0  ;;  %v5239_v18 = vadd.f32 %v9144_v2, %v12754_v14  ;;  %4905 = vmatmul.mubr.bf16.gmra.mrb[208].mxu0 %v10212_v40  ;;  %v3612_v14 = vadd.f32 %v12972_v16, %v13753_v1 }
 0x3e3   :  { %4912 = vmatprep.mubr.bf16.mxu0 %v10213_v29  ;;  %v10216_v29 = vld [vmem:[%s13633_s0 + $0xbe4] ss:$28 sps:$4 sm:$0xff]  }
 0x3e4   :  { %v5597_v56 = vmax.f32 %v5239_v18, 0.0  ;;  %8916 = vmatprep.mubr.msk.f32.mxu1 %vm5685_vm1, %v5596_v34  ;;  %v13057_v9 = vpop.f32.mrb[104].mxu1 }
 0x3e5   :  { %13752 = vst [vmem:[#allocation13_spill] sm:$0xff] %v13057_v9  ;;  %v4698_v48 = vpop.f32.mrb[104].mxu0  ;;  %v13059_v54 = vpop.f32.mrb[105].mxu1 }
 0x3e6   :  { %v9146_v55 = vadd.f32 %v4698_v48, %v3609_v45  ;;  %v4700_v20 = vpop.f32.mrb[105].mxu0  ;;  %8917 = vmatmul.mubr.msk.f32.gmra.mrb[178].mxu1 %vm5685_vm1, %v5597_v56  ;;  %v13067_v40 = vpop.f32.mrb[106].mxu1  ;;  %v13755_v45 = vld [vmem:[#allocation21_spill] sm:$0xff] }
 0x3e7   :  { %13754 = vst [vmem:[#allocation14_spill] sm:$0xff] %v13067_v40  ;;  %v4701_v63 = vpop.f32.mrb[106].mxu0  ;;  %v13072_v51 = vpop.f32.mrb[107].mxu1  ;;  %v3617_v48 = vadd.f32 %v12972_v16, %v13755_v45 }
 0x3e8   :  { %v5244_v2 = vadd.f32 %v9146_v55, %v12768_v57  ;;  %v9148_v38 = vadd.f32 %v4701_v63, %v3612_v14  ;;  %v4703_v34 = vpop.f32.mrb[107].mxu0  ;;  %v13757_v55 = vld [vmem:[#allocation22_spill] sm:$0xff]  ;;  %v10218_v14 = vld [vmem:[%s13633_s0 + $0xbe0] ss:$28 sps:$4 sm:$0xff]  }
 0x3ea   :  { %v5598_v18 = vmax.f32 %v5244_v2, 0.0  ;;  %v5247_v56 = vadd.f32 %v9148_v38, %v12781_v37  ;;  %4913 = vmatmul.mubr.bf16.gmra.mrb[212].mxu0 %v10215_v53  ;;  %v3620_v37 = vadd.f32 %v12972_v16, %v13757_v55 }
 0x3eb   :  { %4920 = vmatprep.mubr.bf16.mxu0 %v10216_v29  ;;  %v10219_v29 = vld [vmem:[%s13633_s0 + $0xc1c] ss:$28 sps:$4 sm:$0xff]  }
 0x3ec   :  { %v5599_v19 = vmax.f32 %v5247_v56, 0.0  ;;  %8919 = vmatprep.mubr.msk.f32.mxu1 %vm5685_vm1, %v5598_v18  ;;  %v13079_v20 = vpop.f32.mrb[108].mxu1 }
 0x3ed   :  { %13756 = vst [vmem:[#allocation15_spill] sm:$0xff] %v13079_v20  ;;  %v4706_v1 = vpop.f32.mrb[108].mxu0  ;;  %v13081_v40 = vpop.f32.mrb[109].mxu1 }
 0x3ee   :  { %v9150_v9 = vadd.f32 %v4706_v1, %v3617_v48  ;;  %v4708_v57 = vpop.f32.mrb[109].mxu0  ;;  %8920 = vmatmul.mubr.msk.f32.gmra.mrb[180].mxu1 %vm5685_vm1, %v5599_v19  ;;  %v13089_v53 = vpop.f32.mrb[110].mxu1  ;;  %v13759_v48 = vld [vmem:[#allocation23_spill] sm:$0xff] }
 0x3ef   :  { %13758 = vst [vmem:[#allocation16_spill] sm:$0xff] %v13089_v53  ;;  %v4709_v63 = vpop.f32.mrb[110].mxu0  ;;  %v13094_v2 = vpop.f32.mrb[111].mxu1  ;;  %v3625_v1 = vadd.f32 %v12972_v16, %v13759_v48 }
 0x3f0   :  { %v5252_v38 = vadd.f32 %v9150_v9, %v12766_v17  ;;  %v9152_v34 = vadd.f32 %v4709_v63, %v3620_v37  ;;  %v4711_v18 = vpop.f32.mrb[111].mxu0  ;;  %v13761_v9 = vld [vmem:[#allocation24_spill] sm:$0xff] }
 0x3f1   :  { %v10221_v37 = vld [vmem:[%s13633_s0 + $0xc18] ss:$28 sps:$4 sm:$0xff]  }
 0x3f2   :  { %v5600_v56 = vmax.f32 %v5252_v38, 0.0  ;;  %v5255_v19 = vadd.f32 %v9152_v34, %v12776_v6  ;;  %4921 = vmatmul.mubr.bf16.gmra.mrb[216].mxu0 %v10218_v14  ;;  %v3628_v6 = vadd.f32 %v12972_v16, %v13761_v9 }
 0x3f3   :  { %4928 = vmatprep.mubr.bf16.mxu0 %v10219_v29  ;;  %v10222_v29 = vld [vmem:[%s13633_s0 + $0xc54] ss:$28 sps:$4 sm:$0xff]  }
 0x3f4   :  { %v5601_v45 = vmax.f32 %v5255_v19, 0.0  ;;  %8922 = vmatprep.mubr.msk.f32.mxu1 %vm5685_vm1, %v5600_v56  ;;  %v13101_v57 = vpop.f32.mrb[112].mxu1 }
 0x3f5   :  { %13760 = vst [vmem:[#allocation17_spill] sm:$0xff] %v13101_v57  ;;  %v4714_v55 = vpop.f32.mrb[112].mxu0  ;;  %v13103_v53 = vpop.f32.mrb[113].mxu1 }
 0x3f6   :  { %v9154_v20 = vadd.f32 %v4714_v55, %v3625_v1  ;;  %v4716_v17 = vpop.f32.mrb[113].mxu0  ;;  %8923 = vmatmul.mubr.msk.f32.gmra.mrb[182].mxu1 %vm5685_vm1, %v5601_v45  ;;  %v13111_v14 = vpop.f32.mrb[114].mxu1  ;;  %v13763_v1 = vld [vmem:[#allocation25_spill] sm:$0xff] }
 0x3f7   :  { %13762 = vst [vmem:[#allocation18_spill] sm:$0xff] %v13111_v14  ;;  %v4717_v63 = vpop.f32.mrb[114].mxu0  ;;  %v13116_v38 = vpop.f32.mrb[115].mxu1  ;;  %v3633_v55 = vadd.f32 %v12972_v16, %v13763_v1 }
 0x3f8   :  { %v5260_v34 = vadd.f32 %v9154_v20, %v12790_v27  ;;  %v9156_v18 = vadd.f32 %v4717_v63, %v3628_v6  ;;  %v4719_v56 = vpop.f32.mrb[115].mxu0  ;;  %v13765_v20 = vld [vmem:[#allocation26_spill] sm:$0xff] }
 0x3f9   :  { %v10224_v6 = vld [vmem:[%s13633_s0 + $0xc50] ss:$28 sps:$4 sm:$0xff]  }
 0x3fa   :  { %v5602_v19 = vmax.f32 %v5260_v34, 0.0  ;;  %v5263_v45 = vadd.f32 %v9156_v18, %v12803_v60  ;;  %4929 = vmatmul.mubr.bf16.gmra.mrb[220].mxu0 %v10221_v37  ;;  %v3636_v60 = vadd.f32 %v12972_v16, %v13765_v20 }
 0x3fb   :  { %4936 = vmatprep.mubr.bf16.mxu0 %v10222_v29  ;;  %v10225_v29 = vld [vmem:[%s13633_s0 + $0xc8c] ss:$28 sps:$4 sm:$0xff]  }
 0x3fc   :  { %v5603_v48 = vmax.f32 %v5263_v45, 0.0  ;;  %8925 = vmatprep.mubr.msk.f32.mxu1 %vm5685_vm1, %v5602_v19  ;;  %v13123_v17 = vpop.f32.mrb[116].mxu1 }
 0x3fd   :  { %13764 = vst [vmem:[#allocation19_spill] sm:$0xff] %v13123_v17  ;;  %v4722_v9 = vpop.f32.mrb[116].mxu0  ;;  %v13125_v14 = vpop.f32.mrb[117].mxu1 }
 0x3fe   :  { %v9158_v57 = vadd.f32 %v4722_v9, %v3633_v55  ;;  %v4724_v27 = vpop.f32.mrb[117].mxu0  ;;  %8926 = vmatmul.mubr.msk.f32.gmra.mrb[184].mxu1 %vm5685_vm1, %v5603_v48  ;;  %v13133_v37 = vpop.f32.mrb[118].mxu1  ;;  %v13767_v55 = vld [vmem:[#allocation27_spill] sm:$0xff] }
 0x3ff   :  { %13766 = vst [vmem:[#allocation20_spill] sm:$0xff] %v13133_v37  ;;  %v4725_v63 = vpop.f32.mrb[118].mxu0  ;;  %v13138_v34 = vpop.f32.mrb[119].mxu1  ;;  %v3641_v9 = vadd.f32 %v12972_v16, %v13767_v55 }
 0x400   :  { %v5268_v18 = vadd.f32 %v9158_v57, %v12788_v41  ;;  %v9160_v56 = vadd.f32 %v4725_v63, %v3636_v60  ;;  %v4727_v19 = vpop.f32.mrb[119].mxu0  ;;  %v13769_v57 = vld [vmem:[#allocation28_spill] sm:$0xff]  ;;  %v10227_v60 = vld [vmem:[%s13633_s0 + $0xc88] ss:$28 sps:$4 sm:$0xff]  }
 0x402   :  { %v5604_v45 = vmax.f32 %v5268_v18, 0.0  ;;  %v5271_v48 = vadd.f32 %v9160_v56, %v12798_v30  ;;  %4937 = vmatmul.mubr.bf16.gmra.mrb[224].mxu0 %v10224_v6  ;;  %v3644_v30 = vadd.f32 %v12972_v16, %v13769_v57  ;;  %v10228_v18 = vld [vmem:[%s13633_s0 + $0xcc4] ss:$28 sps:$4 sm:$0xff]  }
 0x403   :  { %4944 = vmatprep.mubr.bf16.mxu0 %v10225_v29 }
 0x404   :  { %v5605_v1 = vmax.f32 %v5271_v48, 0.0  ;;  %8928 = vmatprep.mubr.msk.f32.mxu1 %vm5685_vm1, %v5604_v45  ;;  %v13145_v27 = vpop.f32.mrb[120].mxu1 }
 0x405   :  { %13768 = vst [vmem:[#allocation21_spill] sm:$0xff] %v13145_v27  ;;  %v4730_v20 = vpop.f32.mrb[120].mxu0  ;;  %v13147_v37 = vpop.f32.mrb[121].mxu1 }
 0x406   :  { %v9162_v17 = vadd.f32 %v4730_v20, %v3641_v9  ;;  %v4732_v41 = vpop.f32.mrb[121].mxu0  ;;  %8929 = vmatmul.mubr.msk.f32.gmra.mrb[186].mxu1 %vm5685_vm1, %v5605_v1  ;;  %v13155_v6 = vpop.f32.mrb[122].mxu1  ;;  %v13771_v9 = vld [vmem:[#allocation29_spill] sm:$0xff] }
 0x407   :  { %13770 = vst [vmem:[#allocation22_spill] sm:$0xff] %v13155_v6  ;;  %v4733_v63 = vpop.f32.mrb[122].mxu0  ;;  %v13157_v29 = vpop.f32.mrb[123].mxu1  ;;  %v3649_v20 = vadd.f32 %v12972_v16, %v13771_v9  ;;  %v13189_v9 = vld [vmem:[%s13637_s4] ss:$0 sm:$0xff] }
 0x408   :  { %v5276_v56 = vadd.f32 %v9162_v17, %v12812_v11  ;;  %v9164_v19 = vadd.f32 %v4733_v63, %v3644_v30  ;;  %v4735_v45 = vpop.f32.mrb[123].mxu0  ;;  %v13774_v17 = vld [vmem:[#allocation30_spill] sm:$0xff]  ;;  %v10230_v30 = vld [vmem:[%s13633_s0 + $0xcc0] ss:$28 sps:$4 sm:$0xff]  }
 0x40a   :  { %v5606_v48 = vmax.f32 %v5276_v56, 0.0  ;;  %v5279_v1 = vadd.f32 %v9164_v19, %v12825_v8  ;;  %4945 = vmatmul.mubr.bf16.gmra.mrb[228].mxu0 %v10227_v60  ;;  %v3652_v8 = vadd.f32 %v12972_v16, %v13774_v17  ;;  %v10231_v56 = vld [vmem:[%s13633_s0 + $0xcfc] ss:$28 sps:$4 sm:$0xff]  }
 0x40b   :  { %4952 = vmatprep.mubr.bf16.mxu0 %v10228_v18 }
 0x40c   :  { %v5607_v55 = vmax.f32 %v5279_v1, 0.0  ;;  %8931 = vmatprep.mubr.msk.f32.mxu1 %vm5685_vm1, %v5606_v48  ;;  %v13167_v41 = vpop.f32.mrb[124].mxu1 }
 0x40d   :  { %13772 = vst [vmem:[#allocation23_spill] sm:$0xff] %v13167_v41  ;;  %v4738_v57 = vpop.f32.mrb[124].mxu0  ;;  %v13169_v6 = vpop.f32.mrb[125].mxu1 }
 0x40e   :  { %13773 = vst [vmem:[#allocation24_spill] sm:$0xff] %v13169_v6  ;;  %v9166_v27 = vadd.f32 %v4738_v57, %v3649_v20  ;;  %v4740_v11 = vpop.f32.mrb[125].mxu0  ;;  %8932 = vmatmul.mubr.msk.f32.gmra.mrb[188].mxu1 %vm5685_vm1, %v5607_v55  ;;  %v13177_v60 = vpop.f32.mrb[126].mxu1  ;;  %v13777_v57 = vld [vmem:[#allocation31_spill] sm:$0xff] }
 0x40f   :  { %13775 = vst [vmem:[#allocation25_spill] sm:$0xff] %v13177_v60  ;;  %v4741_v63 = vpop.f32.mrb[126].mxu0  ;;  %v13179_v18 = vpop.f32.mrb[127].mxu1  ;;  %v3657_v11 = vadd.f32 %v12972_v16, %v13777_v57 }
 0x410   :  { %13776 = vst [vmem:[#allocation26_spill] sm:$0xff] %v13179_v18  ;;  %v5284_v19 = vadd.f32 %v9166_v27, %v12810_v50  ;;  %v9168_v45 = vadd.f32 %v4741_v63, %v3652_v8  ;;  %v4743_v48 = vpop.f32.mrb[127].mxu0 }
 0x412   :  { %v5608_v1 = vmax.f32 %v5284_v19, 0.0  ;;  %v5287_v55 = vadd.f32 %v9168_v45, %v12820_v7  ;;  %4953 = vmatmul.mubr.bf16.gmra.mrb[232].mxu0 %v10230_v30  ;;  %v13778_v19 = vld [vmem:[#allocation32_spill] sm:$0xff] }
 0x413   :  { %4960 = vmatprep.mubr.bf16.mxu0 %v10231_v56  ;;  %v3660_v56 = vadd.f32 %v12972_v16, %v13778_v19  ;;  %v10233_v45 = vld [vmem:[%s13633_s0 + $0xcf8] ss:$28 sps:$4 sm:$0xff]  }
 0x414   :  { %v5609_v20 = vmax.f32 %v5287_v55, 0.0  ;;  %8934 = vmatprep.mubr.msk.f32.mxu1 %vm5685_vm1, %v5608_v1  ;;  %v8843_v17 = vpop.f32.mrb[128].mxu1  ;;  %v10234_v55 = vld [vmem:[%s13633_s0 + $0xd34] ss:$28 sps:$4 sm:$0xff]  }
 0x415   :  { %v4746_v50 = vpop.f32.mrb[128].mxu0  ;;  %v6142_v27 = vadd.f32 %v8843_v17, %v13189_v9  ;;  %v6136_v8 = vpop.f32.mrb[129].mxu1 }
 0x416   :  { %v9170_v63 = vadd.f32 %v4746_v50, %v3657_v11  ;;  %v4748_v7 = vpop.f32.mrb[129].mxu0  ;;  %v6137_v30 = vadd.f32 %v13189_v9, %v6136_v8  ;;  %8935 = vmatmul.mubr.msk.f32.gmra.mrb[190].mxu1 %vm5685_vm1, %v5609_v20 }
 0x417   :  { %v8379_v48 = vmul.f32 -1.442695, %v6142_v27  ;;  %v4749_v1 = vpop.f32.mrb[130].mxu0 }
 0x418   :  { %v5292_v57 = vadd.f32 %v9170_v63, %v12834_v46  ;;  %v8378_v11 = vmul.f32 -1.442695, %v6137_v30  ;;  %v9172_v17 = vadd.f32 %v4749_v1, %v3660_v56  ;;  %v4751_v50 = vpop.f32.mrb[131].mxu0  ;;  %v8846_v8 = vpop.f32.mrb[130].mxu1  ;;  %v13779_v46 = vld [vmem:[#allocation33_spill] sm:$0xff] }
 0x419   :  { %10246 = vpow2.f32 %v8379_v48  ;;  %v6152_v20 = vadd.f32 %v8846_v8, %v13189_v9  ;;  %v6146_v7 = vpop.f32.mrb[131].mxu1  ;;  %v3665_v63 = vadd.f32 %v12972_v16, %v13779_v46  ;;  %v10237_v50 = vld [vmem:[%s13633_s0 + $0xd6c] ss:$28 sps:$4 sm:$0xff]  }
 0x41a   :  { %v5610_v19 = vmax.f32 %v5292_v57, 0.0  ;;  %10248 = vpow2.f32 %v8378_v11  ;;  %v5295_v60 = vadd.f32 %v9172_v17, %v12847_v28  ;;  %4961 = vmatmul.mubr.bf16.gmra.mrb[236].mxu0 %v10233_v45  ;;  %v6147_v27 = vadd.f32 %v13189_v9, %v6146_v7  ;;  %v10236_v11 = vld [vmem:[%s13633_s0 + $0xd30] ss:$28 sps:$4 sm:$0xff]  }
 0x41b   :  { %v8381_v41 = vmul.f32 -1.442695, %v6152_v20  ;;  %4968 = vmatprep.mubr.bf16.mxu0 %v10234_v55 }
 0x41c   :  { %v5611_v18 = vmax.f32 %v5295_v60, 0.0  ;;  %v8380_v6 = vmul.f32 -1.442695, %v6147_v27  ;;  %8937 = vmatprep.mubr.msk.f32.mxu1 %vm5685_vm1, %v5610_v19  ;;  %v8849_v30 = vpop.f32.mrb[132].mxu1  ;;  %v13780_v60 = vld [vmem:[#allocation34_spill] sm:$0xff] }
 0x41d   :  { %10250 = vpow2.f32 %v8381_v41  ;;  %v4754_v56 = vpop.f32.mrb[132].mxu0  ;;  %v6162_v48 = vadd.f32 %v8849_v30, %v13189_v9  ;;  %v6156_v1 = vpop.f32.mrb[133].mxu1  ;;  %v3668_v55 = vadd.f32 %v12972_v16, %v13780_v60 }
 0x41e   :  { %10252 = vpow2.f32 %v8380_v6  ;;  %v9174_v28 = vadd.f32 %v4754_v56, %v3665_v63  ;;  %v4756_v45 = vpop.f32.mrb[133].mxu0  ;;  %v6157_v57 = vadd.f32 %v13189_v9, %v6156_v1  ;;  %8938 = vmatmul.mubr.msk.f32.gmra.mrb[192].mxu1 %vm5685_vm1, %v5611_v18 }
 0x41f   :  { %v8383_v17 = vmul.f32 -1.442695, %v6162_v48  ;;  %v4757_v41 = vpop.f32.mrb[134].mxu0 }
 0x420   :  { %v5300_v6 = vadd.f32 %v9174_v28, %v12832_v59  ;;  %v8382_v8 = vmul.f32 -1.442695, %v6157_v57  ;;  %v9176_v20 = vadd.f32 %v4757_v41, %v3668_v55  ;;  %v4759_v7 = vpop.f32.mrb[135].mxu0  ;;  %v8852_v19 = vpop.f32.mrb[134].mxu1  ;;  %v13781_v57 = vld [vmem:[#allocation35_spill] sm:$0xff] }
 0x421   :  { %10254 = vpow2.f32 %v8383_v17  ;;  %v6172_v18 = vadd.f32 %v8852_v19, %v13189_v9  ;;  %v6166_v27 = vpop.f32.mrb[135].mxu1  ;;  %v3673_v60 = vadd.f32 %v12972_v16, %v13781_v57 }
 0x422   :  { %v5612_v46 = vmax.f32 %v5300_v6, 0.0  ;;  %10256 = vpow2.f32 %v8382_v8  ;;  %v5303_v63 = vadd.f32 %v9176_v20, %v12842_v26  ;;  %4969 = vmatmul.mubr.bf16.gmra.mrb[240].mxu0 %v10236_v11  ;;  %v6167_v30 = vadd.f32 %v13189_v9, %v6166_v27  ;;  %v10239_v20 = vld [vmem:[%s13633_s0 + $0xd68] ss:$28 sps:$4 sm:$0xff]  }
 0x423   :  { %v10247_v56 = vpop.eup %10246  ;;  %v8385_v48 = vmul.f32 -1.442695, %v6172_v18  ;;  %4976 = vmatprep.mubr.bf16.mxu0 %v10237_v50  ;;  %v13782_v18 = vld [vmem:[#allocation36_spill] sm:$0xff] }
 0x424   :  { %v10249_v1 = vpop.eup %10248  ;;  %v7160_v59 = vadd.f32 1.0, %v10247_v56  ;;  %v5613_v28 = vmax.f32 %v5303_v63, 0.0  ;;  %v8384_v45 = vmul.f32 -1.442695, %v6167_v30  ;;  %8940 = vmatprep.mubr.msk.f32.mxu1 %vm5685_vm1, %v5612_v46  ;;  %v8855_v55 = vpop.f32.mrb[136].mxu1  ;;  %v3676_v27 = vadd.f32 %v12972_v16, %v13782_v18 }
 0x425   :  { %v7159_v17 = vadd.f32 1.0, %v10249_v1  ;;  %10258 = vpow2.f32 %v8385_v48  ;;  %v4762_v41 = vpop.f32.mrb[136].mxu0  ;;  %v6182_v26 = vadd.f32 %v8855_v55, %v13189_v9  ;;  %v6176_v11 = vpop.f32.mrb[137].mxu1  ;;  %v10240_v63 = vld [vmem:[%s13633_s0 + $0xda4] ss:$28 sps:$4 sm:$0xff]  }
 0x426   :  { %10260 = vrcp.f32 %v7160_v59  ;;  %v9178_v6 = vadd.f32 %v4762_v41, %v3673_v60  ;;  %v4764_v8 = vpop.f32.mrb[137].mxu0  ;;  %v6177_v50 = vadd.f32 %v13189_v9, %v6176_v11  ;;  %8941 = vmatmul.mubr.msk.f32.gmra.mrb[194].mxu1 %vm5685_vm1, %v5613_v28 }
 0x427   :  { %v10251_v7 = vpop.eup %10250  ;;  %10262 = vrcp.f32 %v7159_v17  ;;  %v8387_v19 = vmul.f32 -1.442695, %v6182_v26  ;;  %v4765_v46 = vpop.f32.mrb[138].mxu0 }
 0x428   :  { %v10253_v30 = vpop.eup %10252  ;;  %v7162_v56 = vadd.f32 1.0, %v10251_v7  ;;  %10264 = vpow2.f32 %v8384_v45  ;;  %v5308_v48 = vadd.f32 %v9178_v6, %v12856_v58  ;;  %v8386_v1 = vmul.f32 -1.442695, %v6177_v50  ;;  %v4767_v59 = vpop.f32.mrb[139].mxu0  ;;  %v13783_v7 = vld [vmem:[#allocation37_spill] sm:$0xff] }
 0x429   :  { %v8858_v28 = vpop.f32.mrb[138].mxu1  ;;  %v7161_v57 = vadd.f32 1.0, %v10253_v30  ;;  %10266 = vpow2.f32 %v8387_v19  ;;  %v9180_v60 = vadd.f32 %v4765_v46, %v3676_v27  ;;  %v3681_v19 = vadd.f32 %v12972_v16, %v13783_v7 }
 0x42a   :  { %v6192_v55 = vadd.f32 %v8858_v28, %v13189_v9  ;;  %v6186_v17 = vpop.f32.mrb[139].mxu1  ;;  %10268 = vrcp.f32 %v7162_v56  ;;  %v5614_v41 = vmax.f32 %v5308_v48, 0.0  ;;  %4977 = vmatmul.mubr.bf16.gmra.mrb[244].mxu0 %v10239_v20 }
 0x42b   :  { %v6187_v26 = vadd.f32 %v13189_v9, %v6186_v17  ;;  %v10255_v11 = vpop.eup %10254  ;;  %10270 = vrcp.f32 %v7161_v57  ;;  %v5311_v45 = vadd.f32 %v9180_v60, %v12869_v4  ;;  %4984 = vmatprep.mubr.bf16.mxu0 %v10240_v63  ;;  %v13784_v57 = vld [vmem:[#allocation38_spill] sm:$0xff]  ;;  %v10243_v17 = vld [vmem:[%s13633_s0 + $0xddc] ss:$28 sps:$4 sm:$0xff]  }
 0x42c   :  { %v8389_v8 = vmul.f32 -1.442695, %v6192_v55  ;;  %v10257_v58 = vpop.eup %10256  ;;  %v7164_v6 = vadd.f32 1.0, %v10255_v11  ;;  %10272 = vpow2.f32 %v8386_v1  ;;  %8943 = vmatprep.mubr.msk.f32.mxu1 %vm5685_vm1, %v5614_v41  ;;  %v8861_v18 = vpop.f32.mrb[140].mxu1  ;;  %v10242_v1 = vld [vmem:[%s13633_s0 + $0xda0] ss:$28 sps:$4 sm:$0xff]   ;;  %v3684_v60 = vadd.f32 %v12972_v16, %v13784_v57 }
 0x42d   :  { %v8388_v50 = vmul.f32 -1.442695, %v6187_v26  ;;  %v7163_v27 = vadd.f32 1.0, %v10257_v58  ;;  %v5615_v20 = vmax.f32 %v5311_v45, 0.0  ;;  %v4770_v46 = vpop.f32.mrb[140].mxu0  ;;  %v6202_v30 = vadd.f32 %v8861_v18, %v13189_v9  ;;  %v6196_v56 = vpop.f32.mrb[141].mxu1 }
 0x42e   :  { %10274 = vpow2.f32 %v8389_v8  ;;  %v9182_v4 = vadd.f32 %v4770_v46, %v3681_v19  ;;  %v4772_v63 = vpop.f32.mrb[141].mxu0  ;;  %v6197_v48 = vadd.f32 %v13189_v9, %v6196_v56 }
 0x42f   :  { %10276 = vrcp.f32 %v7164_v6  ;;  %v10259_v59 = vpop.eup %10258  ;;  %v8391_v28 = vmul.f32 -1.442695, %v6202_v30  ;;  %8944 = vmatmul.mubr.msk.f32.gmra.mrb[196].mxu1 %vm5685_vm1, %v5615_v20  ;;  %v4773_v55 = vpop.f32.mrb[142].mxu0 }
 0x430   :  { %10278 = vrcp.f32 %v7163_v27  ;;  %v10261_v41 = vpop.eup %10260  ;;  %v7166_v26 = vadd.f32 1.0, %v10259_v59  ;;  %v5316_v11 = vadd.f32 %v9182_v4, %v12854_v3  ;;  %v8390_v45 = vmul.f32 -1.442695, %v6197_v48  ;;  %v4775_v8 = vpop.f32.mrb[143].mxu0  ;;  %v13785_v59 = vld [vmem:[#allocation39_spill] sm:$0xff] }
 0x431   :  { %10280 = vpow2.f32 %v8388_v50  ;;  %v8864_v58 = vpop.f32.mrb[142].mxu1  ;;  %v10263_v6 = vpop.eup %10262  ;;  %7544 = vst [vmem:[#allocation2 + $0x8] sm:$0xff] %v10261_v41  ;;  %v9184_v7 = vadd.f32 %v4773_v55, %v3684_v60  ;;  %v10245_v8 = vld [vmem:[%s13633_s0 + $0xdd8] ss:$28 sps:$4 sm:$0xff]  }
 0x432   :  { %10282 = vpow2.f32 %v8391_v28  ;;  %v6212_v19 = vadd.f32 %v8864_v58, %v13189_v9  ;;  %v6206_v18 = vpop.f32.mrb[143].mxu1  ;;  %v10265_v27 = vpop.eup %10264  ;;  %7543 = vst [vmem:[#allocation2] sm:$0xff] %v10263_v6  ;;  %v5616_v20 = vmax.f32 %v5316_v11, 0.0  ;;  %4985 = vmatmul.mubr.bf16.gmra.mrb[248].mxu0 %v10242_v1  ;;  %v3689_v28 = vadd.f32 %v12972_v16, %v13785_v59 }
 0x433   :  { %10284 = vrcp.f32 %v7166_v26  ;;  %v6207_v46 = vadd.f32 %v13189_v9, %v6206_v18  ;;  %v10267_v50 = vpop.eup %10266  ;;  %v7165_v30 = vadd.f32 1.0, %v10265_v27  ;;  %v5319_v3 = vadd.f32 %v9184_v7, %v12864_v62  ;;  %4992 = vmatprep.mubr.bf16.mxu0 %v10243_v17 }
 0x434   :  { %10286 = vpow2.f32 %v8390_v45  ;;  %v8393_v56 = vmul.f32 -1.442695, %v6212_v19  ;;  %v10269_v4 = vpop.eup %10268  ;;  %v7168_v63 = vadd.f32 1.0, %v10267_v50  ;;  %8946 = vmatprep.mubr.msk.f32.mxu1 %vm5685_vm1, %v5616_v20  ;;  %v8867_v57 = vpop.f32.mrb[144].mxu1  ;;  %v13786_v19 = vld [vmem:[#allocation40_spill] sm:$0xff] }
 0x435   :  { %v8392_v48 = vmul.f32 -1.442695, %v6207_v46  ;;  %v10271_v60 = vpop.eup %10270  ;;  %7546 = vst [vmem:[#allocation2 + $0x18] sm:$0xff] %v10269_v4  ;;  %10288 = vrcp.f32 %v7165_v30  ;;  %v5617_v1 = vmax.f32 %v5319_v3, 0.0  ;;  %v4778_v55 = vpop.f32.mrb[144].mxu0  ;;  %v6222_v41 = vadd.f32 %v8867_v57, %v13189_v9 }
 0x436   :  { %v6216_v26 = vpop.f32.mrb[145].mxu1  ;;  %v10273_v62 = vpop.eup %10272  ;;  %7545 = vst [vmem:[#allocation2 + $0x10] sm:$0xff] %v10271_v60  ;;  %10290 = vrcp.f32 %v7168_v63  ;;  %v9186_v17 = vadd.f32 %v4778_v55, %v3689_v28  ;;  %v3692_v18 = vadd.f32 %v12972_v16, %v13786_v19 }
 0x437   :  { %v4780_v11 = vpop.f32.mrb[145].mxu0  ;;  %v6217_v45 = vadd.f32 %v13189_v9, %v6216_v26  ;;  %v7167_v6 = vadd.f32 1.0, %v10273_v62  ;;  %10292 = vpow2.f32 %v8393_v56  ;;  %v8395_v7 = vmul.f32 -1.442695, %v6222_v41  ;;  %8947 = vmatmul.mubr.msk.f32.gmra.mrb[198].mxu1 %vm5685_vm1, %v5617_v1 }
 0x438   :  { %v10275_v58 = vpop.eup %10274  ;;  %v4781_v27 = vpop.f32.mrb[146].mxu0  ;;  %10294 = vpow2.f32 %v8392_v48  ;;  %v5324_v50 = vadd.f32 %v9186_v17, %v12878_v10  ;;  %v13787_v17 = vld [vmem:[#allocation41_spill] sm:$0xff] }
 0x439   :  { %v10277_v20 = vpop.eup %10276  ;;  %v7170_v46 = vadd.f32 1.0, %v10275_v58  ;;  %v8394_v30 = vmul.f32 -1.442695, %v6217_v45  ;;  %v4783_v3 = vpop.f32.mrb[147].mxu0  ;;  %10296 = vrcp.f32 %v7167_v6  ;;  %v9188_v63 = vadd.f32 %v4781_v27, %v3692_v18  ;;  %v13788_v18 = vld [vmem:[#allocation42_spill] sm:$0xff] }
 0x43a   :  { %v10279_v4 = vpop.eup %10278  ;;  %7548 = vst [vmem:[#allocation2 + $0x28] sm:$0xff] %v10277_v20  ;;  %v8870_v59 = vpop.f32.mrb[146].mxu1  ;;  %v5618_v28 = vmax.f32 %v5324_v50, 0.0  ;;  %4993 = vmatmul.mubr.bf16.gmra.mrb[252].mxu0 %v10245_v8  ;;  %v3697_v11 = vadd.f32 %v12972_v16, %v13787_v17  ;;  %v3700_v27 = vadd.f32 %v12972_v16, %v13788_v18  ;;  %v13789_v17 = vld [vmem:[#allocation43_spill] sm:$0xff] }
 0x43b   :  { %v10281_v56 = vpop.eup %10280  ;;  %7547 = vst [vmem:[#allocation2 + $0x20] sm:$0xff] %v10279_v4  ;;  %10298 = vrcp.f32 %v7170_v46  ;;  %v6232_v57 = vadd.f32 %v8870_v59, %v13189_v9  ;;  %v6226_v60 = vpop.f32.mrb[147].mxu1  ;;  %v5327_v10 = vadd.f32 %v9188_v63, %v12891_v33 }
 0x43c   :  { %v10283_v1 = vpop.eup %10282  ;;  %v7169_v55 = vadd.f32 1.0, %v10281_v56  ;;  %10300 = vpow2.f32 %v8395_v7  ;;  %v6227_v48 = vadd.f32 %v13189_v9, %v6226_v60  ;;  %8949 = vmatprep.mubr.msk.f32.mxu1 %vm5685_vm1, %v5618_v28 }
 0x43d   :  { %v10285_v41 = vpop.eup %10284  ;;  %v7172_v26 = vadd.f32 1.0, %v10283_v1  ;;  %10302 = vpow2.f32 %v8394_v30  ;;  %v8397_v62 = vmul.f32 -1.442695, %v6232_v57  ;;  %v5619_v8 = vmax.f32 %v5327_v10, 0.0  ;;  %v4786_v6 = vpop.f32.mrb[148].mxu0 }
 0x43e   :  { %v10287_v45 = vpop.eup %10286  ;;  %7550 = vst [vmem:[#allocation2 + $0x38] sm:$0xff] %v10285_v41  ;;  %10304 = vrcp.f32 %v7169_v55  ;;  %v8396_v58 = vmul.f32 -1.442695, %v6227_v48  ;;  %v9190_v33 = vadd.f32 %v4786_v6, %v3697_v11  ;;  %v4788_v19 = vpop.f32.mrb[149].mxu0  ;;  %v3705_v11 = vadd.f32 %v12972_v16, %v13789_v17 }
 0x43f   :  { %10306 = vrcp.f32 %v7172_v26  ;;  %v7171_v7 = vadd.f32 1.0, %v10287_v45  ;;  %v10289_v20 = vpop.eup %10288  ;;  %8950 = vmatmul.mubr.msk.f32.gmra.mrb[200].mxu1 %vm5685_vm1, %v5619_v8  ;;  %v4789_v46 = vpop.f32.mrb[150].mxu0  ;;  %v13790_v19 = vld [vmem:[#allocation44_spill] sm:$0xff] }
 0x440   :  { %10308 = vpow2.f32 %v8397_v62  ;;  %v10291_v50 = vpop.eup %10290  ;;  %7549 = vst [vmem:[#allocation2 + $0x30] sm:$0xff] %v10289_v20  ;;  %v5332_v30 = vadd.f32 %v9190_v33, %v12876_v12  ;;  %v9192_v3 = vadd.f32 %v4789_v46, %v3700_v27  ;;  %v4791_v4 = vpop.f32.mrb[151].mxu0  ;;  %v3708_v18 = vadd.f32 %v12972_v16, %v13790_v19 }
 0x441   :  { %10310 = vrcp.f32 %v7171_v7  ;;  %v10293_v63 = vpop.eup %10292  ;;  %7552 = vst [vmem:[#allocation2 + $0x48] sm:$0xff] %v10291_v50  ;;  %v8873_v59 = vpop.f32.mrb[148].mxu1 }
 0x442   :  { %10312 = vpow2.f32 %v8396_v58  ;;  %v10295_v56 = vpop.eup %10294  ;;  %v7174_v28 = vadd.f32 1.0, %v10293_v63  ;;  %v5620_v57 = vmax.f32 %v5332_v30, 0.0  ;;  %v5335_v60 = vadd.f32 %v9192_v3, %v12886_v36  ;;  %v6236_v55 = vpop.f32.mrb[149].mxu1 }
 0x443   :  { %v6242_v1 = vadd.f32 %v8873_v59, %v13189_v9  ;;  %v10297_v10 = vpop.eup %10296  ;;  %v7173_v48 = vadd.f32 1.0, %v10295_v56  ;;  %v6237_v41 = vadd.f32 %v13189_v9, %v6236_v55 }
 0x444   :  { %7551 = vst [vmem:[#allocation2 + $0x40] sm:$0xff] %v10297_v10  ;;  %10314 = vrcp.f32 %v7174_v28  ;;  %v5621_v12 = vmax.f32 %v5335_v60, 0.0  ;;  %8952 = vmatprep.mubr.msk.f32.mxu1 %vm5685_vm1, %v5620_v57 }
 0x445   :  { %v10299_v26 = vpop.eup %10298  ;;  %v8399_v62 = vmul.f32 -1.442695, %v6242_v1  ;;  %10316 = vrcp.f32 %v7173_v48  ;;  %v8398_v36 = vmul.f32 -1.442695, %v6237_v41  ;;  %v4794_v8 = vpop.f32.mrb[152].mxu0  ;;  %v13791_v41 = vld [vmem:[#allocation45_spill] sm:$0xff] }
 0x446   :  { %v10301_v45 = vpop.eup %10300  ;;  %7554 = vst [vmem:[#allocation2 + $0x58] sm:$0xff] %v10299_v26  ;;  %v9194_v7 = vadd.f32 %v4794_v8, %v3705_v11  ;;  %v4796_v33 = vpop.f32.mrb[153].mxu0  ;;  %8953 = vmatmul.mubr.msk.f32.gmra.mrb[202].mxu1 %vm5685_vm1, %v5621_v12  ;;  %v13305_v8 = vld [vmem:[%s13635_s2] ss:$0 sm:$0xff] }
 0x447   :  { %v10303_v58 = vpop.eup %10302  ;;  %v7176_v6 = vadd.f32 1.0, %v10301_v45  ;;  %10318 = vpow2.f32 %v8399_v62  ;;  %v4797_v46 = vpop.f32.mrb[154].mxu0 }
 0x448   :  { %v10305_v27 = vpop.eup %10304  ;;  %v7175_v20 = vadd.f32 1.0, %v10303_v58  ;;  %10320 = vpow2.f32 %v8398_v36  ;;  %v5340_v30 = vadd.f32 %v9194_v7, %v12900_v5  ;;  %v9196_v3 = vadd.f32 %v4797_v46, %v3708_v18  ;;  %v4799_v4 = vpop.f32.mrb[155].mxu0 }
 0x449   :  { %v10307_v50 = vpop.eup %10306  ;;  %7553 = vst [vmem:[#allocation2 + $0x50] sm:$0xff] %v10305_v27  ;;  %10322 = vrcp.f32 %v7176_v6  ;;  %v8876_v59 = vpop.f32.mrb[150].mxu1  ;;  %v3713_v5 = vadd.f32 %v12972_v16, %v13791_v41  ;;  %v13792_v16 = vld [vmem:[#allocation46_spill] sm:$0xff] }
 0x44a   :  { %v10309_v63 = vpop.eup %10308  ;;  %7556 = vst [vmem:[#allocation2 + $0x68] sm:$0xff] %v10307_v50  ;;  %10324 = vrcp.f32 %v7175_v20  ;;  %v5622_v57 = vmax.f32 %v5340_v30, 0.0  ;;  %v5343_v60 = vadd.f32 %v9196_v3, %v12913_v0  ;;  %v6252_v1 = vadd.f32 %v8876_v59, %v13189_v9  ;;  %v6246_v55 = vpop.f32.mrb[151].mxu1 }
 0x44b   :  { %v10311_v56 = vpop.eup %10310  ;;  %v7178_v28 = vadd.f32 1.0, %v10309_v63  ;;  %v6247_v48 = vadd.f32 %v13189_v9, %v6246_v55  ;;  %v3716_v58 = vadd.f32 %v13305_v8, %v13792_v16 }
 0x44c   :  { %v10313_v10 = vpop.eup %10312  ;;  %7555 = vst [vmem:[#allocation2 + $0x60] sm:$0xff] %v10311_v56  ;;  %v5623_v12 = vmax.f32 %v5343_v60, 0.0  ;;  %v8401_v62 = vmul.f32 -1.442695, %v6252_v1  ;;  %8955 = vmatprep.mubr.msk.f32.mxu1 %vm5685_vm1, %v5622_v57  ;;  %v13793_v1 = vld [vmem:[#allocation47_spill] sm:$0xff] }
 0x44d   :  { %10326 = vrcp.f32 %v7178_v28  ;;  %v7177_v26 = vadd.f32 1.0, %v10313_v10  ;;  %v8400_v17 = vmul.f32 -1.442695, %v6247_v48  ;;  %v4802_v11 = vpop.f32.mrb[156].mxu0  ;;  %v3721_v55 = vadd.f32 %v13305_v8, %v13793_v1 }
 0x44e   :  { %v10315_v45 = vpop.eup %10314  ;;  %v9198_v0 = vadd.f32 %v4802_v11, %v3713_v5  ;;  %v4804_v36 = vpop.f32.mrb[157].mxu0  ;;  %8956 = vmatmul.mubr.msk.f32.gmra.mrb[204].mxu1 %vm5685_vm1, %v5623_v12 }
 0x44f   :  { %10328 = vrcp.f32 %v7177_v26  ;;  %v10317_v6 = vpop.eup %10316  ;;  %7558 = vst [vmem:[#allocation2 + $0x78] sm:$0xff] %v10315_v45  ;;  %v4805_v7 = vpop.f32.mrb[158].mxu0  ;;  %v13794_v26 = vld [vmem:[#allocation48_spill] sm:$0xff] }
 0x450   :  { %10330 = vpow2.f32 %v8401_v62  ;;  %7557 = vst [vmem:[#allocation2 + $0x70] sm:$0xff] %v10317_v6  ;;  %v5348_v19 = vadd.f32 %v9198_v0, %v12898_v39  ;;  %v9200_v18 = vadd.f32 %v4805_v7, %v3716_v58  ;;  %v4807_v27 = vpop.f32.mrb[159].mxu0  ;;  %v3724_v12 = vadd.f32 %v13305_v8, %v13794_v26 }
 0x451   :  { %v10319_v33 = vpop.eup %10318  ;;  %10332 = vpow2.f32 %v8400_v17  ;;  %v8879_v50 = vpop.f32.mrb[152].mxu1 }
 0x452   :  { %v10321_v20 = vpop.eup %10320  ;;  %v7180_v46 = vadd.f32 1.0, %v10319_v33  ;;  %v5624_v4 = vmax.f32 %v5348_v19, 0.0  ;;  %v5351_v63 = vadd.f32 %v9200_v18, %v12908_v31  ;;  %v6262_v59 = vadd.f32 %v8879_v50, %v13189_v9  ;;  %v6256_v56 = vpop.f32.mrb[153].mxu1 }
 0x453   :  { %v10323_v30 = vpop.eup %10322  ;;  %v7179_v3 = vadd.f32 1.0, %v10321_v20  ;;  %v6257_v57 = vadd.f32 %v13189_v9, %v6256_v56 }
 0x454   :  { %v10325_v28 = vpop.eup %10324  ;;  %7560 = vst [vmem:[#allocation2 + $0x88] sm:$0xff] %v10323_v30  ;;  %10334 = vrcp.f32 %v7180_v46  ;;  %v5625_v39 = vmax.f32 %v5351_v63, 0.0  ;;  %v8403_v60 = vmul.f32 -1.442695, %v6262_v59  ;;  %8958 = vmatprep.mubr.msk.f32.mxu1 %vm5685_vm1, %v5624_v4 }
 0x455   :  { %7559 = vst [vmem:[#allocation2 + $0x80] sm:$0xff] %v10325_v28  ;;  %10336 = vrcp.f32 %v7179_v3  ;;  %v8402_v10 = vmul.f32 -1.442695, %v6257_v57  ;;  %v4810_v48 = vpop.f32.mrb[160].mxu0  ;;  %v13796_v28 = vld [vmem:[#allocation50_spill] sm:$0xff] }
 0x456   :  { %10338 = vpow2.f32 %v8403_v60  ;;  %v9202_v41 = vadd.f32 %v4810_v48, %v3721_v55  ;;  %v4812_v5 = vpop.f32.mrb[161].mxu0  ;;  %8959 = vmatmul.mubr.msk.f32.gmra.mrb[206].mxu1 %vm5685_vm1, %v5625_v39  ;;  %v3732_v57 = vadd.f32 %v13305_v8, %v13796_v28 }
 0x457   :  { %v10327_v31 = vpop.eup %10326  ;;  %10340 = vpow2.f32 %v8402_v10  ;;  %v4813_v62 = vpop.f32.mrb[162].mxu0 }
 0x458   :  { %7562 = vst [vmem:[#allocation2 + $0x98] sm:$0xff] %v10327_v31  ;;  %v5356_v11 = vadd.f32 %v9202_v41, %v12922_v35  ;;  %v9204_v45 = vadd.f32 %v4813_v62, %v3724_v12  ;;  %v4815_v0 = vpop.f32.mrb[163].mxu0  ;;  %v13795_v35 = vld [vmem:[#allocation49_spill] sm:$0xff] }
 0x459   :  { %v10329_v17 = vpop.eup %10328  ;;  %v8882_v16 = vpop.f32.mrb[154].mxu1  ;;  %v3729_v30 = vadd.f32 %v13305_v8, %v13795_v35 }
 0x45a   :  { %v10331_v36 = vpop.eup %10330  ;;  %7561 = vst [vmem:[#allocation2 + $0x90] sm:$0xff] %v10329_v17  ;;  %v5626_v7 = vmax.f32 %v5356_v11, 0.0  ;;  %v5359_v33 = vadd.f32 %v9204_v45, %v12935_v15  ;;  %v6272_v19 = vadd.f32 %v8882_v16, %v13189_v9  ;;  %v6266_v18 = vpop.f32.mrb[155].mxu1 }
 0x45b   :  { %v10333_v58 = vpop.eup %10332  ;;  %v7182_v6 = vadd.f32 1.0, %v10331_v36  ;;  %v6267_v20 = vadd.f32 %v13189_v9, %v6266_v18 }
 0x45c   :  { %v7181_v27 = vadd.f32 1.0, %v10333_v58  ;;  %v5627_v46 = vmax.f32 %v5359_v33, 0.0  ;;  %v8405_v50 = vmul.f32 -1.442695, %v6272_v19  ;;  %8961 = vmatprep.mubr.msk.f32.mxu1 %vm5685_vm1, %v5626_v7  ;;  %v13798_v33 = vld [vmem:[#allocation52_spill] sm:$0xff] }
 0x45d   :  { %10342 = vrcp.f32 %v7182_v6  ;;  %v8404_v4 = vmul.f32 -1.442695, %v6267_v20  ;;  %v4818_v63 = vpop.f32.mrb[164].mxu0  ;;  %v3740_v19 = vadd.f32 %v13305_v8, %v13798_v33 }
 0x45e   :  { %v10335_v3 = vpop.eup %10334  ;;  %10344 = vrcp.f32 %v7181_v27  ;;  %v9206_v15 = vadd.f32 %v4818_v63, %v3729_v30  ;;  %v4820_v56 = vpop.f32.mrb[165].mxu0  ;;  %8962 = vmatmul.mubr.msk.f32.gmra.mrb[208].mxu1 %vm5685_vm1, %v5627_v46 }
 0x45f   :  { %v10337_v59 = vpop.eup %10336  ;;  %7564 = vst [vmem:[#allocation2 + $0xa8] sm:$0xff] %v10335_v3  ;;  %10346 = vpow2.f32 %v8405_v50  ;;  %v4821_v39 = vpop.f32.mrb[166].mxu0 }
 0x460   :  { %7563 = vst [vmem:[#allocation2 + $0xa0] sm:$0xff] %v10337_v59  ;;  %10348 = vpow2.f32 %v8404_v4  ;;  %v10339_v60 = vpop.eup %10338  ;;  %v5364_v1 = vadd.f32 %v9206_v15, %v12920_v21  ;;  %v9208_v55 = vadd.f32 %v4821_v39, %v3732_v57  ;;  %v4823_v10 = vpop.f32.mrb[167].mxu0  ;;  %v13797_v21 = vld [vmem:[#allocation51_spill] sm:$0xff] }
 0x461   :  { %v10341_v48 = vpop.eup %10340  ;;  %v7184_v31 = vadd.f32 1.0, %v10339_v60  ;;  %v8885_v41 = vpop.f32.mrb[156].mxu1  ;;  %v3737_v36 = vadd.f32 %v13305_v8, %v13797_v21 }
 0x462   :  { %v7183_v5 = vadd.f32 1.0, %v10341_v48  ;;  %v5628_v26 = vmax.f32 %v5364_v1, 0.0  ;;  %v5367_v12 = vadd.f32 %v9208_v55, %v12930_v47  ;;  %v6282_v62 = vadd.f32 %v8885_v41, %v13189_v9  ;;  %v6276_v17 = vpop.f32.mrb[157].mxu1 }
 0x463   :  { %10350 = vrcp.f32 %v7184_v31  ;;  %v6277_v11 = vadd.f32 %v13189_v9, %v6276_v17 }
 0x464   :  { %10352 = vrcp.f32 %v7183_v5  ;;  %v5629_v45 = vmax.f32 %v5367_v12, 0.0  ;;  %v8407_v0 = vmul.f32 -1.442695, %v6282_v62  ;;  %8964 = vmatprep.mubr.msk.f32.mxu1 %vm5685_vm1, %v5628_v26  ;;  %v13800_v5 = vld [vmem:[#allocation54_spill] sm:$0xff] }
 0x465   :  { %v8406_v16 = vmul.f32 -1.442695, %v6277_v11  ;;  %v4826_v58 = vpop.f32.mrb[168].mxu0  ;;  %v3748_v26 = vadd.f32 %v13305_v8, %v13800_v5 }
 0x466   :  { %10354 = vpow2.f32 %v8407_v0  ;;  %v9210_v7 = vadd.f32 %v4826_v58, %v3737_v36  ;;  %v4828_v47 = vpop.f32.mrb[169].mxu0  ;;  %8965 = vmatmul.mubr.msk.f32.gmra.mrb[210].mxu1 %vm5685_vm1, %v5629_v45 }
 0x467   :  { %v10343_v6 = vpop.eup %10342  ;;  %10356 = vpow2.f32 %v8406_v16  ;;  %v4829_v27 = vpop.f32.mrb[170].mxu0 }
 0x468   :  { %v10345_v18 = vpop.eup %10344  ;;  %7566 = vst [vmem:[#allocation2 + $0xb8] sm:$0xff] %v10343_v6  ;;  %v5372_v46 = vadd.f32 %v9210_v7, %v12944_v52  ;;  %v9212_v50 = vadd.f32 %v4829_v27, %v3740_v19  ;;  %v4831_v35 = vpop.f32.mrb[171].mxu0  ;;  %v13799_v52 = vld [vmem:[#allocation53_spill] sm:$0xff] }
 0x469   :  { %v10347_v20 = vpop.eup %10346  ;;  %7565 = vst [vmem:[#allocation2 + $0xb0] sm:$0xff] %v10345_v18  ;;  %v8888_v4 = vpop.f32.mrb[158].mxu1  ;;  %v3745_v1 = vadd.f32 %v13305_v8, %v13799_v52 }
 0x46a   :  { %v10349_v30 = vpop.eup %10348  ;;  %v7186_v3 = vadd.f32 1.0, %v10347_v20  ;;  %v5630_v59 = vmax.f32 %v5372_v46, 0.0  ;;  %v5375_v15 = vadd.f32 %v9212_v50, %v12957_v24  ;;  %v6292_v56 = vadd.f32 %v8888_v4, %v13189_v9  ;;  %v6286_v28 = vpop.f32.mrb[159].mxu1 }
 0x46b   :  { %v7185_v63 = vadd.f32 1.0, %v10349_v30  ;;  %v6287_v57 = vadd.f32 %v13189_v9, %v6286_v28 }
 0x46c   :  { %10358 = vrcp.f32 %v7186_v3  ;;  %v5631_v39 = vmax.f32 %v5375_v15, 0.0  ;;  %v8409_v60 = vmul.f32 -1.442695, %v6292_v56  ;;  %8967 = vmatprep.mubr.msk.f32.mxu1 %vm5685_vm1, %v5630_v59  ;;  %v13802_v3 = vld [vmem:[#allocation56_spill] sm:$0xff] }
 0x46d   :  { %10360 = vrcp.f32 %v7185_v63  ;;  %v10351_v55 = vpop.eup %10350  ;;  %v8408_v10 = vmul.f32 -1.442695, %v6287_v57  ;;  %v4834_v48 = vpop.f32.mrb[172].mxu0  ;;  %v3756_v4 = vadd.f32 %v13305_v8, %v13802_v3  ;;  %v13807_v3 = vld [vmem:[#allocation59_spill] sm:$0xff] }
 0x46e   :  { %v10353_v31 = vpop.eup %10352  ;;  %7568 = vst [vmem:[#allocation2 + $0xc8] sm:$0xff] %v10351_v55  ;;  %10362 = vpow2.f32 %v8409_v60  ;;  %v9214_v24 = vadd.f32 %v4834_v48, %v3745_v1  ;;  %v4836_v41 = vpop.f32.mrb[173].mxu0  ;;  %8968 = vmatmul.mubr.msk.f32.gmra.mrb[212].mxu1 %vm5685_vm1, %v5631_v39 }
 0x46f   :  { %7567 = vst [vmem:[#allocation2 + $0xc0] sm:$0xff] %v10353_v31  ;;  %10364 = vpow2.f32 %v8408_v10  ;;  %v4837_v12 = vpop.f32.mrb[174].mxu0 }
 0x470   :  { %v10355_v62 = vpop.eup %10354  ;;  %v5380_v17 = vadd.f32 %v9214_v24, %v12942_v23  ;;  %v9216_v11 = vadd.f32 %v4837_v12, %v3748_v26  ;;  %v4839_v45 = vpop.f32.mrb[175].mxu0  ;;  %v13801_v23 = vld [vmem:[#allocation55_spill] sm:$0xff] }
 0x471   :  { %v10357_v0 = vpop.eup %10356  ;;  %v7188_v21 = vadd.f32 1.0, %v10355_v62  ;;  %v8891_v36 = vpop.f32.mrb[160].mxu1  ;;  %v3753_v27 = vadd.f32 %v13305_v8, %v13801_v23  ;;  %v13804_v45 = vld [vmem:[#allocation58_spill] sm:$0xff] }
 0x472   :  { %v7187_v16 = vadd.f32 1.0, %v10357_v0  ;;  %v5632_v58 = vmax.f32 %v5380_v17, 0.0  ;;  %v5383_v6 = vadd.f32 %v9216_v11, %v12952_v22  ;;  %v6302_v7 = vadd.f32 %v8891_v36, %v13189_v9  ;;  %v6296_v47 = vpop.f32.mrb[161].mxu1  ;;  %v13805_v36 = vld [vmem:[#allocation5_spill] sm:$0xff]  ;;  %v13806_v23 = vld [vmem:[#allocation6_spill] sm:$0xff] }
 0x473   :  { %10366 = vrcp.f32 %v7188_v21  ;;  %v6297_v33 = vadd.f32 %v13189_v9, %v6296_v47 }
 0x474   :  { %10368 = vrcp.f32 %v7187_v16  ;;  %v5633_v19 = vmax.f32 %v5383_v6, 0.0  ;;  %v8411_v18 = vmul.f32 -1.442695, %v6302_v7  ;;  %8970 = vmatprep.mubr.msk.f32.mxu1 %vm5685_vm1, %v5632_v58 }
 0x475   :  { %v8410_v46 = vmul.f32 -1.442695, %v6297_v33  ;;  %v4842_v50 = vpop.f32.mrb[176].mxu0 }
 0x476   :  { %v10359_v20 = vpop.eup %10358  ;;  %10370 = vpow2.f32 %v8411_v18  ;;  %v9218_v22 = vadd.f32 %v4842_v50, %v3753_v27  ;;  %v4844_v30 = vpop.f32.mrb[177].mxu0  ;;  %8971 = vmatmul.mubr.msk.f32.gmra.mrb[214].mxu1 %vm5685_vm1, %v5633_v19 }
 0x477   :  { %v10361_v35 = vpop.eup %10360  ;;  %7570 = vst [vmem:[#allocation2 + $0xd8] sm:$0xff] %v10359_v20  ;;  %10372 = vpow2.f32 %v8410_v46  ;;  %v4845_v63 = vpop.f32.mrb[178].mxu0  ;;  %v13374_v20 = vld [vmem:[%s13637_s4] ss:$0 sm:$0xff] }
 0x478   :  { %7569 = vst [vmem:[#allocation2 + $0xd0] sm:$0xff] %v10361_v35  ;;  %v10363_v59 = vpop.eup %10362  ;;  %v5388_v15 = vadd.f32 %v9218_v22, %v12966_v49  ;;  %v9220_v56 = vadd.f32 %v4845_v63, %v3756_v4  ;;  %v4847_v28 = vpop.f32.mrb[179].mxu0  ;;  %v13803_v49 = vld [vmem:[#allocation57_spill] sm:$0xff]  ;;  %v3769_v4 = vadd.f32 %v13305_v8, %v13807_v3 }
 0x479   :  { %v10365_v57 = vpop.eup %10364  ;;  %v7190_v39 = vadd.f32 1.0, %v10363_v59  ;;  %v8894_v60 = vpop.f32.mrb[162].mxu1  ;;  %v3761_v5 = vadd.f32 %v13305_v8, %v13803_v49 }
 0x47a   :  { %v7189_v52 = vadd.f32 1.0, %v10365_v57  ;;  %v5634_v1 = vmax.f32 %v5388_v15, 0.0  ;;  %v5391_v55 = vadd.f32 %v9220_v56, %v12984_v44  ;;  %v6312_v10 = vadd.f32 %v8894_v60, %v13189_v9  ;;  %v6306_v48 = vpop.f32.mrb[163].mxu1 }
 0x47b   :  { %10374 = vrcp.f32 %v7190_v39  ;;  %v6307_v31 = vadd.f32 %v13189_v9, %v6306_v48  ;;  %v3764_v9 = vadd.f32 %v13305_v8, %v13804_v45  ;;  %v13808_v39 = vld [vmem:[#allocation60_spill] sm:$0xff] }
 0x47c   :  { %10376 = vrcp.f32 %v7189_v52  ;;  %v5635_v24 = vmax.f32 %v5391_v55, 0.0  ;;  %v8413_v41 = vmul.f32 -1.442695, %v6312_v10  ;;  %8973 = vmatprep.mubr.msk.f32.mxu1 %vm5685_vm1, %v5634_v1  ;;  %v3772_v60 = vadd.f32 %v13305_v8, %v13808_v39 }
 0x47d   :  { %v10367_v26 = vpop.eup %10366  ;;  %v8412_v12 = vmul.f32 -1.442695, %v6307_v31  ;;  %v4850_v62 = vpop.f32.mrb[180].mxu0 }
 0x47e   :  { %v10369_v17 = vpop.eup %10368  ;;  %7572 = vst [vmem:[#allocation2 + $0xe8] sm:$0xff] %v10367_v26  ;;  %10378 = vpow2.f32 %v8413_v41  ;;  %v9222_v44 = vadd.f32 %v4850_v62, %v3761_v5  ;;  %v4852_v11 = vpop.f32.mrb[181].mxu0  ;;  %8974 = vmatmul.mubr.msk.f32.gmra.mrb[216].mxu1 %vm5685_vm1, %v5635_v24 }
 0x47f   :  { %7571 = vst [vmem:[#allocation2 + $0xe0] sm:$0xff] %v10369_v17  ;;  %10380 = vpow2.f32 %v8412_v12  ;;  %v4853_v0 = vpop.f32.mrb[182].mxu0 }
 0x480   :  { %v10371_v21 = vpop.eup %10370  ;;  %v5396_v16 = vadd.f32 %v9222_v44, %v13805_v36  ;;  %v9224_v58 = vadd.f32 %v4853_v0, %v3764_v9  ;;  %v4855_v6 = vpop.f32.mrb[183].mxu0 }
 0x481   :  { %v10373_v7 = vpop.eup %10372  ;;  %v7192_v47 = vadd.f32 1.0, %v10371_v21  ;;  %v8897_v33 = vpop.f32.mrb[164].mxu1 }
 0x482   :  { %v7191_v19 = vadd.f32 1.0, %v10373_v7  ;;  %v5636_v18 = vmax.f32 %v5396_v16, 0.0  ;;  %v5399_v27 = vadd.f32 %v9224_v58, %v13806_v23  ;;  %v6322_v46 = vadd.f32 %v13374_v20, %v8897_v33  ;;  %v6316_v50 = vpop.f32.mrb[165].mxu1  ;;  %v13810_v58 = vld [vmem:[#allocation62_spill] sm:$0xff]  ;;  %v13811_v33 = vld [vmem:[#allocation7_spill] sm:$0xff] }
 0x483   :  { %10382 = vrcp.f32 %v7192_v47  ;;  %v6317_v35 = vadd.f32 %v13374_v20, %v6316_v50  ;;  %v3780_v6 = vadd.f32 %v13305_v8, %v13810_v58 }
 0x484   :  { %10384 = vrcp.f32 %v7191_v19  ;;  %v5637_v22 = vmax.f32 %v5399_v27, 0.0  ;;  %v8415_v30 = vmul.f32 -1.442695, %v6322_v46  ;;  %8976 = vmatprep.mubr.msk.f32.mxu1 %vm5685_vm1, %v5636_v18 }
 0x485   :  { %v10375_v63 = vpop.eup %10374  ;;  %v8414_v59 = vmul.f32 -1.442695, %v6317_v35  ;;  %v4858_v15 = vpop.f32.mrb[184].mxu0 }
 0x486   :  { %v10377_v56 = vpop.eup %10376  ;;  %7574 = vst [vmem:[#allocation2 + $0xf8] sm:$0xff] %v10375_v63  ;;  %10386 = vpow2.f32 %v8415_v30  ;;  %v9226_v28 = vadd.f32 %v4858_v15, %v3769_v4  ;;  %v4860_v57 = vpop.f32.mrb[185].mxu0  ;;  %8977 = vmatmul.mubr.msk.f32.gmra.mrb[218].mxu1 %vm5685_vm1, %v5637_v22  ;;  %v13812_v30 = vld [vmem:[#allocation8_spill] sm:$0xff] }
 0x487   :  { %7573 = vst [vmem:[#allocation2 + $0xf0] sm:$0xff] %v10377_v56  ;;  %10388 = vpow2.f32 %v8414_v59  ;;  %v4861_v52 = vpop.f32.mrb[186].mxu0 }
 0x488   :  { %v10379_v1 = vpop.eup %10378  ;;  %v5404_v55 = vadd.f32 %v9226_v28, %v12993_v32  ;;  %v9228_v10 = vadd.f32 %v4861_v52, %v3772_v60  ;;  %v4863_v48 = vpop.f32.mrb[187].mxu0  ;;  %v13809_v32 = vld [vmem:[#allocation61_spill] sm:$0xff]  ;;  %v13813_v28 = vld [vmem:[#allocation63_spill] sm:$0xff] }
 0x489   :  { %v10381_v31 = vpop.eup %10380  ;;  %v7194_v24 = vadd.f32 1.0, %v10379_v1  ;;  %v8900_v41 = vpop.f32.mrb[166].mxu1  ;;  %v3777_v45 = vadd.f32 %v13305_v8, %v13809_v32  ;;  %v3785_v57 = vadd.f32 %v13305_v8, %v13813_v28  ;;  %v13814_v48 = vld [vmem:[#allocation64_spill] sm:$0xff] }
 0x48a   :  { %v7193_v49 = vadd.f32 1.0, %v10381_v31  ;;  %v5638_v5 = vmax.f32 %v5404_v55, 0.0  ;;  %v5407_v26 = vadd.f32 %v9228_v10, %v13006_v43  ;;  %v6332_v12 = vadd.f32 %v13374_v20, %v8900_v41  ;;  %v6326_v62 = vpop.f32.mrb[167].mxu1 }
 0x48b   :  { %10390 = vrcp.f32 %v7194_v24  ;;  %v6327_v17 = vadd.f32 %v13374_v20, %v6326_v62  ;;  %v3788_v31 = vadd.f32 %v13305_v8, %v13814_v48 }
 0x48c   :  { %10392 = vrcp.f32 %v7193_v49  ;;  %v5639_v44 = vmax.f32 %v5407_v26, 0.0  ;;  %v8417_v11 = vmul.f32 -1.442695, %v6332_v12  ;;  %8979 = vmatprep.mubr.msk.f32.mxu1 %vm5685_vm1, %v5638_v5 }
 0x48d   :  { %v10383_v9 = vpop.eup %10382  ;;  %v8416_v0 = vmul.f32 -1.442695, %v6327_v17  ;;  %v4866_v21 = vpop.f32.mrb[188].mxu0 }
 0x48e   :  { %v10385_v36 = vpop.eup %10384  ;;  %7576 = vst [vmem:[#allocation2 + $0x108] sm:$0xff] %v10383_v9  ;;  %10394 = vpow2.f32 %v8417_v11  ;;  %v9230_v43 = vadd.f32 %v4866_v21, %v3777_v45  ;;  %v4868_v16 = vpop.f32.mrb[189].mxu0  ;;  %8980 = vmatmul.mubr.msk.f32.gmra.mrb[220].mxu1 %vm5685_vm1, %v5639_v44 }
 0x48f   :  { %7575 = vst [vmem:[#allocation2 + $0x100] sm:$0xff] %v10385_v36  ;;  %10396 = vpow2.f32 %v8416_v0  ;;  %v4869_v7 = vpop.f32.mrb[190].mxu0 }
 0x490   :  { %v10387_v47 = vpop.eup %10386  ;;  %v5412_v19 = vadd.f32 %v9230_v43, %v13811_v33  ;;  %v9232_v18 = vadd.f32 %v4869_v7, %v3780_v6  ;;  %v4871_v23 = vpop.f32.mrb[191].mxu0  ;;  %v13816_v33 = vld [vmem:[#allocation66_spill] sm:$0xff] }
 0x491   :  { %v10389_v27 = vpop.eup %10388  ;;  %v7196_v46 = vadd.f32 1.0, %v10387_v47  ;;  %v8903_v50 = vpop.f32.mrb[168].mxu1 }
 0x492   :  { %v7195_v35 = vadd.f32 1.0, %v10389_v27  ;;  %v5640_v22 = vmax.f32 %v5412_v19, 0.0  ;;  %v5415_v3 = vadd.f32 %v9232_v18, %v13812_v30  ;;  %v6342_v4 = vadd.f32 %v13374_v20, %v8903_v50  ;;  %v6336_v63 = vpop.f32.mrb[169].mxu1  ;;  %v13817_v27 = vld [vmem:[#allocation9_spill] sm:$0xff] }
 0x493   :  { %10398 = vrcp.f32 %v7196_v46  ;;  %v6337_v59 = vadd.f32 %v13374_v20, %v6336_v63  ;;  %v3796_v19 = vadd.f32 %v13305_v8, %v13816_v33 }
 0x494   :  { %10400 = vrcp.f32 %v7195_v35  ;;  %v5641_v15 = vmax.f32 %v5415_v3, 0.0  ;;  %v8419_v56 = vmul.f32 -1.442695, %v6342_v4  ;;  %8982 = vmatprep.mubr.msk.f32.mxu1 %vm5685_vm1, %v5640_v22 }
 0x495   :  { %v10391_v39 = vpop.eup %10390  ;;  %v8418_v60 = vmul.f32 -1.442695, %v6337_v59  ;;  %v4874_v52 = vpop.f32.mrb[192].mxu0  ;;  %v13818_v59 = vld [vmem:[#allocation10_spill] sm:$0xff] }
 0x496   :  { %v10393_v1 = vpop.eup %10392  ;;  %7578 = vst [vmem:[#allocation2 + $0x118] sm:$0xff] %v10391_v39  ;;  %10402 = vpow2.f32 %v8419_v56  ;;  %v9234_v55 = vadd.f32 %v4874_v52, %v3785_v57  ;;  %v4876_v10 = vpop.f32.mrb[193].mxu0  ;;  %8983 = vmatmul.mubr.msk.f32.gmra.mrb[222].mxu1 %vm5685_vm1, %v5641_v15  ;;  %v13819_v52 = vld [vmem:[#allocation67_spill] sm:$0xff] }
 0x497   :  { %7577 = vst [vmem:[#allocation2 + $0x110] sm:$0xff] %v10393_v1  ;;  %10404 = vpow2.f32 %v8418_v60  ;;  %v4877_v24 = vpop.f32.mrb[194].mxu0  ;;  %v3801_v1 = vadd.f32 %v13305_v8, %v13819_v52 }
 0x498   :  { %v10395_v41 = vpop.eup %10394  ;;  %v5420_v49 = vadd.f32 %v9234_v55, %v13015_v42  ;;  %v9236_v5 = vadd.f32 %v4877_v24, %v3788_v31  ;;  %v4879_v26 = vpop.f32.mrb[195].mxu0  ;;  %v13815_v42 = vld [vmem:[#allocation65_spill] sm:$0xff] }
 0x499   :  { %v10397_v12 = vpop.eup %10396  ;;  %v7198_v62 = vadd.f32 1.0, %v10395_v41  ;;  %v8906_v17 = vpop.f32.mrb[170].mxu1  ;;  %v3793_v43 = vadd.f32 %v13305_v8, %v13815_v42 }
 0x49a   :  { %v7197_v44 = vadd.f32 1.0, %v10397_v12  ;;  %v5642_v11 = vmax.f32 %v5420_v49, 0.0  ;;  %v5423_v32 = vadd.f32 %v9236_v5, %v13028_v13  ;;  %v6352_v45 = vadd.f32 %v13374_v20, %v8906_v17  ;;  %v6346_v9 = vpop.f32.mrb[171].mxu1  ;;  %v13820_v49 = vld [vmem:[#allocation68_spill] sm:$0xff] }
 0x49b   :  { %10406 = vrcp.f32 %v7198_v62  ;;  %v6347_v0 = vadd.f32 %v13374_v20, %v6346_v9  ;;  %v3804_v5 = vadd.f32 %v13305_v8, %v13820_v49 }
 0x49c   :  { %10408 = vrcp.f32 %v7197_v44  ;;  %v5643_v21 = vmax.f32 %v5423_v32, 0.0  ;;  %v8421_v36 = vmul.f32 -1.442695, %v6352_v45  ;;  %8985 = vmatprep.mubr.msk.f32.mxu1 %vm5685_vm1, %v5642_v11 }
 0x49d   :  { %v10399_v16 = vpop.eup %10398  ;;  %v8420_v58 = vmul.f32 -1.442695, %v6347_v0  ;;  %v4882_v6 = vpop.f32.mrb[196].mxu0 }
 0x49e   :  { %v10401_v7 = vpop.eup %10400  ;;  %7580 = vst [vmem:[#allocation2 + $0x128] sm:$0xff] %v10399_v16  ;;  %10410 = vpow2.f32 %v8421_v36  ;;  %v9238_v13 = vadd.f32 %v4882_v6, %v3793_v43  ;;  %v4884_v47 = vpop.f32.mrb[197].mxu0  ;;  %8986 = vmatmul.mubr.msk.f32.gmra.mrb[224].mxu1 %vm5685_vm1, %v5643_v21 }
 0x49f   :  { %7579 = vst [vmem:[#allocation2 + $0x120] sm:$0xff] %v10401_v7  ;;  %10412 = vpow2.f32 %v8420_v58  ;;  %v4885_v18 = vpop.f32.mrb[198].mxu0 }
 0x4a0   :  { %v10403_v23 = vpop.eup %10402  ;;  %v5428_v46 = vadd.f32 %v9238_v13, %v13817_v27  ;;  %v9240_v50 = vadd.f32 %v4885_v18, %v3796_v19  ;;  %v4887_v35 = vpop.f32.mrb[199].mxu0  ;;  %v13822_v18 = vld [vmem:[#allocation70_spill] sm:$0xff] }
 0x4a1   :  { %v10405_v22 = vpop.eup %10404  ;;  %v7200_v30 = vadd.f32 1.0, %v10403_v23  ;;  %v8909_v3 = vpop.f32.mrb[172].mxu1  ;;  %v3812_v23 = vadd.f32 %v13305_v8, %v13822_v18  ;;  %v13828_v18 = vld [vmem:[#allocation74_spill] sm:$0xff] }
 0x4a2   :  { %v7199_v4 = vadd.f32 1.0, %v10405_v22  ;;  %v5644_v63 = vmax.f32 %v5428_v46, 0.0  ;;  %v5431_v15 = vadd.f32 %v9240_v50, %v13818_v59  ;;  %v6362_v56 = vadd.f32 %v13374_v20, %v8909_v3  ;;  %v6356_v28 = vpop.f32.mrb[173].mxu1  ;;  %v13823_v50 = vld [vmem:[#allocation11_spill] sm:$0xff] }
 0x4a3   :  { %10414 = vrcp.f32 %v7200_v30  ;;  %v6357_v57 = vadd.f32 %v13374_v20, %v6356_v28 }
 0x4a4   :  { %10416 = vrcp.f32 %v7199_v4  ;;  %v5645_v39 = vmax.f32 %v5431_v15, 0.0  ;;  %v8423_v60 = vmul.f32 -1.442695, %v6362_v56  ;;  %8988 = vmatprep.mubr.msk.f32.mxu1 %vm5685_vm1, %v5644_v63  ;;  %v13824_v56 = vld [vmem:[#allocation12_spill] sm:$0xff] }
 0x4a5   :  { %v10407_v55 = vpop.eup %10406  ;;  %v8422_v10 = vmul.f32 -1.442695, %v6357_v57  ;;  %v4890_v48 = vpop.f32.mrb[200].mxu0 }
 0x4a6   :  { %v10409_v31 = vpop.eup %10408  ;;  %7582 = vst [vmem:[#allocation2 + $0x138] sm:$0xff] %v10407_v55  ;;  %10418 = vpow2.f32 %v8423_v60  ;;  %v9242_v24 = vadd.f32 %v4890_v48, %v3801_v1  ;;  %v4892_v41 = vpop.f32.mrb[201].mxu0  ;;  %8989 = vmatmul.mubr.msk.f32.gmra.mrb[226].mxu1 %vm5685_vm1, %v5645_v39  ;;  %v13825_v55 = vld [vmem:[#allocation71_spill] sm:$0xff] }
 0x4a7   :  { %7581 = vst [vmem:[#allocation2 + $0x130] sm:$0xff] %v10409_v31  ;;  %10420 = vpow2.f32 %v8422_v10  ;;  %v4893_v26 = vpop.f32.mrb[202].mxu0  ;;  %v3817_v10 = vadd.f32 %v13305_v8, %v13825_v55  ;;  %v13831_v55 = vld [vmem:[#allocation75_spill] sm:$0xff] }
 0x4a8   :  { %v10411_v12 = vpop.eup %10410  ;;  %v5436_v62 = vadd.f32 %v9242_v24, %v13037_v61  ;;  %v9244_v17 = vadd.f32 %v4893_v26, %v3804_v5  ;;  %v4895_v44 = vpop.f32.mrb[203].mxu0  ;;  %v13821_v61 = vld [vmem:[#allocation69_spill] sm:$0xff]  ;;  %v13826_v26 = vld [vmem:[#allocation72_spill] sm:$0xff] }
 0x4a9   :  { %v10413_v11 = vpop.eup %10412  ;;  %v7202_v32 = vadd.f32 1.0, %v10411_v12  ;;  %v8912_v45 = vpop.f32.mrb[174].mxu1  ;;  %v3809_v6 = vadd.f32 %v13305_v8, %v13821_v61  ;;  %v3820_v12 = vadd.f32 %v13305_v8, %v13826_v26  ;;  %v13832_v26 = vld [vmem:[#allocation76_spill] sm:$0xff] }
 0x4aa   :  { %v7201_v9 = vadd.f32 1.0, %v10413_v11  ;;  %v5646_v0 = vmax.f32 %v5436_v62, 0.0  ;;  %v5439_v21 = vadd.f32 %v9244_v17, %v13050_v25  ;;  %v6372_v36 = vadd.f32 %v13374_v20, %v8912_v45  ;;  %v6366_v42 = vpop.f32.mrb[175].mxu1 }
 0x4ab   :  { %10422 = vrcp.f32 %v7202_v32  ;;  %v6367_v43 = vadd.f32 %v13374_v20, %v6366_v42 }
 0x4ac   :  { %10424 = vrcp.f32 %v7201_v9  ;;  %v5647_v16 = vmax.f32 %v5439_v21, 0.0  ;;  %v8425_v58 = vmul.f32 -1.442695, %v6372_v36  ;;  %8991 = vmatprep.mubr.msk.f32.mxu1 %vm5685_vm1, %v5646_v0 }
 0x4ad   :  { %v10415_v7 = vpop.eup %10414  ;;  %v8424_v13 = vmul.f32 -1.442695, %v6367_v43  ;;  %v4898_v47 = vpop.f32.mrb[204].mxu0 }
 0x4ae   :  { %v10417_v33 = vpop.eup %10416  ;;  %7584 = vst [vmem:[#allocation2 + $0x148] sm:$0xff] %v10415_v7  ;;  %10426 = vpow2.f32 %v8425_v58  ;;  %v9246_v25 = vadd.f32 %v4898_v47, %v3809_v6  ;;  %v4900_v19 = vpop.f32.mrb[205].mxu0  ;;  %8992 = vmatmul.mubr.msk.f32.gmra.mrb[228].mxu1 %vm5685_vm1, %v5647_v16 }
 0x4af   :  { %7583 = vst [vmem:[#allocation2 + $0x140] sm:$0xff] %v10417_v33  ;;  %10428 = vpow2.f32 %v8424_v13  ;;  %v4901_v27 = vpop.f32.mrb[206].mxu0 }
 0x4b0   :  { %v10419_v46 = vpop.eup %10418  ;;  %v5444_v35 = vadd.f32 %v9246_v25, %v13823_v50  ;;  %v9248_v22 = vadd.f32 %v4901_v27, %v3812_v23  ;;  %v4903_v30 = vpop.f32.mrb[207].mxu0  ;;  %v3828_v23 = vadd.f32 %v13305_v8, %v13828_v18  ;;  %v13829_v50 = vld [vmem:[#allocation13_spill] sm:$0xff] }
 0x4b1   :  { %v10421_v3 = vpop.eup %10420  ;;  %v7204_v4 = vadd.f32 1.0, %v10419_v46  ;;  %v8915_v63 = vpop.f32.mrb[176].mxu1 }
 0x4b2   :  { %v7203_v59 = vadd.f32 1.0, %v10421_v3  ;;  %v5648_v15 = vmax.f32 %v5444_v35, 0.0  ;;  %v5447_v28 = vadd.f32 %v9248_v22, %v13824_v56  ;;  %v6382_v57 = vadd.f32 %v13374_v20, %v8915_v63  ;;  %v6376_v39 = vpop.f32.mrb[177].mxu1  ;;  %v13830_v56 = vld [vmem:[#allocation14_spill] sm:$0xff] }
 0x4b3   :  { %10430 = vrcp.f32 %v7204_v4  ;;  %v6377_v60 = vadd.f32 %v13374_v20, %v6376_v39 }
 0x4b4   :  { %10432 = vrcp.f32 %v7203_v59  ;;  %v5649_v52 = vmax.f32 %v5447_v28, 0.0  ;;  %v8427_v1 = vmul.f32 -1.442695, %v6382_v57  ;;  %8994 = vmatprep.mubr.msk.f32.mxu1 %vm5685_vm1, %v5648_v15 }
 0x4b5   :  { %v10423_v48 = vpop.eup %10422  ;;  %v8426_v31 = vmul.f32 -1.442695, %v6377_v60  ;;  %v4906_v24 = vpop.f32.mrb[208].mxu0 }
 0x4b6   :  { %v10425_v41 = vpop.eup %10424  ;;  %7586 = vst [vmem:[#allocation2 + $0x158] sm:$0xff] %v10423_v48  ;;  %10434 = vpow2.f32 %v8427_v1  ;;  %v9250_v49 = vadd.f32 %v4906_v24, %v3817_v10  ;;  %v4908_v5 = vpop.f32.mrb[209].mxu0  ;;  %8995 = vmatmul.mubr.msk.f32.gmra.mrb[230].mxu1 %vm5685_vm1, %v5649_v52  ;;  %v3833_v10 = vadd.f32 %v13305_v8, %v13831_v55 }
 0x4b7   :  { %7585 = vst [vmem:[#allocation2 + $0x150] sm:$0xff] %v10425_v41  ;;  %10436 = vpow2.f32 %v8426_v31  ;;  %v4909_v62 = vpop.f32.mrb[210].mxu0 }
 0x4b8   :  { %v10427_v17 = vpop.eup %10426  ;;  %v5452_v44 = vadd.f32 %v9250_v49, %v13059_v54  ;;  %v9252_v11 = vadd.f32 %v4909_v62, %v3820_v12  ;;  %v4911_v32 = vpop.f32.mrb[211].mxu0  ;;  %v13827_v54 = vld [vmem:[#allocation73_spill] sm:$0xff]  ;;  %v3836_v12 = vadd.f32 %v13305_v8, %v13832_v26 }
 0x4b9   :  { %v10429_v45 = vpop.eup %10428  ;;  %v7206_v9 = vadd.f32 1.0, %v10427_v17  ;;  %v8918_v0 = vpop.f32.mrb[178].mxu1  ;;  %v3825_v7 = vadd.f32 %v13305_v8, %v13827_v54 }
 0x4ba   :  { %v7205_v21 = vadd.f32 1.0, %v10429_v45  ;;  %v5650_v36 = vmax.f32 %v5452_v44, 0.0  ;;  %v5455_v42 = vadd.f32 %v9252_v11, %v13072_v51  ;;  %v6392_v43 = vadd.f32 %v13374_v20, %v8918_v0  ;;  %v6386_v16 = vpop.f32.mrb[179].mxu1 }
 0x4bb   :  { %10438 = vrcp.f32 %v7206_v9  ;;  %v6387_v58 = vadd.f32 %v13374_v20, %v6386_v16 }
 0x4bc   :  { %10440 = vrcp.f32 %v7205_v21  ;;  %v5651_v61 = vmax.f32 %v5455_v42, 0.0  ;;  %v8429_v6 = vmul.f32 -1.442695, %v6392_v43  ;;  %8997 = vmatprep.mubr.msk.f32.mxu1 %vm5685_vm1, %v5650_v36 }
 0x4bd   :  { %v10431_v13 = vpop.eup %10430  ;;  %v8428_v47 = vmul.f32 -1.442695, %v6387_v58  ;;  %v4914_v33 = vpop.f32.mrb[212].mxu0 }
 0x4be   :  { %v10433_v25 = vpop.eup %10432  ;;  %7588 = vst [vmem:[#allocation2 + $0x168] sm:$0xff] %v10431_v13  ;;  %10442 = vpow2.f32 %v8429_v6  ;;  %v9254_v51 = vadd.f32 %v4914_v33, %v3825_v7  ;;  %v4916_v19 = vpop.f32.mrb[213].mxu0  ;;  %8998 = vmatmul.mubr.msk.f32.gmra.mrb[232].mxu1 %vm5685_vm1, %v5651_v61 }
 0x4bf   :  { %7587 = vst [vmem:[#allocation2 + $0x160] sm:$0xff] %v10433_v25  ;;  %10444 = vpow2.f32 %v8428_v47  ;;  %v4917_v27 = vpop.f32.mrb[214].mxu0  ;;  %v13834_v19 = vld [vmem:[#allocation78_spill] sm:$0xff] }
 0x4c0   :  { %v10435_v46 = vpop.eup %10434  ;;  %v5460_v35 = vadd.f32 %v9254_v51, %v13829_v50  ;;  %v9256_v22 = vadd.f32 %v4917_v27, %v3828_v23  ;;  %v4919_v30 = vpop.f32.mrb[215].mxu0  ;;  %v13475_v51 = vld [vmem:[%s13635_s2] ss:$0 sm:$0xff]  ;;  %v13835_v27 = vld [vmem:[#allocation15_spill] sm:$0xff] }
 0x4c1   :  { %v10437_v3 = vpop.eup %10436  ;;  %v7208_v4 = vadd.f32 1.0, %v10435_v46  ;;  %v8921_v63 = vpop.f32.mrb[180].mxu1  ;;  %v3844_v18 = vadd.f32 %v13475_v51, %v13834_v19  ;;  %v13841_v19 = vld [vmem:[#allocation17_spill] sm:$0xff] }
 0x4c2   :  { %v7207_v59 = vadd.f32 1.0, %v10437_v3  ;;  %v5652_v15 = vmax.f32 %v5460_v35, 0.0  ;;  %v5463_v28 = vadd.f32 %v9256_v22, %v13830_v56  ;;  %v6402_v57 = vadd.f32 %v13374_v20, %v8921_v63  ;;  %v6396_v39 = vpop.f32.mrb[181].mxu1 }
 0x4c3   :  { %10446 = vrcp.f32 %v7208_v4  ;;  %v6397_v60 = vadd.f32 %v13374_v20, %v6396_v39 }
 0x4c4   :  { %10448 = vrcp.f32 %v7207_v59  ;;  %v5653_v52 = vmax.f32 %v5463_v28, 0.0  ;;  %v8431_v1 = vmul.f32 -1.442695, %v6402_v57  ;;  %9000 = vmatprep.mubr.msk.f32.mxu1 %vm5685_vm1, %v5652_v15  ;;  %v13836_v59 = vld [vmem:[#allocation16_spill] sm:$0xff] }
 0x4c5   :  { %v10439_v48 = vpop.eup %10438  ;;  %v8430_v31 = vmul.f32 -1.442695, %v6397_v60  ;;  %v4922_v24 = vpop.f32.mrb[216].mxu0 }
 0x4c6   :  { %v10441_v41 = vpop.eup %10440  ;;  %7590 = vst [vmem:[#allocation2 + $0x178] sm:$0xff] %v10439_v48  ;;  %10450 = vpow2.f32 %v8431_v1  ;;  %v9258_v49 = vadd.f32 %v4922_v24, %v3833_v10  ;;  %v4924_v5 = vpop.f32.mrb[217].mxu0  ;;  %9001 = vmatmul.mubr.msk.f32.gmra.mrb[234].mxu1 %vm5685_vm1, %v5653_v52  ;;  %v13837_v52 = vld [vmem:[#allocation79_spill] sm:$0xff] }
 0x4c7   :  { %7589 = vst [vmem:[#allocation2 + $0x170] sm:$0xff] %v10441_v41  ;;  %10452 = vpow2.f32 %v8430_v31  ;;  %v4925_v62 = vpop.f32.mrb[218].mxu0  ;;  %v3849_v1 = vadd.f32 %v13475_v51, %v13837_v52 }
 0x4c8   :  { %v10443_v17 = vpop.eup %10442  ;;  %v5468_v44 = vadd.f32 %v9258_v49, %v13081_v40  ;;  %v9260_v11 = vadd.f32 %v4925_v62, %v3836_v12  ;;  %v4927_v32 = vpop.f32.mrb[219].mxu0  ;;  %v13833_v40 = vld [vmem:[#allocation77_spill] sm:$0xff]  ;;  %v13838_v49 = vld [vmem:[#allocation80_spill] sm:$0xff] }
 0x4c9   :  { %v10445_v45 = vpop.eup %10444  ;;  %v7210_v9 = vadd.f32 1.0, %v10443_v17  ;;  %v8924_v0 = vpop.f32.mrb[182].mxu1  ;;  %v3841_v54 = vadd.f32 %v13305_v8, %v13833_v40  ;;  %v3852_v5 = vadd.f32 %v13475_v51, %v13838_v49 }
 0x4ca   :  { %v7209_v21 = vadd.f32 1.0, %v10445_v45  ;;  %v5654_v36 = vmax.f32 %v5468_v44, 0.0  ;;  %v5471_v42 = vadd.f32 %v9260_v11, %v13094_v2  ;;  %v6412_v43 = vadd.f32 %v13374_v20, %v8924_v0  ;;  %v6406_v16 = vpop.f32.mrb[183].mxu1 }
 0x4cb   :  { %10454 = vrcp.f32 %v7210_v9  ;;  %v6407_v58 = vadd.f32 %v13374_v20, %v6406_v16 }
 0x4cc   :  { %10456 = vrcp.f32 %v7209_v21  ;;  %v5655_v61 = vmax.f32 %v5471_v42, 0.0  ;;  %v8433_v6 = vmul.f32 -1.442695, %v6412_v43  ;;  %9003 = vmatprep.mubr.msk.f32.mxu1 %vm5685_vm1, %v5654_v36 }
 0x4cd   :  { %v10447_v7 = vpop.eup %10446  ;;  %v8432_v13 = vmul.f32 -1.442695, %v6407_v58  ;;  %v4930_v47 = vpop.f32.mrb[220].mxu0 }
 0x4ce   :  { %v10449_v33 = vpop.eup %10448  ;;  %7592 = vst [vmem:[#allocation2 + $0x188] sm:$0xff] %v10447_v7  ;;  %10458 = vpow2.f32 %v8433_v6  ;;  %v9262_v2 = vadd.f32 %v4930_v47, %v3841_v54  ;;  %v4932_v25 = vpop.f32.mrb[221].mxu0  ;;  %9004 = vmatmul.mubr.msk.f32.gmra.mrb[236].mxu1 %vm5685_vm1, %v5655_v61  ;;  %v13840_v47 = vld [vmem:[#allocation82_spill] sm:$0xff] }
 0x4cf   :  { %7591 = vst [vmem:[#allocation2 + $0x180] sm:$0xff] %v10449_v33  ;;  %10460 = vpow2.f32 %v8432_v13  ;;  %v4933_v8 = vpop.f32.mrb[222].mxu0  ;;  %v3860_v33 = vadd.f32 %v13475_v51, %v13840_v47 }
 0x4d0   :  { %v10451_v23 = vpop.eup %10450  ;;  %v5476_v46 = vadd.f32 %v9262_v2, %v13835_v27  ;;  %v9264_v50 = vadd.f32 %v4933_v8, %v3844_v18  ;;  %v4935_v35 = vpop.f32.mrb[223].mxu0 }
 0x4d1   :  { %v10453_v22 = vpop.eup %10452  ;;  %v7212_v30 = vadd.f32 1.0, %v10451_v23  ;;  %v8927_v3 = vpop.f32.mrb[184].mxu1 }
 0x4d2   :  { %v7211_v4 = vadd.f32 1.0, %v10453_v22  ;;  %v5656_v63 = vmax.f32 %v5476_v46, 0.0  ;;  %v5479_v15 = vadd.f32 %v9264_v50, %v13836_v59  ;;  %v6422_v56 = vadd.f32 %v13374_v20, %v8927_v3  ;;  %v6416_v28 = vpop.f32.mrb[185].mxu1 }
 0x4d3   :  { %10462 = vrcp.f32 %v7212_v30  ;;  %v6417_v57 = vadd.f32 %v13374_v20, %v6416_v28  ;;  %v13842_v30 = vld [vmem:[#allocation18_spill] sm:$0xff]  ;;  %v13843_v28 = vld [vmem:[#allocation83_spill] sm:$0xff] }
 0x4d4   :  { %10464 = vrcp.f32 %v7211_v4  ;;  %v5657_v39 = vmax.f32 %v5479_v15, 0.0  ;;  %v8435_v60 = vmul.f32 -1.442695, %v6422_v56  ;;  %9006 = vmatprep.mubr.msk.f32.mxu1 %vm5685_vm1, %v5656_v63 }
 0x4d5   :  { %v10455_v55 = vpop.eup %10454  ;;  %v8434_v10 = vmul.f32 -1.442695, %v6417_v57  ;;  %v4938_v48 = vpop.f32.mrb[224].mxu0  ;;  %v3865_v57 = vadd.f32 %v13475_v51, %v13843_v28 }
 0x4d6   :  { %v10457_v31 = vpop.eup %10456  ;;  %7594 = vst [vmem:[#allocation2 + $0x198] sm:$0xff] %v10455_v55  ;;  %10466 = vpow2.f32 %v8435_v60  ;;  %v9266_v24 = vadd.f32 %v4938_v48, %v3849_v1  ;;  %v4940_v41 = vpop.f32.mrb[225].mxu0  ;;  %9007 = vmatmul.mubr.msk.f32.gmra.mrb[238].mxu1 %vm5685_vm1, %v5657_v39  ;;  %v13844_v48 = vld [vmem:[#allocation84_spill] sm:$0xff] }
 0x4d7   :  { %7593 = vst [vmem:[#allocation2 + $0x190] sm:$0xff] %v10457_v31  ;;  %10468 = vpow2.f32 %v8434_v10  ;;  %v4941_v26 = vpop.f32.mrb[226].mxu0  ;;  %v3868_v31 = vadd.f32 %v13475_v51, %v13844_v48 }
 0x4d8   :  { %v10459_v12 = vpop.eup %10458  ;;  %v5484_v62 = vadd.f32 %v9266_v24, %v13103_v53  ;;  %v9268_v17 = vadd.f32 %v4941_v26, %v3852_v5  ;;  %v4943_v44 = vpop.f32.mrb[227].mxu0  ;;  %v13839_v53 = vld [vmem:[#allocation81_spill] sm:$0xff] }
 0x4d9   :  { %v10461_v11 = vpop.eup %10460  ;;  %v7214_v32 = vadd.f32 1.0, %v10459_v12  ;;  %v8930_v45 = vpop.f32.mrb[186].mxu1  ;;  %v3857_v61 = vadd.f32 %v13475_v51, %v13839_v53 }
 0x4da   :  { %v7213_v9 = vadd.f32 1.0, %v10461_v11  ;;  %v5658_v0 = vmax.f32 %v5484_v62, 0.0  ;;  %v5487_v21 = vadd.f32 %v9268_v17, %v13116_v38  ;;  %v6432_v36 = vadd.f32 %v13374_v20, %v8930_v45  ;;  %v6426_v42 = vpop.f32.mrb[187].mxu1 }
 0x4db   :  { %10470 = vrcp.f32 %v7214_v32  ;;  %v6427_v43 = vadd.f32 %v13374_v20, %v6426_v42 }
 0x4dc   :  { %10472 = vrcp.f32 %v7213_v9  ;;  %v5659_v16 = vmax.f32 %v5487_v21, 0.0  ;;  %v8437_v58 = vmul.f32 -1.442695, %v6432_v36  ;;  %9009 = vmatprep.mubr.msk.f32.mxu1 %vm5685_vm1, %v5658_v0 }
 0x4dd   :  { %v10463_v6 = vpop.eup %10462  ;;  %v8436_v40 = vmul.f32 -1.442695, %v6427_v43  ;;  %v4946_v54 = vpop.f32.mrb[228].mxu0 }
 0x4de   :  { %v10465_v7 = vpop.eup %10464  ;;  %7596 = vst [vmem:[#allocation2 + $0x1a8] sm:$0xff] %v10463_v6  ;;  %10474 = vpow2.f32 %v8437_v58  ;;  %v9270_v38 = vadd.f32 %v4946_v54, %v3857_v61  ;;  %v4948_v13 = vpop.f32.mrb[229].mxu0  ;;  %9010 = vmatmul.mubr.msk.f32.gmra.mrb[240].mxu1 %vm5685_vm1, %v5659_v16  ;;  %v13846_v6 = vld [vmem:[#allocation86_spill] sm:$0xff] }
 0x4df   :  { %7595 = vst [vmem:[#allocation2 + $0x1a0] sm:$0xff] %v10465_v7  ;;  %10476 = vpow2.f32 %v8436_v40  ;;  %v4949_v2 = vpop.f32.mrb[230].mxu0  ;;  %v3876_v40 = vadd.f32 %v13475_v51, %v13846_v6 }
 0x4e0   :  { %v10467_v25 = vpop.eup %10466  ;;  %v5492_v18 = vadd.f32 %v9270_v38, %v13841_v19  ;;  %v9272_v8 = vadd.f32 %v4949_v2, %v3860_v33  ;;  %v4951_v23 = vpop.f32.mrb[231].mxu0  ;;  %v13847_v38 = vld [vmem:[#allocation19_spill] sm:$0xff] }
 0x4e1   :  { %v10469_v27 = vpop.eup %10468  ;;  %v7216_v46 = vadd.f32 1.0, %v10467_v25  ;;  %v8933_v50 = vpop.f32.mrb[188].mxu1  ;;  %v13848_v23 = vld [vmem:[#allocation20_spill] sm:$0xff] }
 0x4e2   :  { %v7215_v35 = vadd.f32 1.0, %v10469_v27  ;;  %v5660_v22 = vmax.f32 %v5492_v18, 0.0  ;;  %v5495_v3 = vadd.f32 %v9272_v8, %v13842_v30  ;;  %v6442_v4 = vadd.f32 %v13374_v20, %v8933_v50  ;;  %v6436_v63 = vpop.f32.mrb[189].mxu1 }
 0x4e3   :  { %10478 = vrcp.f32 %v7216_v46  ;;  %v6437_v59 = vadd.f32 %v13374_v20, %v6436_v63 }
 0x4e4   :  { %10480 = vrcp.f32 %v7215_v35  ;;  %v5661_v15 = vmax.f32 %v5495_v3, 0.0  ;;  %v8439_v56 = vmul.f32 -1.442695, %v6442_v4  ;;  %9012 = vmatprep.mubr.msk.f32.mxu1 %vm5685_vm1, %v5660_v22  ;;  %v13849_v3 = vld [vmem:[#allocation87_spill] sm:$0xff] }
 0x4e5   :  { %v10471_v39 = vpop.eup %10470  ;;  %v8438_v60 = vmul.f32 -1.442695, %v6437_v59  ;;  %v4954_v52 = vpop.f32.mrb[232].mxu0  ;;  %v3881_v4 = vadd.f32 %v13475_v51, %v13849_v3  ;;  %v13856_v3 = vld [vmem:[#allocation92_spill] sm:$0xff] }
 0x4e6   :  { %v10473_v1 = vpop.eup %10472  ;;  %7598 = vst [vmem:[#allocation2 + $0x1b8] sm:$0xff] %v10471_v39  ;;  %10482 = vpow2.f32 %v8439_v56  ;;  %v9274_v55 = vadd.f32 %v4954_v52, %v3865_v57  ;;  %v4956_v10 = vpop.f32.mrb[233].mxu0  ;;  %9013 = vmatmul.mubr.msk.f32.gmra.mrb[242].mxu1 %vm5685_vm1, %v5661_v15  ;;  %v13850_v39 = vld [vmem:[#allocation88_spill] sm:$0xff] }
 0x4e7   :  { %7597 = vst [vmem:[#allocation2 + $0x1b0] sm:$0xff] %v10473_v1  ;;  %10484 = vpow2.f32 %v8438_v60  ;;  %v4957_v24 = vpop.f32.mrb[234].mxu0  ;;  %v3884_v60 = vadd.f32 %v13475_v51, %v13850_v39 }
 0x4e8   :  { %v10475_v41 = vpop.eup %10474  ;;  %v5500_v49 = vadd.f32 %v9274_v55, %v13125_v14  ;;  %v9276_v5 = vadd.f32 %v4957_v24, %v3868_v31  ;;  %v4959_v26 = vpop.f32.mrb[235].mxu0  ;;  %v13845_v14 = vld [vmem:[#allocation85_spill] sm:$0xff] }
 0x4e9   :  { %v10477_v12 = vpop.eup %10476  ;;  %v7218_v62 = vadd.f32 1.0, %v10475_v41  ;;  %v8936_v17 = vpop.f32.mrb[190].mxu1  ;;  %v3873_v42 = vadd.f32 %v13475_v51, %v13845_v14  ;;  %v13852_v14 = vld [vmem:[#allocation90_spill] sm:$0xff] }
 0x4ea   :  { %v7217_v44 = vadd.f32 1.0, %v10477_v12  ;;  %v5662_v11 = vmax.f32 %v5500_v49, 0.0  ;;  %v5503_v32 = vadd.f32 %v9276_v5, %v13138_v34  ;;  %v6452_v45 = vadd.f32 %v13374_v20, %v8936_v17  ;;  %v6446_v9 = vpop.f32.mrb[191].mxu1 }
 0x4eb   :  { %10486 = vrcp.f32 %v7218_v62  ;;  %v6447_v0 = vadd.f32 %v13374_v20, %v6446_v9 }
 0x4ec   :  { %10488 = vrcp.f32 %v7217_v44  ;;  %v5663_v21 = vmax.f32 %v5503_v32, 0.0  ;;  %v8441_v36 = vmul.f32 -1.442695, %v6452_v45  ;;  %9015 = vmatprep.mubr.msk.f32.mxu1 %vm5685_vm1, %v5662_v11 }
 0x4ed   :  { %v10479_v43 = vpop.eup %10478  ;;  %v8440_v16 = vmul.f32 -1.442695, %v6447_v0  ;;  %v4962_v58 = vpop.f32.mrb[236].mxu0 }
 0x4ee   :  { %v10481_v53 = vpop.eup %10480  ;;  %7600 = vst [vmem:[#allocation2 + $0x1c8] sm:$0xff] %v10479_v43  ;;  %10490 = vpow2.f32 %v8441_v36  ;;  %v9278_v34 = vadd.f32 %v4962_v58, %v3873_v42  ;;  %v4964_v61 = vpop.f32.mrb[237].mxu0  ;;  %9016 = vmatmul.mubr.msk.f32.gmra.mrb[244].mxu1 %vm5685_vm1, %v5663_v21 }
 0x4ef   :  { %7599 = vst [vmem:[#allocation2 + $0x1c0] sm:$0xff] %v10481_v53  ;;  %10492 = vpow2.f32 %v8440_v16  ;;  %v4965_v54 = vpop.f32.mrb[238].mxu0  ;;  %v13853_v16 = vld [vmem:[#allocation21_spill] sm:$0xff] }
 0x4f0   :  { %v10483_v7 = vpop.eup %10482  ;;  %v5508_v13 = vadd.f32 %v9278_v34, %v13847_v38  ;;  %v9280_v47 = vadd.f32 %v4965_v54, %v3876_v40  ;;  %v4967_v33 = vpop.f32.mrb[239].mxu0 }
 0x4f1   :  { %v10485_v2 = vpop.eup %10484  ;;  %v7220_v25 = vadd.f32 1.0, %v10483_v7  ;;  %v8939_v19 = vpop.f32.mrb[192].mxu1  ;;  %v13854_v7 = vld [vmem:[#allocation22_spill] sm:$0xff] }
 0x4f2   :  { %v7219_v18 = vadd.f32 1.0, %v10485_v2  ;;  %v5664_v8 = vmax.f32 %v5508_v13, 0.0  ;;  %v5511_v27 = vadd.f32 %v9280_v47, %v13848_v23  ;;  %v6462_v46 = vadd.f32 %v13374_v20, %v8939_v19  ;;  %v6456_v50 = vpop.f32.mrb[193].mxu1  ;;  %v13544_v47 = vld [vmem:[%s13637_s4] ss:$0 sm:$0xff] }
 0x4f3   :  { %10494 = vrcp.f32 %v7220_v25  ;;  %v6457_v35 = vadd.f32 %v13374_v20, %v6456_v50 }
 0x4f4   :  { %10496 = vrcp.f32 %v7219_v18  ;;  %v5665_v22 = vmax.f32 %v5511_v27, 0.0  ;;  %v8443_v30 = vmul.f32 -1.442695, %v6462_v46  ;;  %9018 = vmatprep.mubr.msk.f32.mxu1 %vm5685_vm1, %v5664_v8  ;;  %v13855_v18 = vld [vmem:[#allocation91_spill] sm:$0xff] }
 0x4f5   :  { %v10487_v63 = vpop.eup %10486  ;;  %v8442_v59 = vmul.f32 -1.442695, %v6457_v35  ;;  %v4970_v15 = vpop.f32.mrb[240].mxu0  ;;  %v3897_v8 = vadd.f32 %v13475_v51, %v13855_v18 }
 0x4f6   :  { %v10489_v56 = vpop.eup %10488  ;;  %7602 = vst [vmem:[#allocation2 + $0x1d8] sm:$0xff] %v10487_v63  ;;  %10498 = vpow2.f32 %v8443_v30  ;;  %v9282_v28 = vadd.f32 %v4970_v15, %v3881_v4  ;;  %v4972_v57 = vpop.f32.mrb[241].mxu0  ;;  %9019 = vmatmul.mubr.msk.f32.gmra.mrb[246].mxu1 %vm5685_vm1, %v5665_v22  ;;  %v3900_v4 = vadd.f32 %v13475_v51, %v13856_v3  ;;  %v13857_v15 = vld [vmem:[#allocation24_spill] sm:$0xff] }
 0x4f7   :  { %7601 = vst [vmem:[#allocation2 + $0x1d0] sm:$0xff] %v10489_v56  ;;  %10500 = vpow2.f32 %v8442_v59  ;;  %v4973_v52 = vpop.f32.mrb[242].mxu0 }
 0x4f8   :  { %v10491_v1 = vpop.eup %10490  ;;  %v5516_v55 = vadd.f32 %v9282_v28, %v13147_v37  ;;  %v9284_v10 = vadd.f32 %v4973_v52, %v3884_v60  ;;  %v4975_v48 = vpop.f32.mrb[243].mxu0  ;;  %v13851_v37 = vld [vmem:[#allocation89_spill] sm:$0xff] }
 0x4f9   :  { %v10493_v31 = vpop.eup %10492  ;;  %v7222_v24 = vadd.f32 1.0, %v10491_v1  ;;  %v8942_v41 = vpop.f32.mrb[194].mxu1  ;;  %v3889_v32 = vadd.f32 %v13475_v51, %v13851_v37 }
 0x4fa   :  { %v7221_v49 = vadd.f32 1.0, %v10493_v31  ;;  %v5666_v5 = vmax.f32 %v5516_v55, 0.0  ;;  %v5519_v26 = vadd.f32 %v9284_v10, %v13157_v29  ;;  %v6472_v12 = vadd.f32 %v13374_v20, %v8942_v41  ;;  %v6466_v62 = vpop.f32.mrb[195].mxu1  ;;  %v13858_v55 = vld [vmem:[#allocation26_spill] sm:$0xff] }
 0x4fb   :  { %10502 = vrcp.f32 %v7222_v24  ;;  %v6467_v17 = vadd.f32 %v13374_v20, %v6466_v62  ;;  %v3892_v20 = vadd.f32 %v13475_v51, %v13852_v14 }
 0x4fc   :  { %10504 = vrcp.f32 %v7221_v49  ;;  %v5667_v44 = vmax.f32 %v5519_v26, 0.0  ;;  %v8445_v11 = vmul.f32 -1.442695, %v6472_v12  ;;  %9021 = vmatprep.mubr.msk.f32.mxu1 %vm5685_vm1, %v5666_v5  ;;  %v13859_v5 = vld [vmem:[#allocation93_spill] sm:$0xff] }
 0x4fd   :  { %v10495_v45 = vpop.eup %10494  ;;  %v8444_v9 = vmul.f32 -1.442695, %v6467_v17  ;;  %v4978_v0 = vpop.f32.mrb[244].mxu0  ;;  %v3905_v26 = vadd.f32 %v13475_v51, %v13859_v5 }
 0x4fe   :  { %v10497_v21 = vpop.eup %10496  ;;  %7604 = vst [vmem:[#allocation2 + $0x1e8] sm:$0xff] %v10495_v45  ;;  %10506 = vpow2.f32 %v8445_v11  ;;  %v9286_v29 = vadd.f32 %v4978_v0, %v3889_v32  ;;  %v4980_v36 = vpop.f32.mrb[245].mxu0  ;;  %9022 = vmatmul.mubr.msk.f32.gmra.mrb[248].mxu1 %vm5685_vm1, %v5667_v44  ;;  %v13860_v45 = vld [vmem:[#allocation94_spill] sm:$0xff] }
 0x4ff   :  { %7603 = vst [vmem:[#allocation2 + $0x1e0] sm:$0xff] %v10497_v21  ;;  %10508 = vpow2.f32 %v8444_v9  ;;  %v4981_v42 = vpop.f32.mrb[246].mxu0  ;;  %v3908_v9 = vadd.f32 %v13475_v51, %v13860_v45  ;;  %v13861_v21 = vld [vmem:[#allocation23_spill] sm:$0xff] }
 0x500   :  { %v10499_v43 = vpop.eup %10498  ;;  %v5524_v58 = vadd.f32 %v9286_v29, %v13853_v16  ;;  %v9288_v53 = vadd.f32 %v4981_v42, %v3892_v20  ;;  %v4983_v34 = vpop.f32.mrb[247].mxu0 }
 0x501   :  { %v10501_v61 = vpop.eup %10500  ;;  %v7224_v6 = vadd.f32 1.0, %v10499_v43 }
 0x502   :  { %v7223_v40 = vadd.f32 1.0, %v10501_v61  ;;  %v5668_v54 = vmax.f32 %v5524_v58, 0.0  ;;  %v5527_v38 = vadd.f32 %v9288_v53, %v13854_v7  ;;  %v8945_v13 = vpop.f32.mrb[196].mxu1  ;;  %v13862_v58 = vld [vmem:[#allocation25_spill] sm:$0xff] }
 0x503   :  { %10510 = vrcp.f32 %v7224_v6  ;;  %v6482_v33 = vadd.f32 %v13544_v47, %v8945_v13  ;;  %v6476_v2 = vpop.f32.mrb[197].mxu1 }
 0x504   :  { %10512 = vrcp.f32 %v7223_v40  ;;  %v5669_v25 = vmax.f32 %v5527_v38, 0.0  ;;  %v6477_v19 = vadd.f32 %v13544_v47, %v6476_v2  ;;  %9024 = vmatprep.mubr.msk.f32.mxu1 %vm5685_vm1, %v5668_v54 }
 0x505   :  { %v10503_v23 = vpop.eup %10502  ;;  %v8447_v27 = vmul.f32 -1.442695, %v6482_v33  ;;  %v4986_v46 = vpop.f32.mrb[248].mxu0 }
 0x506   :  { %v10505_v50 = vpop.eup %10504  ;;  %7606 = vst [vmem:[#allocation2 + $0x1f8] sm:$0xff] %v10503_v23  ;;  %v8446_v35 = vmul.f32 -1.442695, %v6477_v19  ;;  %v9290_v22 = vadd.f32 %v4986_v46, %v3897_v8  ;;  %v4988_v30 = vpop.f32.mrb[249].mxu0  ;;  %9025 = vmatmul.mubr.msk.f32.gmra.mrb[250].mxu1 %vm5685_vm1, %v5669_v25 }
 0x507   :  { %7605 = vst [vmem:[#allocation2 + $0x1f0] sm:$0xff] %v10505_v50  ;;  %10514 = vpow2.f32 %v8447_v27  ;;  %v4989_v63 = vpop.f32.mrb[250].mxu0 }
 0x508   :  { %v10507_v59 = vpop.eup %10506  ;;  %10516 = vpow2.f32 %v8446_v35  ;;  %v5532_v56 = vadd.f32 %v9290_v22, %v13857_v15  ;;  %v9292_v28 = vadd.f32 %v4989_v63, %v3900_v4  ;;  %v4991_v57 = vpop.f32.mrb[251].mxu0 }
 0x509   :  { %v10509_v39 = vpop.eup %10508  ;;  %v7226_v60 = vadd.f32 1.0, %v10507_v59 }
 0x50a   :  { %v7225_v52 = vadd.f32 1.0, %v10509_v39  ;;  %v5670_v1 = vmax.f32 %v5532_v56, 0.0  ;;  %v5535_v10 = vadd.f32 %v9292_v28, %v13858_v55  ;;  %v8948_v48 = vpop.f32.mrb[198].mxu1 }
 0x50b   :  { %10518 = vrcp.f32 %v7226_v60  ;;  %v6492_v31 = vadd.f32 %v13544_v47, %v8948_v48  ;;  %v6486_v24 = vpop.f32.mrb[199].mxu1 }
 0x50c   :  { %10520 = vrcp.f32 %v7225_v52  ;;  %v5671_v41 = vmax.f32 %v5535_v10, 0.0  ;;  %v6487_v49 = vadd.f32 %v13544_v47, %v6486_v24  ;;  %9027 = vmatprep.mubr.msk.f32.mxu1 %vm5685_vm1, %v5670_v1 }
 0x50d   :  { %v10511_v12 = vpop.eup %10510  ;;  %v8449_v62 = vmul.f32 -1.442695, %v6492_v31  ;;  %v4994_v17 = vpop.f32.mrb[252].mxu0 }
 0x50e   :  { %v10513_v44 = vpop.eup %10512  ;;  %7608 = vst [vmem:[#allocation2 + $0x208] sm:$0xff] %v10511_v12  ;;  %v8448_v11 = vmul.f32 -1.442695, %v6487_v49  ;;  %v9294_v37 = vadd.f32 %v4994_v17, %v3905_v26  ;;  %v4996_v32 = vpop.f32.mrb[253].mxu0  ;;  %9028 = vmatmul.mubr.msk.f32.gmra.mrb[252].mxu1 %vm5685_vm1, %v5671_v41 }
 0x50f   :  { %7607 = vst [vmem:[#allocation2 + $0x200] sm:$0xff] %v10513_v44  ;;  %10522 = vpow2.f32 %v8449_v62  ;;  %v4997_v0 = vpop.f32.mrb[254].mxu0 }
 0x510   :  { %10524 = vpow2.f32 %v8448_v11  ;;  %v5540_v29 = vadd.f32 %v9294_v37, %v13861_v21  ;;  %v9296_v36 = vadd.f32 %v4997_v0, %v3908_v9  ;;  %v4999_v14 = vpop.f32.mrb[255].mxu0 }
 0x511   :  { %v10515_v20 = vpop.eup %10514 }
 0x512   :  { %v10517_v42 = vpop.eup %10516  ;;  %v7228_v43 = vadd.f32 1.0, %v10515_v20  ;;  %v5672_v16 = vmax.f32 %v5540_v29, 0.0  ;;  %v5543_v53 = vadd.f32 %v9296_v36, %v13862_v58  ;;  %v8951_v34 = vpop.f32.mrb[200].mxu1 }
 0x513   :  { %v7227_v61 = vadd.f32 1.0, %v10517_v42  ;;  %v6502_v6 = vadd.f32 %v13544_v47, %v8951_v34  ;;  %v6496_v40 = vpop.f32.mrb[201].mxu1 }
 0x514   :  { %10526 = vrcp.f32 %v7228_v43  ;;  %v5673_v51 = vmax.f32 %v5543_v53, 0.0  ;;  %v6497_v54 = vadd.f32 %v13544_v47, %v6496_v40  ;;  %9030 = vmatprep.mubr.msk.f32.mxu1 %vm5685_vm1, %v5672_v16 }
 0x515   :  { %v10519_v7 = vpop.eup %10518  ;;  %10528 = vrcp.f32 %v7227_v61  ;;  %v8451_v38 = vmul.f32 -1.442695, %v6502_v6 }
 0x516   :  { %v10521_v13 = vpop.eup %10520  ;;  %7610 = vst [vmem:[#allocation2 + $0x218] sm:$0xff] %v10519_v7  ;;  %v8450_v33 = vmul.f32 -1.442695, %v6497_v54  ;;  %9031 = vmatmul.mubr.msk.f32.gmra.mrb[254].mxu1 %vm5685_vm1, %v5673_v51 }
 0x517   :  { %7609 = vst [vmem:[#allocation2 + $0x210] sm:$0xff] %v10521_v13  ;;  %10530 = vpow2.f32 %v8451_v38 }
 0x518   :  { %10532 = vpow2.f32 %v8450_v33 }
 0x519   :  { %v10523_v2 = vpop.eup %10522  ;;  %v8954_v25 = vpop.f32.mrb[202].mxu1 }
 0x51a   :  { %v10525_v19 = vpop.eup %10524  ;;  %v7230_v18 = vadd.f32 1.0, %v10523_v2  ;;  %v6512_v8 = vadd.f32 %v13544_v47, %v8954_v25  ;;  %v6506_v23 = vpop.f32.mrb[203].mxu1 }
 0x51b   :  { %v7229_v27 = vadd.f32 1.0, %v10525_v19  ;;  %v6507_v46 = vadd.f32 %v13544_v47, %v6506_v23 }
 0x51c   :  { %10534 = vrcp.f32 %v7230_v18  ;;  %v8453_v50 = vmul.f32 -1.442695, %v6512_v8 }
 0x51d   :  { %10536 = vrcp.f32 %v7229_v27  ;;  %v8452_v35 = vmul.f32 -1.442695, %v6507_v46 }
 0x51e   :  { %v10527_v22 = vpop.eup %10526  ;;  %10538 = vpow2.f32 %v8453_v50 }
 0x51f   :  { %v10529_v30 = vpop.eup %10528  ;;  %7612 = vst [vmem:[#allocation2 + $0x228] sm:$0xff] %v10527_v22  ;;  %10540 = vpow2.f32 %v8452_v35 }
 0x520   :  { %7611 = vst [vmem:[#allocation2 + $0x220] sm:$0xff] %v10529_v30 }
 0x521   :  { %v10531_v3 = vpop.eup %10530  ;;  %v8957_v4 = vpop.f32.mrb[204].mxu1 }
 0x522   :  { %v10533_v63 = vpop.eup %10532  ;;  %v7232_v59 = vadd.f32 1.0, %v10531_v3  ;;  %v6522_v15 = vadd.f32 %v13544_v47, %v8957_v4  ;;  %v6516_v56 = vpop.f32.mrb[205].mxu1 }
 0x523   :  { %v7231_v28 = vadd.f32 1.0, %v10533_v63  ;;  %v6517_v57 = vadd.f32 %v13544_v47, %v6516_v56 }
 0x524   :  { %10542 = vrcp.f32 %v7232_v59  ;;  %v8455_v39 = vmul.f32 -1.442695, %v6522_v15 }
 0x525   :  { %10544 = vrcp.f32 %v7231_v28  ;;  %v8454_v60 = vmul.f32 -1.442695, %v6517_v57 }
 0x526   :  { %v10535_v52 = vpop.eup %10534  ;;  %10546 = vpow2.f32 %v8455_v39 }
 0x527   :  { %v10537_v1 = vpop.eup %10536  ;;  %7614 = vst [vmem:[#allocation2 + $0x238] sm:$0xff] %v10535_v52  ;;  %10548 = vpow2.f32 %v8454_v60 }
 0x528   :  { %v10539_v55 = vpop.eup %10538  ;;  %7613 = vst [vmem:[#allocation2 + $0x230] sm:$0xff] %v10537_v1 }
 0x529   :  { %v10541_v10 = vpop.eup %10540  ;;  %v7234_v48 = vadd.f32 1.0, %v10539_v55  ;;  %v8960_v31 = vpop.f32.mrb[206].mxu1 }
 0x52a   :  { %v7233_v24 = vadd.f32 1.0, %v10541_v10  ;;  %v6532_v41 = vadd.f32 %v13544_v47, %v8960_v31  ;;  %v6526_v49 = vpop.f32.mrb[207].mxu1 }
 0x52b   :  { %10550 = vrcp.f32 %v7234_v48  ;;  %v6527_v5 = vadd.f32 %v13544_v47, %v6526_v49 }
 0x52c   :  { %10552 = vrcp.f32 %v7233_v24  ;;  %v8457_v26 = vmul.f32 -1.442695, %v6532_v41 }
 0x52d   :  { %v8456_v12 = vmul.f32 -1.442695, %v6527_v5 }
 0x52e   :  { %v10543_v62 = vpop.eup %10542  ;;  %10554 = vpow2.f32 %v8457_v26 }
 0x52f   :  { %v10545_v17 = vpop.eup %10544  ;;  %7616 = vst [vmem:[#allocation2 + $0x248] sm:$0xff] %v10543_v62  ;;  %10556 = vpow2.f32 %v8456_v12 }
 0x530   :  { %v10547_v44 = vpop.eup %10546  ;;  %7615 = vst [vmem:[#allocation2 + $0x240] sm:$0xff] %v10545_v17 }
 0x531   :  { %v10549_v11 = vpop.eup %10548  ;;  %v7236_v37 = vadd.f32 1.0, %v10547_v44  ;;  %v8963_v32 = vpop.f32.mrb[208].mxu1 }
 0x532   :  { %v7235_v45 = vadd.f32 1.0, %v10549_v11  ;;  %v6542_v9 = vadd.f32 %v13544_v47, %v8963_v32  ;;  %v6536_v0 = vpop.f32.mrb[209].mxu1 }
 0x533   :  { %10558 = vrcp.f32 %v7236_v37  ;;  %v6537_v21 = vadd.f32 %v13544_v47, %v6536_v0 }
 0x534   :  { %10560 = vrcp.f32 %v7235_v45  ;;  %v8459_v29 = vmul.f32 -1.442695, %v6542_v9 }
 0x535   :  { %v10551_v36 = vpop.eup %10550  ;;  %v8458_v14 = vmul.f32 -1.442695, %v6537_v21 }
 0x536   :  { %v10553_v20 = vpop.eup %10552  ;;  %7618 = vst [vmem:[#allocation2 + $0x258] sm:$0xff] %v10551_v36  ;;  %10562 = vpow2.f32 %v8459_v29 }
 0x537   :  { %7617 = vst [vmem:[#allocation2 + $0x250] sm:$0xff] %v10553_v20  ;;  %10564 = vpow2.f32 %v8458_v14 }
 0x538   :  { %v10555_v42 = vpop.eup %10554 }
 0x539   :  { %v10557_v43 = vpop.eup %10556  ;;  %v7238_v16 = vadd.f32 1.0, %v10555_v42  ;;  %v8966_v58 = vpop.f32.mrb[210].mxu1 }
 0x53a   :  { %v7237_v53 = vadd.f32 1.0, %v10557_v43  ;;  %v6552_v34 = vadd.f32 %v13544_v47, %v8966_v58  ;;  %v6546_v61 = vpop.f32.mrb[211].mxu1 }
 0x53b   :  { %10566 = vrcp.f32 %v7238_v16  ;;  %v6547_v6 = vadd.f32 %v13544_v47, %v6546_v61 }
 0x53c   :  { %10568 = vrcp.f32 %v7237_v53  ;;  %v8461_v40 = vmul.f32 -1.442695, %v6552_v34 }
 0x53d   :  { %v10559_v51 = vpop.eup %10558  ;;  %v8460_v54 = vmul.f32 -1.442695, %v6547_v6 }
 0x53e   :  { %v10561_v7 = vpop.eup %10560  ;;  %7620 = vst [vmem:[#allocation2 + $0x268] sm:$0xff] %v10559_v51  ;;  %10570 = vpow2.f32 %v8461_v40 }
 0x53f   :  { %7619 = vst [vmem:[#allocation2 + $0x260] sm:$0xff] %v10561_v7  ;;  %10572 = vpow2.f32 %v8460_v54 }
 0x540   :  { %v10563_v38 = vpop.eup %10562 }
 0x541   :  { %v10565_v13 = vpop.eup %10564  ;;  %v7240_v33 = vadd.f32 1.0, %v10563_v38  ;;  %v8969_v2 = vpop.f32.mrb[212].mxu1 }
 0x542   :  { %v7239_v25 = vadd.f32 1.0, %v10565_v13  ;;  %v6562_v19 = vadd.f32 %v13544_v47, %v8969_v2  ;;  %v6556_v18 = vpop.f32.mrb[213].mxu1 }
 0x543   :  { %10574 = vrcp.f32 %v7240_v33  ;;  %v6557_v8 = vadd.f32 %v13544_v47, %v6556_v18 }
 0x544   :  { %10576 = vrcp.f32 %v7239_v25  ;;  %v8463_v23 = vmul.f32 -1.442695, %v6562_v19 }
 0x545   :  { %v10567_v27 = vpop.eup %10566  ;;  %v8462_v46 = vmul.f32 -1.442695, %v6557_v8 }
 0x546   :  { %v10569_v50 = vpop.eup %10568  ;;  %7622 = vst [vmem:[#allocation2 + $0x278] sm:$0xff] %v10567_v27  ;;  %10578 = vpow2.f32 %v8463_v23 }
 0x547   :  { %7621 = vst [vmem:[#allocation2 + $0x270] sm:$0xff] %v10569_v50  ;;  %10580 = vpow2.f32 %v8462_v46 }
 0x548   :  { %v10571_v35 = vpop.eup %10570 }
 0x549   :  { %v10573_v22 = vpop.eup %10572  ;;  %v7242_v30 = vadd.f32 1.0, %v10571_v35  ;;  %v8972_v3 = vpop.f32.mrb[214].mxu1 }
 0x54a   :  { %v7241_v4 = vadd.f32 1.0, %v10573_v22  ;;  %v6572_v63 = vadd.f32 %v13544_v47, %v8972_v3  ;;  %v6566_v59 = vpop.f32.mrb[215].mxu1 }
 0x54b   :  { %10582 = vrcp.f32 %v7242_v30  ;;  %v6567_v15 = vadd.f32 %v13544_v47, %v6566_v59 }
 0x54c   :  { %10584 = vrcp.f32 %v7241_v4  ;;  %v8465_v56 = vmul.f32 -1.442695, %v6572_v63 }
 0x54d   :  { %v10575_v28 = vpop.eup %10574  ;;  %v8464_v57 = vmul.f32 -1.442695, %v6567_v15 }
 0x54e   :  { %v10577_v39 = vpop.eup %10576  ;;  %7624 = vst [vmem:[#allocation2 + $0x288] sm:$0xff] %v10575_v28  ;;  %10586 = vpow2.f32 %v8465_v56 }
 0x54f   :  { %7623 = vst [vmem:[#allocation2 + $0x280] sm:$0xff] %v10577_v39  ;;  %10588 = vpow2.f32 %v8464_v57 }
 0x550   :  { %v10579_v60 = vpop.eup %10578 }
 0x551   :  { %v10581_v52 = vpop.eup %10580  ;;  %v7244_v1 = vadd.f32 1.0, %v10579_v60  ;;  %v8975_v55 = vpop.f32.mrb[216].mxu1 }
 0x552   :  { %v7243_v10 = vadd.f32 1.0, %v10581_v52  ;;  %v6582_v48 = vadd.f32 %v13544_v47, %v8975_v55  ;;  %v6576_v31 = vpop.f32.mrb[217].mxu1 }
 0x553   :  { %10590 = vrcp.f32 %v7244_v1  ;;  %v6577_v24 = vadd.f32 %v13544_v47, %v6576_v31 }
 0x554   :  { %10592 = vrcp.f32 %v7243_v10  ;;  %v8467_v41 = vmul.f32 -1.442695, %v6582_v48 }
 0x555   :  { %v10583_v49 = vpop.eup %10582  ;;  %v8466_v5 = vmul.f32 -1.442695, %v6577_v24 }
 0x556   :  { %v10585_v26 = vpop.eup %10584  ;;  %7626 = vst [vmem:[#allocation2 + $0x298] sm:$0xff] %v10583_v49  ;;  %10594 = vpow2.f32 %v8467_v41 }
 0x557   :  { %7625 = vst [vmem:[#allocation2 + $0x290] sm:$0xff] %v10585_v26  ;;  %10596 = vpow2.f32 %v8466_v5 }
 0x558   :  { %v10587_v12 = vpop.eup %10586 }
 0x559   :  { %v10589_v62 = vpop.eup %10588  ;;  %v7246_v17 = vadd.f32 1.0, %v10587_v12  ;;  %v8978_v44 = vpop.f32.mrb[218].mxu1 }
 0x55a   :  { %v7245_v11 = vadd.f32 1.0, %v10589_v62  ;;  %v6592_v37 = vadd.f32 %v13544_v47, %v8978_v44  ;;  %v6586_v32 = vpop.f32.mrb[219].mxu1 }
 0x55b   :  { %10598 = vrcp.f32 %v7246_v17  ;;  %v6587_v45 = vadd.f32 %v13544_v47, %v6586_v32 }
 0x55c   :  { %10600 = vrcp.f32 %v7245_v11  ;;  %v8469_v9 = vmul.f32 -1.442695, %v6592_v37 }
 0x55d   :  { %v10591_v0 = vpop.eup %10590  ;;  %v8468_v21 = vmul.f32 -1.442695, %v6587_v45 }
 0x55e   :  { %v10593_v29 = vpop.eup %10592  ;;  %7628 = vst [vmem:[#allocation2 + $0x2a8] sm:$0xff] %v10591_v0  ;;  %10602 = vpow2.f32 %v8469_v9 }
 0x55f   :  { %7627 = vst [vmem:[#allocation2 + $0x2a0] sm:$0xff] %v10593_v29  ;;  %10604 = vpow2.f32 %v8468_v21 }
 0x560   :  { %v10595_v36 = vpop.eup %10594 }
 0x561   :  { %v10597_v14 = vpop.eup %10596  ;;  %v7248_v20 = vadd.f32 1.0, %v10595_v36  ;;  %v8981_v42 = vpop.f32.mrb[220].mxu1 }
 0x562   :  { %v7247_v43 = vadd.f32 1.0, %v10597_v14  ;;  %v6602_v16 = vadd.f32 %v13544_v47, %v8981_v42  ;;  %v6596_v58 = vpop.f32.mrb[221].mxu1 }
 0x563   :  { %10606 = vrcp.f32 %v7248_v20  ;;  %v6597_v53 = vadd.f32 %v13544_v47, %v6596_v58 }
 0x564   :  { %10608 = vrcp.f32 %v7247_v43  ;;  %v8471_v34 = vmul.f32 -1.442695, %v6602_v16 }
 0x565   :  { %v10599_v61 = vpop.eup %10598  ;;  %v8470_v6 = vmul.f32 -1.442695, %v6597_v53 }
 0x566   :  { %v10601_v40 = vpop.eup %10600  ;;  %7630 = vst [vmem:[#allocation2 + $0x2b8] sm:$0xff] %v10599_v61  ;;  %10610 = vpow2.f32 %v8471_v34 }
 0x567   :  { %7629 = vst [vmem:[#allocation2 + $0x2b0] sm:$0xff] %v10601_v40  ;;  %10612 = vpow2.f32 %v8470_v6 }
 0x568   :  { %v10603_v51 = vpop.eup %10602 }
 0x569   :  { %v10605_v54 = vpop.eup %10604  ;;  %v7250_v7 = vadd.f32 1.0, %v10603_v51  ;;  %v8984_v38 = vpop.f32.mrb[222].mxu1 }
 0x56a   :  { %v7249_v13 = vadd.f32 1.0, %v10605_v54  ;;  %v6612_v33 = vadd.f32 %v13544_v47, %v8984_v38  ;;  %v6606_v2 = vpop.f32.mrb[223].mxu1 }
 0x56b   :  { %10614 = vrcp.f32 %v7250_v7  ;;  %v6607_v25 = vadd.f32 %v13544_v47, %v6606_v2 }
 0x56c   :  { %10616 = vrcp.f32 %v7249_v13  ;;  %v8473_v19 = vmul.f32 -1.442695, %v6612_v33 }
 0x56d   :  { %v10607_v18 = vpop.eup %10606  ;;  %v8472_v8 = vmul.f32 -1.442695, %v6607_v25 }
 0x56e   :  { %v10609_v23 = vpop.eup %10608  ;;  %7632 = vst [vmem:[#allocation2 + $0x2c8] sm:$0xff] %v10607_v18  ;;  %10618 = vpow2.f32 %v8473_v19 }
 0x56f   :  { %7631 = vst [vmem:[#allocation2 + $0x2c0] sm:$0xff] %v10609_v23  ;;  %10620 = vpow2.f32 %v8472_v8 }
 0x570   :  { %v10611_v27 = vpop.eup %10610 }
 0x571   :  { %v10613_v46 = vpop.eup %10612  ;;  %v7252_v50 = vadd.f32 1.0, %v10611_v27  ;;  %v8987_v35 = vpop.f32.mrb[224].mxu1 }
 0x572   :  { %v7251_v22 = vadd.f32 1.0, %v10613_v46  ;;  %v6622_v30 = vadd.f32 %v13544_v47, %v8987_v35  ;;  %v6616_v3 = vpop.f32.mrb[225].mxu1 }
 0x573   :  { %10622 = vrcp.f32 %v7252_v50  ;;  %v6617_v4 = vadd.f32 %v13544_v47, %v6616_v3 }
 0x574   :  { %10624 = vrcp.f32 %v7251_v22  ;;  %v8475_v63 = vmul.f32 -1.442695, %v6622_v30 }
 0x575   :  { %v10615_v59 = vpop.eup %10614  ;;  %v8474_v15 = vmul.f32 -1.442695, %v6617_v4 }
 0x576   :  { %v10617_v56 = vpop.eup %10616  ;;  %7634 = vst [vmem:[#allocation2 + $0x2d8] sm:$0xff] %v10615_v59  ;;  %10626 = vpow2.f32 %v8475_v63 }
 0x577   :  { %7633 = vst [vmem:[#allocation2 + $0x2d0] sm:$0xff] %v10617_v56  ;;  %10628 = vpow2.f32 %v8474_v15 }
 0x578   :  { %v10619_v28 = vpop.eup %10618 }
 0x579   :  { %v10621_v57 = vpop.eup %10620  ;;  %v7254_v39 = vadd.f32 1.0, %v10619_v28  ;;  %v8990_v60 = vpop.f32.mrb[226].mxu1 }
 0x57a   :  { %v7253_v52 = vadd.f32 1.0, %v10621_v57  ;;  %v6632_v1 = vadd.f32 %v13544_v47, %v8990_v60  ;;  %v6626_v55 = vpop.f32.mrb[227].mxu1 }
 0x57b   :  { %10630 = vrcp.f32 %v7254_v39  ;;  %v6627_v10 = vadd.f32 %v13544_v47, %v6626_v55 }
 0x57c   :  { %10632 = vrcp.f32 %v7253_v52  ;;  %v8477_v48 = vmul.f32 -1.442695, %v6632_v1 }
 0x57d   :  { %v10623_v31 = vpop.eup %10622  ;;  %v8476_v24 = vmul.f32 -1.442695, %v6627_v10 }
 0x57e   :  { %v10625_v41 = vpop.eup %10624  ;;  %7636 = vst [vmem:[#allocation2 + $0x2e8] sm:$0xff] %v10623_v31  ;;  %10634 = vpow2.f32 %v8477_v48 }
 0x57f   :  { %7635 = vst [vmem:[#allocation2 + $0x2e0] sm:$0xff] %v10625_v41  ;;  %10636 = vpow2.f32 %v8476_v24 }
 0x580   :  { %v10627_v49 = vpop.eup %10626 }
 0x581   :  { %v10629_v5 = vpop.eup %10628  ;;  %v7256_v26 = vadd.f32 1.0, %v10627_v49  ;;  %v8993_v12 = vpop.f32.mrb[228].mxu1 }
 0x582   :  { %v7255_v62 = vadd.f32 1.0, %v10629_v5  ;;  %v6642_v17 = vadd.f32 %v13544_v47, %v8993_v12  ;;  %v6636_v44 = vpop.f32.mrb[229].mxu1 }
 0x583   :  { %10638 = vrcp.f32 %v7256_v26  ;;  %v6637_v11 = vadd.f32 %v13544_v47, %v6636_v44 }
 0x584   :  { %10640 = vrcp.f32 %v7255_v62  ;;  %v8479_v37 = vmul.f32 -1.442695, %v6642_v17 }
 0x585   :  { %v10631_v32 = vpop.eup %10630  ;;  %v8478_v45 = vmul.f32 -1.442695, %v6637_v11 }
 0x586   :  { %v10633_v9 = vpop.eup %10632  ;;  %7638 = vst [vmem:[#allocation2 + $0x2f8] sm:$0xff] %v10631_v32  ;;  %10642 = vpow2.f32 %v8479_v37 }
 0x587   :  { %7637 = vst [vmem:[#allocation2 + $0x2f0] sm:$0xff] %v10633_v9  ;;  %10644 = vpow2.f32 %v8478_v45 }
 0x588   :  { %v10635_v0 = vpop.eup %10634 }
 0x589   :  { %v10637_v21 = vpop.eup %10636  ;;  %v7258_v29 = vadd.f32 1.0, %v10635_v0  ;;  %v8996_v36 = vpop.f32.mrb[230].mxu1 }
 0x58a   :  { %v7257_v14 = vadd.f32 1.0, %v10637_v21  ;;  %v6652_v20 = vadd.f32 %v13544_v47, %v8996_v36  ;;  %v6646_v42 = vpop.f32.mrb[231].mxu1 }
 0x58b   :  { %10646 = vrcp.f32 %v7258_v29  ;;  %v6647_v43 = vadd.f32 %v13544_v47, %v6646_v42 }
 0x58c   :  { %10648 = vrcp.f32 %v7257_v14  ;;  %v8481_v16 = vmul.f32 -1.442695, %v6652_v20 }
 0x58d   :  { %v10639_v58 = vpop.eup %10638  ;;  %v8480_v53 = vmul.f32 -1.442695, %v6647_v43 }
 0x58e   :  { %v10641_v34 = vpop.eup %10640  ;;  %7640 = vst [vmem:[#allocation2 + $0x308] sm:$0xff] %v10639_v58  ;;  %10650 = vpow2.f32 %v8481_v16 }
 0x58f   :  { %7639 = vst [vmem:[#allocation2 + $0x300] sm:$0xff] %v10641_v34  ;;  %10652 = vpow2.f32 %v8480_v53 }
 0x590   :  { %v10643_v61 = vpop.eup %10642 }
 0x591   :  { %v10645_v6 = vpop.eup %10644  ;;  %v7260_v40 = vadd.f32 1.0, %v10643_v61  ;;  %v8999_v51 = vpop.f32.mrb[232].mxu1 }
 0x592   :  { %v7259_v54 = vadd.f32 1.0, %v10645_v6  ;;  %v6662_v7 = vadd.f32 %v13544_v47, %v8999_v51  ;;  %v6656_v38 = vpop.f32.mrb[233].mxu1 }
 0x593   :  { %10654 = vrcp.f32 %v7260_v40  ;;  %v6657_v13 = vadd.f32 %v13544_v47, %v6656_v38 }
 0x594   :  { %10656 = vrcp.f32 %v7259_v54  ;;  %v8483_v33 = vmul.f32 -1.442695, %v6662_v7 }
 0x595   :  { %v10647_v2 = vpop.eup %10646  ;;  %v8482_v25 = vmul.f32 -1.442695, %v6657_v13 }
 0x596   :  { %v10649_v19 = vpop.eup %10648  ;;  %7642 = vst [vmem:[#allocation2 + $0x318] sm:$0xff] %v10647_v2  ;;  %10658 = vpow2.f32 %v8483_v33 }
 0x597   :  { %7641 = vst [vmem:[#allocation2 + $0x310] sm:$0xff] %v10649_v19  ;;  %10660 = vpow2.f32 %v8482_v25 }
 0x598   :  { %v10651_v18 = vpop.eup %10650 }
 0x599   :  { %v10653_v8 = vpop.eup %10652  ;;  %v7262_v23 = vadd.f32 1.0, %v10651_v18  ;;  %v9002_v27 = vpop.f32.mrb[234].mxu1 }
 0x59a   :  { %v7261_v46 = vadd.f32 1.0, %v10653_v8  ;;  %v6672_v50 = vadd.f32 %v13544_v47, %v9002_v27  ;;  %v6666_v35 = vpop.f32.mrb[235].mxu1 }
 0x59b   :  { %10662 = vrcp.f32 %v7262_v23  ;;  %v6667_v22 = vadd.f32 %v13544_v47, %v6666_v35 }
 0x59c   :  { %10664 = vrcp.f32 %v7261_v46  ;;  %v8485_v30 = vmul.f32 -1.442695, %v6672_v50 }
 0x59d   :  { %v10655_v3 = vpop.eup %10654  ;;  %v8484_v4 = vmul.f32 -1.442695, %v6667_v22 }
 0x59e   :  { %v10657_v63 = vpop.eup %10656  ;;  %7644 = vst [vmem:[#allocation2 + $0x328] sm:$0xff] %v10655_v3  ;;  %10666 = vpow2.f32 %v8485_v30 }
 0x59f   :  { %7643 = vst [vmem:[#allocation2 + $0x320] sm:$0xff] %v10657_v63  ;;  %10668 = vpow2.f32 %v8484_v4 }
 0x5a0   :  { %v10659_v59 = vpop.eup %10658 }
 0x5a1   :  { %v10661_v15 = vpop.eup %10660  ;;  %v7264_v56 = vadd.f32 1.0, %v10659_v59  ;;  %v9005_v28 = vpop.f32.mrb[236].mxu1 }
 0x5a2   :  { %v7263_v57 = vadd.f32 1.0, %v10661_v15  ;;  %v6682_v39 = vadd.f32 %v13544_v47, %v9005_v28  ;;  %v6676_v60 = vpop.f32.mrb[237].mxu1 }
 0x5a3   :  { %10670 = vrcp.f32 %v7264_v56  ;;  %v6677_v52 = vadd.f32 %v13544_v47, %v6676_v60 }
 0x5a4   :  { %10672 = vrcp.f32 %v7263_v57  ;;  %v8487_v1 = vmul.f32 -1.442695, %v6682_v39 }
 0x5a5   :  { %v10663_v55 = vpop.eup %10662  ;;  %v8486_v10 = vmul.f32 -1.442695, %v6677_v52 }
 0x5a6   :  { %v10665_v48 = vpop.eup %10664  ;;  %7646 = vst [vmem:[#allocation2 + $0x338] sm:$0xff] %v10663_v55  ;;  %10674 = vpow2.f32 %v8487_v1 }
 0x5a7   :  { %7645 = vst [vmem:[#allocation2 + $0x330] sm:$0xff] %v10665_v48  ;;  %10676 = vpow2.f32 %v8486_v10 }
 0x5a8   :  { %v10667_v31 = vpop.eup %10666 }
 0x5a9   :  { %v10669_v24 = vpop.eup %10668  ;;  %v7266_v41 = vadd.f32 1.0, %v10667_v31  ;;  %v9008_v49 = vpop.f32.mrb[238].mxu1 }
 0x5aa   :  { %v7265_v5 = vadd.f32 1.0, %v10669_v24  ;;  %v6692_v26 = vadd.f32 %v13544_v47, %v9008_v49  ;;  %v6686_v12 = vpop.f32.mrb[239].mxu1 }
 0x5ab   :  { %10678 = vrcp.f32 %v7266_v41  ;;  %v6687_v62 = vadd.f32 %v13544_v47, %v6686_v12 }
 0x5ac   :  { %10680 = vrcp.f32 %v7265_v5  ;;  %v8489_v17 = vmul.f32 -1.442695, %v6692_v26 }
 0x5ad   :  { %v10671_v44 = vpop.eup %10670  ;;  %v8488_v11 = vmul.f32 -1.442695, %v6687_v62 }
 0x5ae   :  { %v10673_v37 = vpop.eup %10672  ;;  %7648 = vst [vmem:[#allocation2 + $0x348] sm:$0xff] %v10671_v44  ;;  %10682 = vpow2.f32 %v8489_v17 }
 0x5af   :  { %7647 = vst [vmem:[#allocation2 + $0x340] sm:$0xff] %v10673_v37  ;;  %10684 = vpow2.f32 %v8488_v11 }
 0x5b0   :  { %v10675_v32 = vpop.eup %10674 }
 0x5b1   :  { %v10677_v45 = vpop.eup %10676  ;;  %v7268_v9 = vadd.f32 1.0, %v10675_v32  ;;  %v9011_v0 = vpop.f32.mrb[240].mxu1 }
 0x5b2   :  { %v7267_v21 = vadd.f32 1.0, %v10677_v45  ;;  %v6702_v29 = vadd.f32 %v13544_v47, %v9011_v0  ;;  %v6696_v36 = vpop.f32.mrb[241].mxu1 }
 0x5b3   :  { %10686 = vrcp.f32 %v7268_v9  ;;  %v6697_v14 = vadd.f32 %v13544_v47, %v6696_v36  ;;  %v10763_v9 = vld [vmem:[%s13637_s4] ss:$0 sm:$0xff]  ;;  %s10789_s4 = smov [#allocation2]  }
 0x5b4   :  { %10688 = vrcp.f32 %v7267_v21  ;;  %v8491_v20 = vmul.f32 -1.442695, %v6702_v29  ;;  %s7676_s28 = sshll.u32 %s10789_s4, 4  ;;  %s7677_s28 = int_to_ptr.vmem [resolvable:$true] %s7676_s28 }
 0x5b5   :  { %v10679_v42 = vpop.eup %10678  ;;  %v8490_v43 = vmul.f32 -1.442695, %v6697_v14  ;;  %s10764_s29 = scalar_lea.vmem %s7677_s28, 16384  ;;  %p10769_p1 = scmp.lt.s32.totalorder %s7677_s28, %s7677_s28 }
 0x5b6   :  { %v10681_v16 = vpop.eup %10680  ;;  %7650 = vst [vmem:[#allocation2 + $0x358] sm:$0xff] %v10679_v42  ;;  %10690 = vpow2.f32 %v8491_v20  ;;  %p10765_p0 = scmp.ne.s32.totalorder %s7677_s28, %s10764_s29  ;;  %p10770_p2 = scmp.lt.s32.totalorder %s10764_s29, %s10764_s29 }
 0x5b7   :  { %7649 = vst [vmem:[#allocation2 + $0x350] sm:$0xff] %v10681_v16  ;;  %10692 = vpow2.f32 %v8490_v43 }
 0x5b8   :  { %v10683_v58 = vpop.eup %10682  ;;  %p10771_p3 = por %p10770_p2, %p10769_p1 }
 0x5b9   :  { %v10685_v53 = vpop.eup %10684  ;;  %v7270_v34 = vadd.f32 1.0, %v10683_v58  ;;  %v9014_v61 = vpop.f32.mrb[242].mxu1 }
 0x5ba   :  { %v7269_v6 = vadd.f32 1.0, %v10685_v53  ;;  %v6712_v40 = vadd.f32 %v13544_v47, %v9014_v61  ;;  %v6706_v51 = vpop.f32.mrb[243].mxu1  ;;  %p10772_p4 = pnand %p10771_p3, %p10765_p0 }
 0x5bb   :  { %10694 = vrcp.f32 %v7270_v34  ;;  %v6707_v54 = vadd.f32 %v13544_v47, %v6706_v51 }
 0x5bc   :  { %10696 = vrcp.f32 %v7269_v6  ;;  %v8493_v7 = vmul.f32 -1.442695, %v6712_v40 }
 0x5bd   :  { %v10687_v38 = vpop.eup %10686  ;;  %v8492_v13 = vmul.f32 -1.442695, %v6707_v54 }
 0x5be   :  { %v10689_v33 = vpop.eup %10688  ;;  %7652 = vst [vmem:[#allocation2 + $0x368] sm:$0xff] %v10687_v38  ;;  %10698 = vpow2.f32 %v8493_v7 }
 0x5bf   :  { %7651 = vst [vmem:[#allocation2 + $0x360] sm:$0xff] %v10689_v33  ;;  %10700 = vpow2.f32 %v8492_v13 }
 0x5c0   :  { %v10691_v2 = vpop.eup %10690 }
 0x5c1   :  { %v10693_v25 = vpop.eup %10692  ;;  %v7272_v19 = vadd.f32 1.0, %v10691_v2  ;;  %v9017_v18 = vpop.f32.mrb[244].mxu1 }
 0x5c2   :  { %v7271_v8 = vadd.f32 1.0, %v10693_v25  ;;  %v6722_v23 = vadd.f32 %v13544_v47, %v9017_v18  ;;  %v6716_v27 = vpop.f32.mrb[245].mxu1 }
 0x5c3   :  { %10702 = vrcp.f32 %v7272_v19  ;;  %v6717_v46 = vadd.f32 %v13544_v47, %v6716_v27 }
 0x5c4   :  { %10704 = vrcp.f32 %v7271_v8  ;;  %v8495_v50 = vmul.f32 -1.442695, %v6722_v23 }
 0x5c5   :  { %v10695_v35 = vpop.eup %10694  ;;  %v8494_v22 = vmul.f32 -1.442695, %v6717_v46 }
 0x5c6   :  { %v10697_v30 = vpop.eup %10696  ;;  %7654 = vst [vmem:[#allocation2 + $0x378] sm:$0xff] %v10695_v35  ;;  %10706 = vpow2.f32 %v8495_v50 }
 0x5c7   :  { %7653 = vst [vmem:[#allocation2 + $0x370] sm:$0xff] %v10697_v30  ;;  %10708 = vpow2.f32 %v8494_v22 }
 0x5c8   :  { %v10699_v3 = vpop.eup %10698 }
 0x5c9   :  { %v10701_v4 = vpop.eup %10700  ;;  %v7274_v63 = vadd.f32 1.0, %v10699_v3  ;;  %v9020_v59 = vpop.f32.mrb[246].mxu1 }
 0x5ca   :  { %v7273_v15 = vadd.f32 1.0, %v10701_v4  ;;  %v6732_v56 = vadd.f32 %v13544_v47, %v9020_v59  ;;  %v6726_v28 = vpop.f32.mrb[247].mxu1 }
 0x5cb   :  { %10710 = vrcp.f32 %v7274_v63  ;;  %v6727_v57 = vadd.f32 %v13544_v47, %v6726_v28 }
 0x5cc   :  { %10712 = vrcp.f32 %v7273_v15  ;;  %v8497_v39 = vmul.f32 -1.442695, %v6732_v56 }
 0x5cd   :  { %v10703_v60 = vpop.eup %10702  ;;  %v8496_v52 = vmul.f32 -1.442695, %v6727_v57 }
 0x5ce   :  { %v10705_v1 = vpop.eup %10704  ;;  %7656 = vst [vmem:[#allocation2 + $0x388] sm:$0xff] %v10703_v60  ;;  %10714 = vpow2.f32 %v8497_v39 }
 0x5cf   :  { %7655 = vst [vmem:[#allocation2 + $0x380] sm:$0xff] %v10705_v1  ;;  %10716 = vpow2.f32 %v8496_v52 }
 0x5d0   :  { %v10707_v55 = vpop.eup %10706 }
 0x5d1   :  { %v10709_v10 = vpop.eup %10708  ;;  %v7276_v48 = vadd.f32 1.0, %v10707_v55  ;;  %v9023_v31 = vpop.f32.mrb[248].mxu1 }
 0x5d2   :  { %v7275_v24 = vadd.f32 1.0, %v10709_v10  ;;  %v6742_v41 = vadd.f32 %v13544_v47, %v9023_v31  ;;  %v6736_v49 = vpop.f32.mrb[249].mxu1 }
 0x5d3   :  { %10718 = vrcp.f32 %v7276_v48  ;;  %v6737_v5 = vadd.f32 %v13544_v47, %v6736_v49 }
 0x5d4   :  { %10720 = vrcp.f32 %v7275_v24  ;;  %v8499_v26 = vmul.f32 -1.442695, %v6742_v41 }
 0x5d5   :  { %v10711_v12 = vpop.eup %10710  ;;  %v8498_v62 = vmul.f32 -1.442695, %v6737_v5 }
 0x5d6   :  { %v10713_v17 = vpop.eup %10712  ;;  %7658 = vst [vmem:[#allocation2 + $0x398] sm:$0xff] %v10711_v12  ;;  %10722 = vpow2.f32 %v8499_v26 }
 0x5d7   :  { %7657 = vst [vmem:[#allocation2 + $0x390] sm:$0xff] %v10713_v17  ;;  %10724 = vpow2.f32 %v8498_v62 }
 0x5d8   :  { %v10715_v44 = vpop.eup %10714 }
 0x5d9   :  { %v10717_v11 = vpop.eup %10716  ;;  %v7278_v37 = vadd.f32 1.0, %v10715_v44  ;;  %v9026_v32 = vpop.f32.mrb[250].mxu1 }
 0x5da   :  { %v7277_v45 = vadd.f32 1.0, %v10717_v11  ;;  %v6752_v0 = vadd.f32 %v10763_v9, %v9026_v32  ;;  %v6746_v47 = vpop.f32.mrb[251].mxu1 }
 0x5db   :  { %10726 = vrcp.f32 %v7278_v37  ;;  %v6747_v21 = vadd.f32 %v10763_v9, %v6746_v47 }
 0x5dc   :  { %10728 = vrcp.f32 %v7277_v45  ;;  %v8501_v29 = vmul.f32 -1.442695, %v6752_v0 }
 0x5dd   :  { %v10719_v36 = vpop.eup %10718  ;;  %v8500_v14 = vmul.f32 -1.442695, %v6747_v21 }
 0x5de   :  { %v10721_v20 = vpop.eup %10720  ;;  %7660 = vst [vmem:[#allocation2 + $0x3a8] sm:$0xff] %v10719_v36  ;;  %10730 = vpow2.f32 %v8501_v29 }
 0x5df   :  { %7659 = vst [vmem:[#allocation2 + $0x3a0] sm:$0xff] %v10721_v20  ;;  %10732 = vpow2.f32 %v8500_v14 }
 0x5e0   :  { %v10723_v42 = vpop.eup %10722 }
 0x5e1   :  { %v10725_v43 = vpop.eup %10724  ;;  %v7280_v16 = vadd.f32 1.0, %v10723_v42  ;;  %v9029_v58 = vpop.f32.mrb[252].mxu1 }
 0x5e2   :  { %v7279_v53 = vadd.f32 1.0, %v10725_v43  ;;  %v6762_v34 = vadd.f32 %v10763_v9, %v9029_v58  ;;  %v6756_v61 = vpop.f32.mrb[253].mxu1 }
 0x5e3   :  { %10734 = vrcp.f32 %v7280_v16  ;;  %v6757_v6 = vadd.f32 %v10763_v9, %v6756_v61 }
 0x5e4   :  { %10736 = vrcp.f32 %v7279_v53  ;;  %v8503_v40 = vmul.f32 -1.442695, %v6762_v34 }
 0x5e5   :  { %v10727_v51 = vpop.eup %10726  ;;  %v8502_v54 = vmul.f32 -1.442695, %v6757_v6 }
 0x5e6   :  { %v10729_v7 = vpop.eup %10728  ;;  %7662 = vst [vmem:[#allocation2 + $0x3b8] sm:$0xff] %v10727_v51  ;;  %10738 = vpow2.f32 %v8503_v40 }
 0x5e7   :  { %7661 = vst [vmem:[#allocation2 + $0x3b0] sm:$0xff] %v10729_v7  ;;  %10740 = vpow2.f32 %v8502_v54 }
 0x5e8   :  { %v10731_v38 = vpop.eup %10730 }
 0x5e9   :  { %v10733_v13 = vpop.eup %10732  ;;  %v7282_v33 = vadd.f32 1.0, %v10731_v38  ;;  %v9032_v2 = vpop.f32.mrb[254].mxu1 }
 0x5ea   :  { %v7281_v25 = vadd.f32 1.0, %v10733_v13  ;;  %v6772_v19 = vadd.f32 %v10763_v9, %v9032_v2  ;;  %v6766_v18 = vpop.f32.mrb[255].mxu1 }
 0x5eb   :  { %10742 = vrcp.f32 %v7282_v33  ;;  %v6767_v8 = vadd.f32 %v10763_v9, %v6766_v18 }
 0x5ec   :  { %10744 = vrcp.f32 %v7281_v25  ;;  %v8505_v23 = vmul.f32 -1.442695, %v6772_v19 }
 0x5ed   :  { %v10735_v27 = vpop.eup %10734  ;;  %v8504_v46 = vmul.f32 -1.442695, %v6767_v8 }
 0x5ee   :  { %v10737_v50 = vpop.eup %10736  ;;  %7664 = vst [vmem:[#allocation2 + $0x3c8] sm:$0xff] %v10735_v27  ;;  %10746 = vpow2.f32 %v8505_v23 }
 0x5ef   :  { %7663 = vst [vmem:[#allocation2 + $0x3c0] sm:$0xff] %v10737_v50  ;;  %10748 = vpow2.f32 %v8504_v46 }
 0x5f0   :  { %v10739_v35 = vpop.eup %10738 }
 0x5f1   :  { %v10741_v22 = vpop.eup %10740  ;;  %v7284_v30 = vadd.f32 1.0, %v10739_v35 }
 0x5f2   :  { %v7283_v3 = vadd.f32 1.0, %v10741_v22 }
 0x5f3   :  { %10750 = vrcp.f32 %v7284_v30 }
 0x5f4   :  { %10752 = vrcp.f32 %v7283_v3 }
 0x5f5   :  { %v10743_v4 = vpop.eup %10742 }
 0x5f6   :  { %v10745_v63 = vpop.eup %10744  ;;  %7666 = vst [vmem:[#allocation2 + $0x3d8] sm:$0xff] %v10743_v4 }
 0x5f7   :  { %7665 = vst [vmem:[#allocation2 + $0x3d0] sm:$0xff] %v10745_v63 }
 0x5f8   :  { %v10747_v59 = vpop.eup %10746 }
 0x5f9   :  { %v10749_v15 = vpop.eup %10748  ;;  %v7286_v56 = vadd.f32 1.0, %v10747_v59 }
 0x5fa   :  { %v7285_v28 = vadd.f32 1.0, %v10749_v15 }
 0x5fb   :  { %10754 = vrcp.f32 %v7286_v56 }
 0x5fc   :  { %10756 = vrcp.f32 %v7285_v28 }
 0x5fd   :  { %v10751_v57 = vpop.eup %10750 }
 0x5fe   :  { %v10753_v39 = vpop.eup %10752  ;;  %7668 = vst [vmem:[#allocation2 + $0x3e8] sm:$0xff] %v10751_v57 }
 0x5ff   :  { %7667 = vst [vmem:[#allocation2 + $0x3e0] sm:$0xff] %v10753_v39 }
 0x605   :  { %v10755_v60 = vpop.eup %10754 }
 0x606   :  { %v10757_v52 = vpop.eup %10756  ;;  %7670 = vst [vmem:[#allocation2 + $0x3f8] sm:$0xff] %v10755_v60 }
 0x607   :  { %7669 = vst [vmem:[#allocation2 + $0x3f0] sm:$0xff] %v10757_v52 }
 0x608   :  { %10775 = shalt.err (!%p10772_p4)
}
 0x609   :  { %s10776_s7 = scalar_lea.hbm %s13638_s5, 16384 }
 0x60a   :  { %p10777_p5 = scmp.ne.s32.totalorder %s13638_s5, %s10776_s7  ;;  %p10780_p6 = scmp.lt.u32.totalorder %s10776_s7, %s13638_s5 }
 0x60c   :  { %p10782_p7 = pnand %p10780_p6, %p10777_p5 }
 0x60e   :  { %10785 = shalt.err (!%p10782_p7)
}
 0x60f   :  { %s10790_s1 = smov 128   ;;  %s10791_s3 = smov 8  }
 0x610   :  { %7682 = dma.vmem_to_hbm [thread:$0]  %s7677_s28, 16384, %s13638_s5, [#allocation3], %s10790_s1, %s10790_s1, %s10791_s3  }
 0x611   :  { %10786 = dma.done.wait [#allocation3], 16384  }
 0x612   :  { %10787 = vsyncadd [#allocation3], 4294950912 }
 0x613   :  { %7686 = vsyncpa [#allocation3], 1 }

</bundles_post_ra>
